<compile_context>
chip_gen: v7x
topology: tpu7x:2x2x1
jax: 0.10.0
libtpu: 0.0.40
codegen_flags: <defaults>
</compile_context>

<pallas_src>
import math

import jax
import jax.numpy as jnp
from jax.experimental import pallas as pl
from jax.experimental.pallas import tpu as pltpu

# ----------------------------- config ---------------------------------------
HIDDEN = 128          # hidden_size
INTER = 256           # intermediate_size
LAYERS = 2            # num_hidden_layers
HEADS = 4             # num_attention_heads
HEAD_DIM = HIDDEN // HEADS
CHANNELS = 3          # num_channels
IMAGE = 32            # image_size
PATCH = 8             # patch_size
GRID_HW = IMAGE // PATCH
NUM_PATCHES = GRID_HW * GRID_HW            # 16  (seq len per image)
CPP = CHANNELS * PATCH * PATCH             # 192 (flattened patch dim)
CPP_PAD = 256                              # padded to a lane-friendly 2*128
EPS = 1e-6
SCALE = HEAD_DIM ** (-0.5)
BATCH = 2
NEG_INF = -1e30


# ------------------------------ math helpers ---------------------------------
def _layernorm(h, w, b):
    mu = jnp.mean(h, axis=-1, keepdims=True)
    var = jnp.mean((h - mu) ** 2, axis=-1, keepdims=True)
    return (h - mu) * jax.lax.rsqrt(var + EPS) * w + b


def _gelu_tanh(x):
    c = math.sqrt(2.0 / math.pi)
    return 0.5 * x * (1.0 + jnp.tanh(c * (x + 0.044715 * x * x * x)))


# ------------------------------ fused kernel ----------------------------------
def siglip_fused_kernel(
    patches_ref,    # (B*S, CPP_PAD)
    pos_ref,        # (B*S, D)      position table, pre-tiled over batch
    bias_ref,       # (B*S, B*S)    0 inside a batch item, -1e30 across items
    pw_ref,         # (CPP_PAD, D)  patch-embed weight (zero-padded rows)
    pb_ref,         # (1, D)        patch-embed bias
    ln_ref,         # (LAYERS, 4, D)   rows: ln1_w, ln1_b, ln2_w, ln2_b
    wqkv_ref,       # (LAYERS, D, 3D)
    bqkv_ref,       # (LAYERS, 1, 3D)
    wo_ref,         # (LAYERS, D, D)
    bo_ref,         # (LAYERS, 1, D)
    w1_ref,         # (LAYERS, D, INTER)
    b1_ref,         # (LAYERS, 1, INTER)
    w2_ref,         # (LAYERS, INTER, D)
    b2_ref,         # (LAYERS, 1, D)
    postln_ref,     # (2, D)        rows: weight, bias
    out_ref,        # (B*S, D)
):
    # ---- patch embedding + position embedding ----
    x = (
        jnp.dot(patches_ref[...], pw_ref[...], preferred_element_type=jnp.float32)
        + pb_ref[...]
        + pos_ref[...]
    )

    attn_bias = bias_ref[...]   # block-diagonal additive mask over batch items

    # ---- encoder layers (static unrolled) ----
    for li in range(LAYERS):
        ln = ln_ref[li]                                   # (4, D)
        ln1w, ln1b = ln[0:1, :], ln[1:2, :]
        ln2w, ln2b = ln[2:3, :], ln[3:4, :]
        wqkv, bqkv = wqkv_ref[li], bqkv_ref[li]
        wo, bo = wo_ref[li], bo_ref[li]
        w1, b1 = w1_ref[li], b1_ref[li]
        w2, b2 = w2_ref[li], b2_ref[li]

        # ---- attention block ----
        h = _layernorm(x, ln1w, ln1b)
        qkv = jnp.dot(h, wqkv, preferred_element_type=jnp.float32) + bqkv  # (BS, 3D)

        ctx_parts = []
        for hd in range(HEADS):                           # static unrolled heads
            q = qkv[:, hd * HEAD_DIM:(hd + 1) * HEAD_DIM]
            k = qkv[:, HIDDEN + hd * HEAD_DIM:HIDDEN + (hd + 1) * HEAD_DIM]
            v = qkv[:, 2 * HIDDEN + hd * HEAD_DIM:2 * HIDDEN + (hd + 1) * HEAD_DIM]
            s = jnp.dot(q, k.T, preferred_element_type=jnp.float32) * SCALE
            s = s + attn_bias                             # keep attention within batch item
            s = s - jnp.max(s, axis=-1, keepdims=True)    # f32 softmax
            p = jnp.exp(s)
            p = p * pl.reciprocal(jnp.sum(p, axis=-1, keepdims=True), approx=True)
            ctx_parts.append(jnp.dot(p, v, preferred_element_type=jnp.float32))
        ctx = jnp.concatenate(ctx_parts, axis=-1)         # (BS, D)

        attn_out = jnp.dot(ctx, wo, preferred_element_type=jnp.float32) + bo
        x = x + attn_out

        # ---- MLP block (applied twice with layer_norm2 between — reference quirk) ----
        def mlp(z):
            z1 = jnp.dot(z, w1, preferred_element_type=jnp.float32) + b1
            z1 = _gelu_tanh(z1)
            return jnp.dot(z1, w2, preferred_element_type=jnp.float32) + b2

        r = x
        h2 = mlp(x)
        h2 = _layernorm(h2, ln2w, ln2b)
        h2 = mlp(h2)
        x = r + h2

    # ---- post layernorm ----
    out_ref[...] = _layernorm(x, postln_ref[0:1, :], postln_ref[1:2, :])


# ------------------------------ forward wrapper --------------------------------
@jax.jit
def siglip_vision_forward(pixel_values, params):
    # pixel_values: (B, C, H, W) NCHW, like PyTorch.
    B, C, H, W = pixel_values.shape
    Hp, Wp = H // PATCH, W // PATCH
    S = Hp * Wp
    BS = B * S

    # Conv2d(kernel=stride=patch, 'valid') == per-patch flatten (C, ph, pw) @ W.
    x = pixel_values.reshape(B, C, Hp, PATCH, Wp, PATCH)
    x = x.transpose(0, 2, 4, 1, 3, 5)                    # (B, Hp, Wp, C, P, P)
    patches = x.reshape(B, S, CPP).astype(jnp.float32)
    patches = jnp.pad(patches, ((0, 0), (0, 0), (0, CPP_PAD - CPP)))
    patches = patches.reshape(BS, CPP_PAD)

    pos = jnp.tile(params["pos_emb"], (B, 1))            # (BS, D)

    # Block-diagonal additive attention bias: 0 within a batch item, -1e30 across.
    rb = jax.lax.broadcasted_iota(jnp.int32, (BS, BS), 0) // S
    cb = jax.lax.broadcasted_iota(jnp.int32, (BS, BS), 1) // S
    attn_bias = jnp.where(rb == cb, 0.0, NEG_INF).astype(jnp.float32)

    vmem = pl.BlockSpec(memory_space=pltpu.MemorySpace.VMEM)
    out = pl.pallas_call(
        siglip_fused_kernel,
        out_shape=jax.ShapeDtypeStruct((BS, HIDDEN), jnp.float32),
        in_specs=[vmem] * 15,
        out_specs=vmem,
    )(
        patches, pos, attn_bias,
        params["patch_w"], params["patch_b"],
        params["ln"],
        params["wqkv"], params["bqkv"],
        params["wo"], params["bo"],
        params["w1"], params["b1"],
        params["w2"], params["b2"],
        params["post_ln"],
    )
    return out.reshape(B, S, HIDDEN)


# ------------------------------ parameter init ---------------------------------
def init_params(key):
    def nrm(k, shape, scale=0.02):
        return (scale * jax.random.normal(k, shape)).astype(jnp.float32)

    keys = jax.random.split(key, 3 + LAYERS)

    # Conv2d(num_channels, hidden, kernel=patch, stride=patch) weight (D, C, P, P)
    conv_w = nrm(keys[0], (HIDDEN, CHANNELS, PATCH, PATCH))
    patch_w = conv_w.reshape(HIDDEN, CPP).T              # (CPP, D), in -> out
    patch_w = jnp.pad(patch_w, ((0, CPP_PAD - CPP), (0, 0)))   # zero-pad K to 256

    params = {
        "patch_w": patch_w,                              # (CPP_PAD, D)
        "patch_b": nrm(keys[1], (1, HIDDEN)),
        "pos_emb": nrm(keys[2], (NUM_PATCHES, HIDDEN)),  # nn.Embedding table
        "post_ln": jnp.concatenate(
            [jnp.ones((1, HIDDEN), jnp.float32), jnp.zeros((1, HIDDEN), jnp.float32)], axis=0
        ),                                               # (2, D)
    }

    ln_l, wqkv_l, bqkv_l, wo_l, bo_l, w1_l, b1_l, w2_l, b2_l = ([] for _ in range(9))
    for li in range(LAYERS):
        lk = jax.random.split(keys[3 + li], 12)
        # Linear weights stored pre-transposed as (in, out): y = x @ W + b
        wq, wk, wv = (nrm(lk[0], (HIDDEN, HIDDEN)), nrm(lk[1], (HIDDEN, HIDDEN)),
                      nrm(lk[2], (HIDDEN, HIDDEN)))
        bq, bk, bv = nrm(lk[3], (HIDDEN,)), nrm(lk[4], (HIDDEN,)), nrm(lk[5], (HIDDEN,))
        wqkv_l.append(jnp.concatenate([wq, wk, wv], axis=1))            # (D, 3D)
        bqkv_l.append(jnp.concatenate([bq, bk, bv])[None, :])           # (1, 3D)
        wo_l.append(nrm(lk[6], (HIDDEN, HIDDEN)))
        bo_l.append(nrm(lk[7], (HIDDEN,))[None, :])
        w1_l.append(nrm(lk[8], (HIDDEN, INTER)))
        b1_l.append(nrm(lk[9], (INTER,))[None, :])
        w2_l.append(nrm(lk[10], (INTER, HIDDEN)))
        b2_l.append(nrm(lk[11], (HIDDEN,))[None, :])
        ln_l.append(jnp.stack([jnp.ones(HIDDEN), jnp.zeros(HIDDEN),
                               jnp.ones(HIDDEN), jnp.zeros(HIDDEN)]).astype(jnp.float32))

    params["ln"] = jnp.stack(ln_l)        # (LAYERS, 4, D)
    params["wqkv"] = jnp.stack(wqkv_l)    # (LAYERS, D, 3D)
    params["bqkv"] = jnp.stack(bqkv_l)    # (LAYERS, 1, 3D)
    params["wo"] = jnp.stack(wo_l)        # (LAYERS, D, D)
    params["bo"] = jnp.stack(bo_l)        # (LAYERS, 1, D)
    params["w1"] = jnp.stack(w1_l)        # (LAYERS, D, INTER)
    params["b1"] = jnp.stack(b1_l)        # (LAYERS, 1, INTER)
    params["w2"] = jnp.stack(w2_l)        # (LAYERS, INTER, D)
    params["b2"] = jnp.stack(b2_l)        # (LAYERS, 1, D)
    return params


# ------------------------------ main -------------------------------------------
if __name__ == "__main__":
    key = jax.random.PRNGKey(0)
    k_params, k_input = jax.random.split(key)
    params = init_params(k_params)

    pixel_values = jax.random.normal(
        k_input, (BATCH, CHANNELS, IMAGE, IMAGE), dtype=jnp.float32
    )

    out = siglip_vision_forward(pixel_values, params)
    out = jax.block_until_ready(out)

    assert out.shape == (BATCH, NUM_PATCHES, HIDDEN), out.shape
    assert bool(jnp.all(jnp.isfinite(out)))
    print("KERNEL_OK")
</pallas_src>

<mosaic_0001>
module attributes {stable_mosaic.version = 11 : i64} {
  func.func @siglip_fused_kernel(%arg0: memref<32x256xf32, #tpu.memory_space<vmem>>, %arg1: memref<32x128xf32, #tpu.memory_space<vmem>>, %arg2: memref<32x32xf32, #tpu.memory_space<vmem>>, %arg3: memref<256x128xf32, #tpu.memory_space<vmem>>, %arg4: memref<1x128xf32, #tpu.memory_space<vmem>>, %arg5: memref<2x4x128xf32, #tpu.memory_space<vmem>>, %arg6: memref<2x128x384xf32, #tpu.memory_space<vmem>>, %arg7: memref<2x1x384xf32, #tpu.memory_space<vmem>>, %arg8: memref<2x128x128xf32, #tpu.memory_space<vmem>>, %arg9: memref<2x1x128xf32, #tpu.memory_space<vmem>>, %arg10: memref<2x128x256xf32, #tpu.memory_space<vmem>>, %arg11: memref<2x1x256xf32, #tpu.memory_space<vmem>>, %arg12: memref<2x256x128xf32, #tpu.memory_space<vmem>>, %arg13: memref<2x1x128xf32, #tpu.memory_space<vmem>>, %arg14: memref<2x128xf32, #tpu.memory_space<vmem>>, %arg15: memref<32x128xf32, #tpu.memory_space<vmem>>) attributes {dimension_semantics = [], scalar_prefetch = 0 : i64, scratch_operands = 0 : i64, tpu.core_type = #tpu.core_type<tc>} {
    %c0 = arith.constant 0 : index
    %c0_0 = arith.constant 0 : index
    %0 = vector.load %arg0[%c0, %c0_0] : memref<32x256xf32, #tpu.memory_space<vmem>>, vector<32x256xf32>
    %c0_1 = arith.constant 0 : index
    %c0_2 = arith.constant 0 : index
    %1 = vector.load %arg3[%c0_1, %c0_2] : memref<256x128xf32, #tpu.memory_space<vmem>>, vector<256x128xf32>
    %cst = arith.constant dense<0.000000e+00> : vector<32x128xf32>
    %2 = tpu.matmul %0, %1, %cst {dimension_numbers = #tpu.dot_dimension_numbers<[1], [0], [0], [1], [0, 0, 1, 1], [], []>} : vector<32x256xf32>, vector<256x128xf32>, vector<32x128xf32> -> vector<32x128xf32>
    %c0_3 = arith.constant 0 : index
    %c0_4 = arith.constant 0 : index
    %3 = vector.load %arg4[%c0_3, %c0_4] : memref<1x128xf32, #tpu.memory_space<vmem>>, vector<1x128xf32>
    %4 = vector.broadcast %3 : vector<1x128xf32> to vector<32x128xf32>
    %5 = arith.addf %2, %4 : vector<32x128xf32>
    %c0_5 = arith.constant 0 : index
    %c0_6 = arith.constant 0 : index
    %6 = vector.load %arg1[%c0_5, %c0_6] : memref<32x128xf32, #tpu.memory_space<vmem>>, vector<32x128xf32>
    %7 = arith.addf %5, %6 : vector<32x128xf32>
    %c0_7 = arith.constant 0 : index
    %c0_8 = arith.constant 0 : index
    %8 = vector.load %arg2[%c0_7, %c0_8] : memref<32x32xf32, #tpu.memory_space<vmem>>, vector<32x32xf32>
    %c0_9 = arith.constant 0 : index
    %c0_10 = arith.constant 0 : index
    %c0_11 = arith.constant 0 : index
    %9 = vector.load %arg5[%c0_9, %c0_10, %c0_11] : memref<2x4x128xf32, #tpu.memory_space<vmem>>, vector<1x4x128xf32>
    %10 = vector.shape_cast %9 : vector<1x4x128xf32> to vector<4x128xf32>
    %11 = vector.extract_strided_slice %10 {offsets = [0, 0], sizes = [1, 128], strides = [1, 1]} : vector<4x128xf32> to vector<1x128xf32>
    %12 = vector.extract_strided_slice %10 {offsets = [1, 0], sizes = [1, 128], strides = [1, 1]} : vector<4x128xf32> to vector<1x128xf32>
    %13 = vector.extract_strided_slice %10 {offsets = [2, 0], sizes = [1, 128], strides = [1, 1]} : vector<4x128xf32> to vector<1x128xf32>
    %14 = vector.extract_strided_slice %10 {offsets = [3, 0], sizes = [1, 128], strides = [1, 1]} : vector<4x128xf32> to vector<1x128xf32>
    %c0_12 = arith.constant 0 : index
    %c0_13 = arith.constant 0 : index
    %c0_14 = arith.constant 0 : index
    %15 = vector.load %arg6[%c0_12, %c0_13, %c0_14] : memref<2x128x384xf32, #tpu.memory_space<vmem>>, vector<1x128x384xf32>
    %16 = vector.shape_cast %15 : vector<1x128x384xf32> to vector<128x384xf32>
    %c0_15 = arith.constant 0 : index
    %c0_16 = arith.constant 0 : index
    %c0_17 = arith.constant 0 : index
    %17 = vector.load %arg7[%c0_15, %c0_16, %c0_17] : memref<2x1x384xf32, #tpu.memory_space<vmem>>, vector<1x1x384xf32>
    %18 = vector.shape_cast %17 : vector<1x1x384xf32> to vector<1x384xf32>
    %c0_18 = arith.constant 0 : index
    %c0_19 = arith.constant 0 : index
    %c0_20 = arith.constant 0 : index
    %19 = vector.load %arg8[%c0_18, %c0_19, %c0_20] : memref<2x128x128xf32, #tpu.memory_space<vmem>>, vector<1x128x128xf32>
    %20 = vector.shape_cast %19 : vector<1x128x128xf32> to vector<128x128xf32>
    %c0_21 = arith.constant 0 : index
    %c0_22 = arith.constant 0 : index
    %c0_23 = arith.constant 0 : index
    %21 = vector.load %arg9[%c0_21, %c0_22, %c0_23] : memref<2x1x128xf32, #tpu.memory_space<vmem>>, vector<1x1x128xf32>
    %22 = vector.shape_cast %21 : vector<1x1x128xf32> to vector<1x128xf32>
    %c0_24 = arith.constant 0 : index
    %c0_25 = arith.constant 0 : index
    %c0_26 = arith.constant 0 : index
    %23 = vector.load %arg10[%c0_24, %c0_25, %c0_26] : memref<2x128x256xf32, #tpu.memory_space<vmem>>, vector<1x128x256xf32>
    %24 = vector.shape_cast %23 : vector<1x128x256xf32> to vector<128x256xf32>
    %c0_27 = arith.constant 0 : index
    %c0_28 = arith.constant 0 : index
    %c0_29 = arith.constant 0 : index
    %25 = vector.load %arg11[%c0_27, %c0_28, %c0_29] : memref<2x1x256xf32, #tpu.memory_space<vmem>>, vector<1x1x256xf32>
    %26 = vector.shape_cast %25 : vector<1x1x256xf32> to vector<1x256xf32>
    %c0_30 = arith.constant 0 : index
    %c0_31 = arith.constant 0 : index
    %c0_32 = arith.constant 0 : index
    %27 = vector.load %arg12[%c0_30, %c0_31, %c0_32] : memref<2x256x128xf32, #tpu.memory_space<vmem>>, vector<1x256x128xf32>
    %28 = vector.shape_cast %27 : vector<1x256x128xf32> to vector<256x128xf32>
    %c0_33 = arith.constant 0 : index
    %c0_34 = arith.constant 0 : index
    %c0_35 = arith.constant 0 : index
    %29 = vector.load %arg13[%c0_33, %c0_34, %c0_35] : memref<2x1x128xf32, #tpu.memory_space<vmem>>, vector<1x1x128xf32>
    %30 = vector.shape_cast %29 : vector<1x1x128xf32> to vector<1x128xf32>
    %cst_36 = arith.constant dense<0.000000e+00> : vector<32xf32>
    %31 = vector.multi_reduction <add>, %7, %cst_36 [1] : vector<32x128xf32> to vector<32xf32>
    %32 = vector.shape_cast %31 : vector<32xf32> to vector<32x1xf32>
    %cst_37 = arith.constant 1.280000e+02 : f32
    %33 = vector.broadcast %cst_37 : f32 to vector<32x1xf32>
    %34 = arith.divf %32, %33 : vector<32x1xf32>
    %35 = vector.broadcast %34 : vector<32x1xf32> to vector<32x128xf32>
    %36 = arith.subf %7, %35 : vector<32x128xf32>
    %37 = arith.mulf %36, %36 : vector<32x128xf32>
    %cst_38 = arith.constant dense<0.000000e+00> : vector<32xf32>
    %38 = vector.multi_reduction <add>, %37, %cst_38 [1] : vector<32x128xf32> to vector<32xf32>
    %39 = vector.shape_cast %38 : vector<32xf32> to vector<32x1xf32>
    %cst_39 = arith.constant 1.280000e+02 : f32
    %40 = vector.broadcast %cst_39 : f32 to vector<32x1xf32>
    %41 = arith.divf %39, %40 : vector<32x1xf32>
    %42 = vector.broadcast %34 : vector<32x1xf32> to vector<32x128xf32>
    %43 = arith.subf %7, %42 : vector<32x128xf32>
    %cst_40 = arith.constant 9.99999997E-7 : f32
    %44 = vector.broadcast %cst_40 : f32 to vector<32x1xf32>
    %45 = arith.addf %41, %44 : vector<32x1xf32>
    %46 = math.rsqrt %45 : vector<32x1xf32>
    %47 = vector.broadcast %46 : vector<32x1xf32> to vector<32x128xf32>
    %48 = arith.mulf %43, %47 : vector<32x128xf32>
    %49 = vector.broadcast %11 : vector<1x128xf32> to vector<32x128xf32>
    %50 = arith.mulf %48, %49 : vector<32x128xf32>
    %51 = vector.broadcast %12 : vector<1x128xf32> to vector<32x128xf32>
    %52 = arith.addf %50, %51 : vector<32x128xf32>
    %cst_41 = arith.constant dense<0.000000e+00> : vector<32x384xf32>
    %53 = tpu.matmul %52, %16, %cst_41 {dimension_numbers = #tpu.dot_dimension_numbers<[1], [0], [0], [1], [0, 0, 1, 1], [], []>} : vector<32x128xf32>, vector<128x384xf32>, vector<32x384xf32> -> vector<32x384xf32>
    %54 = vector.broadcast %18 : vector<1x384xf32> to vector<32x384xf32>
    %55 = arith.addf %53, %54 : vector<32x384xf32>
    %56 = vector.extract_strided_slice %55 {offsets = [0, 0], sizes = [32, 32], strides = [1, 1]} : vector<32x384xf32> to vector<32x32xf32>
    %57 = vector.extract_strided_slice %55 {offsets = [0, 128], sizes = [32, 32], strides = [1, 1]} : vector<32x384xf32> to vector<32x32xf32>
    %58 = vector.extract_strided_slice %55 {offsets = [0, 256], sizes = [32, 32], strides = [1, 1]} : vector<32x384xf32> to vector<32x32xf32>
    %59 = tpu.transpose %57, [1, 0] : vector<32x32xf32> -> vector<32x32xf32>
    %cst_42 = arith.constant dense<0.000000e+00> : vector<32x32xf32>
    %60 = tpu.matmul %56, %59, %cst_42 {dimension_numbers = #tpu.dot_dimension_numbers<[1], [0], [0], [1], [0, 0, 1, 1], [], []>} : vector<32x32xf32>, vector<32x32xf32>, vector<32x32xf32> -> vector<32x32xf32>
    %cst_43 = arith.constant 0.176776692 : f32
    %61 = vector.broadcast %cst_43 : f32 to vector<32x32xf32>
    %62 = arith.mulf %60, %61 : vector<32x32xf32>
    %63 = arith.addf %62, %8 : vector<32x32xf32>
    %cst_44 = arith.constant dense<0xFF800000> : vector<32xf32>
    %64 = vector.multi_reduction <maximumf>, %63, %cst_44 [1] : vector<32x32xf32> to vector<32xf32>
    %65 = vector.shape_cast %64 : vector<32xf32> to vector<32x1xf32>
    %66 = vector.broadcast %65 : vector<32x1xf32> to vector<32x32xf32>
    %67 = arith.subf %63, %66 : vector<32x32xf32>
    %68 = math.exp %67 : vector<32x32xf32>
    %cst_45 = arith.constant dense<0.000000e+00> : vector<32xf32>
    %69 = vector.multi_reduction <add>, %68, %cst_45 [1] : vector<32x32xf32> to vector<32xf32>
    %70 = vector.shape_cast %69 : vector<32xf32> to vector<32x1xf32>
    %71 = tpu.reciprocal %70 {approx = true} : vector<32x1xf32> -> vector<32x1xf32>
    %72 = vector.broadcast %71 : vector<32x1xf32> to vector<32x32xf32>
    %73 = arith.mulf %68, %72 : vector<32x32xf32>
    %cst_46 = arith.constant dense<0.000000e+00> : vector<32x32xf32>
    %74 = tpu.matmul %73, %58, %cst_46 {dimension_numbers = #tpu.dot_dimension_numbers<[1], [0], [0], [1], [0, 0, 1, 1], [], []>} : vector<32x32xf32>, vector<32x32xf32>, vector<32x32xf32> -> vector<32x32xf32>
    %75 = vector.extract_strided_slice %55 {offsets = [0, 32], sizes = [32, 32], strides = [1, 1]} : vector<32x384xf32> to vector<32x32xf32>
    %76 = vector.extract_strided_slice %55 {offsets = [0, 160], sizes = [32, 32], strides = [1, 1]} : vector<32x384xf32> to vector<32x32xf32>
    %77 = vector.extract_strided_slice %55 {offsets = [0, 288], sizes = [32, 32], strides = [1, 1]} : vector<32x384xf32> to vector<32x32xf32>
    %78 = tpu.transpose %76, [1, 0] : vector<32x32xf32> -> vector<32x32xf32>
    %cst_47 = arith.constant dense<0.000000e+00> : vector<32x32xf32>
    %79 = tpu.matmul %75, %78, %cst_47 {dimension_numbers = #tpu.dot_dimension_numbers<[1], [0], [0], [1], [0, 0, 1, 1], [], []>} : vector<32x32xf32>, vector<32x32xf32>, vector<32x32xf32> -> vector<32x32xf32>
    %cst_48 = arith.constant 0.176776692 : f32
    %80 = vector.broadcast %cst_48 : f32 to vector<32x32xf32>
    %81 = arith.mulf %79, %80 : vector<32x32xf32>
    %82 = arith.addf %81, %8 : vector<32x32xf32>
    %cst_49 = arith.constant dense<0xFF800000> : vector<32xf32>
    %83 = vector.multi_reduction <maximumf>, %82, %cst_49 [1] : vector<32x32xf32> to vector<32xf32>
    %84 = vector.shape_cast %83 : vector<32xf32> to vector<32x1xf32>
    %85 = vector.broadcast %84 : vector<32x1xf32> to vector<32x32xf32>
    %86 = arith.subf %82, %85 : vector<32x32xf32>
    %87 = math.exp %86 : vector<32x32xf32>
    %cst_50 = arith.constant dense<0.000000e+00> : vector<32xf32>
    %88 = vector.multi_reduction <add>, %87, %cst_50 [1] : vector<32x32xf32> to vector<32xf32>
    %89 = vector.shape_cast %88 : vector<32xf32> to vector<32x1xf32>
    %90 = tpu.reciprocal %89 {approx = true} : vector<32x1xf32> -> vector<32x1xf32>
    %91 = vector.broadcast %90 : vector<32x1xf32> to vector<32x32xf32>
    %92 = arith.mulf %87, %91 : vector<32x32xf32>
    %cst_51 = arith.constant dense<0.000000e+00> : vector<32x32xf32>
    %93 = tpu.matmul %92, %77, %cst_51 {dimension_numbers = #tpu.dot_dimension_numbers<[1], [0], [0], [1], [0, 0, 1, 1], [], []>} : vector<32x32xf32>, vector<32x32xf32>, vector<32x32xf32> -> vector<32x32xf32>
    %94 = vector.extract_strided_slice %55 {offsets = [0, 64], sizes = [32, 32], strides = [1, 1]} : vector<32x384xf32> to vector<32x32xf32>
    %95 = vector.extract_strided_slice %55 {offsets = [0, 192], sizes = [32, 32], strides = [1, 1]} : vector<32x384xf32> to vector<32x32xf32>
    %96 = vector.extract_strided_slice %55 {offsets = [0, 320], sizes = [32, 32], strides = [1, 1]} : vector<32x384xf32> to vector<32x32xf32>
    %97 = tpu.transpose %95, [1, 0] : vector<32x32xf32> -> vector<32x32xf32>
    %cst_52 = arith.constant dense<0.000000e+00> : vector<32x32xf32>
    %98 = tpu.matmul %94, %97, %cst_52 {dimension_numbers = #tpu.dot_dimension_numbers<[1], [0], [0], [1], [0, 0, 1, 1], [], []>} : vector<32x32xf32>, vector<32x32xf32>, vector<32x32xf32> -> vector<32x32xf32>
    %cst_53 = arith.constant 0.176776692 : f32
    %99 = vector.broadcast %cst_53 : f32 to vector<32x32xf32>
    %100 = arith.mulf %98, %99 : vector<32x32xf32>
    %101 = arith.addf %100, %8 : vector<32x32xf32>
    %cst_54 = arith.constant dense<0xFF800000> : vector<32xf32>
    %102 = vector.multi_reduction <maximumf>, %101, %cst_54 [1] : vector<32x32xf32> to vector<32xf32>
    %103 = vector.shape_cast %102 : vector<32xf32> to vector<32x1xf32>
    %104 = vector.broadcast %103 : vector<32x1xf32> to vector<32x32xf32>
    %105 = arith.subf %101, %104 : vector<32x32xf32>
    %106 = math.exp %105 : vector<32x32xf32>
    %cst_55 = arith.constant dense<0.000000e+00> : vector<32xf32>
    %107 = vector.multi_reduction <add>, %106, %cst_55 [1] : vector<32x32xf32> to vector<32xf32>
    %108 = vector.shape_cast %107 : vector<32xf32> to vector<32x1xf32>
    %109 = tpu.reciprocal %108 {approx = true} : vector<32x1xf32> -> vector<32x1xf32>
    %110 = vector.broadcast %109 : vector<32x1xf32> to vector<32x32xf32>
    %111 = arith.mulf %106, %110 : vector<32x32xf32>
    %cst_56 = arith.constant dense<0.000000e+00> : vector<32x32xf32>
    %112 = tpu.matmul %111, %96, %cst_56 {dimension_numbers = #tpu.dot_dimension_numbers<[1], [0], [0], [1], [0, 0, 1, 1], [], []>} : vector<32x32xf32>, vector<32x32xf32>, vector<32x32xf32> -> vector<32x32xf32>
    %113 = vector.extract_strided_slice %55 {offsets = [0, 96], sizes = [32, 32], strides = [1, 1]} : vector<32x384xf32> to vector<32x32xf32>
    %114 = vector.extract_strided_slice %55 {offsets = [0, 224], sizes = [32, 32], strides = [1, 1]} : vector<32x384xf32> to vector<32x32xf32>
    %115 = vector.extract_strided_slice %55 {offsets = [0, 352], sizes = [32, 32], strides = [1, 1]} : vector<32x384xf32> to vector<32x32xf32>
    %116 = tpu.transpose %114, [1, 0] : vector<32x32xf32> -> vector<32x32xf32>
    %cst_57 = arith.constant dense<0.000000e+00> : vector<32x32xf32>
    %117 = tpu.matmul %113, %116, %cst_57 {dimension_numbers = #tpu.dot_dimension_numbers<[1], [0], [0], [1], [0, 0, 1, 1], [], []>} : vector<32x32xf32>, vector<32x32xf32>, vector<32x32xf32> -> vector<32x32xf32>
    %cst_58 = arith.constant 0.176776692 : f32
    %118 = vector.broadcast %cst_58 : f32 to vector<32x32xf32>
    %119 = arith.mulf %117, %118 : vector<32x32xf32>
    %120 = arith.addf %119, %8 : vector<32x32xf32>
    %cst_59 = arith.constant dense<0xFF800000> : vector<32xf32>
    %121 = vector.multi_reduction <maximumf>, %120, %cst_59 [1] : vector<32x32xf32> to vector<32xf32>
    %122 = vector.shape_cast %121 : vector<32xf32> to vector<32x1xf32>
    %123 = vector.broadcast %122 : vector<32x1xf32> to vector<32x32xf32>
    %124 = arith.subf %120, %123 : vector<32x32xf32>
    %125 = math.exp %124 : vector<32x32xf32>
    %cst_60 = arith.constant dense<0.000000e+00> : vector<32xf32>
    %126 = vector.multi_reduction <add>, %125, %cst_60 [1] : vector<32x32xf32> to vector<32xf32>
    %127 = vector.shape_cast %126 : vector<32xf32> to vector<32x1xf32>
    %128 = tpu.reciprocal %127 {approx = true} : vector<32x1xf32> -> vector<32x1xf32>
    %129 = vector.broadcast %128 : vector<32x1xf32> to vector<32x32xf32>
    %130 = arith.mulf %125, %129 : vector<32x32xf32>
    %cst_61 = arith.constant dense<0.000000e+00> : vector<32x32xf32>
    %131 = tpu.matmul %130, %115, %cst_61 {dimension_numbers = #tpu.dot_dimension_numbers<[1], [0], [0], [1], [0, 0, 1, 1], [], []>} : vector<32x32xf32>, vector<32x32xf32>, vector<32x32xf32> -> vector<32x32xf32>
    %132 = tpu.concatenate %74, %93, %112, %131 in 1 : vector<32x32xf32>, vector<32x32xf32>, vector<32x32xf32>, vector<32x32xf32> -> vector<32x128xf32>
    %cst_62 = arith.constant dense<0.000000e+00> : vector<32x128xf32>
    %133 = tpu.matmul %132, %20, %cst_62 {dimension_numbers = #tpu.dot_dimension_numbers<[1], [0], [0], [1], [0, 0, 1, 1], [], []>} : vector<32x128xf32>, vector<128x128xf32>, vector<32x128xf32> -> vector<32x128xf32>
    %134 = vector.broadcast %22 : vector<1x128xf32> to vector<32x128xf32>
    %135 = arith.addf %133, %134 : vector<32x128xf32>
    %136 = arith.addf %7, %135 : vector<32x128xf32>
    %cst_63 = arith.constant dense<0.000000e+00> : vector<32x256xf32>
    %137 = tpu.matmul %136, %24, %cst_63 {dimension_numbers = #tpu.dot_dimension_numbers<[1], [0], [0], [1], [0, 0, 1, 1], [], []>} : vector<32x128xf32>, vector<128x256xf32>, vector<32x256xf32> -> vector<32x256xf32>
    %138 = vector.broadcast %26 : vector<1x256xf32> to vector<32x256xf32>
    %139 = arith.addf %137, %138 : vector<32x256xf32>
    %cst_64 = arith.constant 5.000000e-01 : f32
    %140 = vector.broadcast %cst_64 : f32 to vector<32x256xf32>
    %141 = arith.mulf %140, %139 : vector<32x256xf32>
    %cst_65 = arith.constant 4.471500e-02 : f32
    %142 = vector.broadcast %cst_65 : f32 to vector<32x256xf32>
    %143 = arith.mulf %142, %139 : vector<32x256xf32>
    %144 = arith.mulf %143, %139 : vector<32x256xf32>
    %145 = arith.mulf %144, %139 : vector<32x256xf32>
    %146 = arith.addf %139, %145 : vector<32x256xf32>
    %cst_66 = arith.constant 0.797884583 : f32
    %147 = vector.broadcast %cst_66 : f32 to vector<32x256xf32>
    %148 = arith.mulf %147, %146 : vector<32x256xf32>
    %149 = math.tanh %148 : vector<32x256xf32>
    %cst_67 = arith.constant 1.000000e+00 : f32
    %150 = vector.broadcast %cst_67 : f32 to vector<32x256xf32>
    %151 = arith.addf %150, %149 : vector<32x256xf32>
    %152 = arith.mulf %141, %151 : vector<32x256xf32>
    %cst_68 = arith.constant dense<0.000000e+00> : vector<32x128xf32>
    %153 = tpu.matmul %152, %28, %cst_68 {dimension_numbers = #tpu.dot_dimension_numbers<[1], [0], [0], [1], [0, 0, 1, 1], [], []>} : vector<32x256xf32>, vector<256x128xf32>, vector<32x128xf32> -> vector<32x128xf32>
    %154 = vector.broadcast %30 : vector<1x128xf32> to vector<32x128xf32>
    %155 = arith.addf %153, %154 : vector<32x128xf32>
    %cst_69 = arith.constant dense<0.000000e+00> : vector<32xf32>
    %156 = vector.multi_reduction <add>, %155, %cst_69 [1] : vector<32x128xf32> to vector<32xf32>
    %157 = vector.shape_cast %156 : vector<32xf32> to vector<32x1xf32>
    %cst_70 = arith.constant 1.280000e+02 : f32
    %158 = vector.broadcast %cst_70 : f32 to vector<32x1xf32>
    %159 = arith.divf %157, %158 : vector<32x1xf32>
    %160 = vector.broadcast %159 : vector<32x1xf32> to vector<32x128xf32>
    %161 = arith.subf %155, %160 : vector<32x128xf32>
    %162 = arith.mulf %161, %161 : vector<32x128xf32>
    %cst_71 = arith.constant dense<0.000000e+00> : vector<32xf32>
    %163 = vector.multi_reduction <add>, %162, %cst_71 [1] : vector<32x128xf32> to vector<32xf32>
    %164 = vector.shape_cast %163 : vector<32xf32> to vector<32x1xf32>
    %cst_72 = arith.constant 1.280000e+02 : f32
    %165 = vector.broadcast %cst_72 : f32 to vector<32x1xf32>
    %166 = arith.divf %164, %165 : vector<32x1xf32>
    %167 = vector.broadcast %159 : vector<32x1xf32> to vector<32x128xf32>
    %168 = arith.subf %155, %167 : vector<32x128xf32>
    %cst_73 = arith.constant 9.99999997E-7 : f32
    %169 = vector.broadcast %cst_73 : f32 to vector<32x1xf32>
    %170 = arith.addf %166, %169 : vector<32x1xf32>
    %171 = math.rsqrt %170 : vector<32x1xf32>
    %172 = vector.broadcast %171 : vector<32x1xf32> to vector<32x128xf32>
    %173 = arith.mulf %168, %172 : vector<32x128xf32>
    %174 = vector.broadcast %13 : vector<1x128xf32> to vector<32x128xf32>
    %175 = arith.mulf %173, %174 : vector<32x128xf32>
    %176 = vector.broadcast %14 : vector<1x128xf32> to vector<32x128xf32>
    %177 = arith.addf %175, %176 : vector<32x128xf32>
    %cst_74 = arith.constant dense<0.000000e+00> : vector<32x256xf32>
    %178 = tpu.matmul %177, %24, %cst_74 {dimension_numbers = #tpu.dot_dimension_numbers<[1], [0], [0], [1], [0, 0, 1, 1], [], []>} : vector<32x128xf32>, vector<128x256xf32>, vector<32x256xf32> -> vector<32x256xf32>
    %179 = vector.broadcast %26 : vector<1x256xf32> to vector<32x256xf32>
    %180 = arith.addf %178, %179 : vector<32x256xf32>
    %cst_75 = arith.constant 5.000000e-01 : f32
    %181 = vector.broadcast %cst_75 : f32 to vector<32x256xf32>
    %182 = arith.mulf %181, %180 : vector<32x256xf32>
    %cst_76 = arith.constant 4.471500e-02 : f32
    %183 = vector.broadcast %cst_76 : f32 to vector<32x256xf32>
    %184 = arith.mulf %183, %180 : vector<32x256xf32>
    %185 = arith.mulf %184, %180 : vector<32x256xf32>
    %186 = arith.mulf %185, %180 : vector<32x256xf32>
    %187 = arith.addf %180, %186 : vector<32x256xf32>
    %cst_77 = arith.constant 0.797884583 : f32
    %188 = vector.broadcast %cst_77 : f32 to vector<32x256xf32>
    %189 = arith.mulf %188, %187 : vector<32x256xf32>
    %190 = math.tanh %189 : vector<32x256xf32>
    %cst_78 = arith.constant 1.000000e+00 : f32
    %191 = vector.broadcast %cst_78 : f32 to vector<32x256xf32>
    %192 = arith.addf %191, %190 : vector<32x256xf32>
    %193 = arith.mulf %182, %192 : vector<32x256xf32>
    %cst_79 = arith.constant dense<0.000000e+00> : vector<32x128xf32>
    %194 = tpu.matmul %193, %28, %cst_79 {dimension_numbers = #tpu.dot_dimension_numbers<[1], [0], [0], [1], [0, 0, 1, 1], [], []>} : vector<32x256xf32>, vector<256x128xf32>, vector<32x128xf32> -> vector<32x128xf32>
    %195 = vector.broadcast %30 : vector<1x128xf32> to vector<32x128xf32>
    %196 = arith.addf %194, %195 : vector<32x128xf32>
    %197 = arith.addf %136, %196 : vector<32x128xf32>
    %c1 = arith.constant 1 : index
    %c0_80 = arith.constant 0 : index
    %c0_81 = arith.constant 0 : index
    %198 = vector.load %arg5[%c1, %c0_80, %c0_81] : memref<2x4x128xf32, #tpu.memory_space<vmem>>, vector<1x4x128xf32>
    %199 = vector.shape_cast %198 : vector<1x4x128xf32> to vector<4x128xf32>
    %200 = vector.extract_strided_slice %199 {offsets = [0, 0], sizes = [1, 128], strides = [1, 1]} : vector<4x128xf32> to vector<1x128xf32>
    %201 = vector.extract_strided_slice %199 {offsets = [1, 0], sizes = [1, 128], strides = [1, 1]} : vector<4x128xf32> to vector<1x128xf32>
    %202 = vector.extract_strided_slice %199 {offsets = [2, 0], sizes = [1, 128], strides = [1, 1]} : vector<4x128xf32> to vector<1x128xf32>
    %203 = vector.extract_strided_slice %199 {offsets = [3, 0], sizes = [1, 128], strides = [1, 1]} : vector<4x128xf32> to vector<1x128xf32>
    %c1_82 = arith.constant 1 : index
    %c0_83 = arith.constant 0 : index
    %c0_84 = arith.constant 0 : index
    %204 = vector.load %arg6[%c1_82, %c0_83, %c0_84] : memref<2x128x384xf32, #tpu.memory_space<vmem>>, vector<1x128x384xf32>
    %205 = vector.shape_cast %204 : vector<1x128x384xf32> to vector<128x384xf32>
    %c1_85 = arith.constant 1 : index
    %c0_86 = arith.constant 0 : index
    %c0_87 = arith.constant 0 : index
    %206 = vector.load %arg7[%c1_85, %c0_86, %c0_87] : memref<2x1x384xf32, #tpu.memory_space<vmem>>, vector<1x1x384xf32>
    %207 = vector.shape_cast %206 : vector<1x1x384xf32> to vector<1x384xf32>
    %c1_88 = arith.constant 1 : index
    %c0_89 = arith.constant 0 : index
    %c0_90 = arith.constant 0 : index
    %208 = vector.load %arg8[%c1_88, %c0_89, %c0_90] : memref<2x128x128xf32, #tpu.memory_space<vmem>>, vector<1x128x128xf32>
    %209 = vector.shape_cast %208 : vector<1x128x128xf32> to vector<128x128xf32>
    %c1_91 = arith.constant 1 : index
    %c0_92 = arith.constant 0 : index
    %c0_93 = arith.constant 0 : index
    %210 = vector.load %arg9[%c1_91, %c0_92, %c0_93] : memref<2x1x128xf32, #tpu.memory_space<vmem>>, vector<1x1x128xf32>
    %211 = vector.shape_cast %210 : vector<1x1x128xf32> to vector<1x128xf32>
    %c1_94 = arith.constant 1 : index
    %c0_95 = arith.constant 0 : index
    %c0_96 = arith.constant 0 : index
    %212 = vector.load %arg10[%c1_94, %c0_95, %c0_96] : memref<2x128x256xf32, #tpu.memory_space<vmem>>, vector<1x128x256xf32>
    %213 = vector.shape_cast %212 : vector<1x128x256xf32> to vector<128x256xf32>
    %c1_97 = arith.constant 1 : index
    %c0_98 = arith.constant 0 : index
    %c0_99 = arith.constant 0 : index
    %214 = vector.load %arg11[%c1_97, %c0_98, %c0_99] : memref<2x1x256xf32, #tpu.memory_space<vmem>>, vector<1x1x256xf32>
    %215 = vector.shape_cast %214 : vector<1x1x256xf32> to vector<1x256xf32>
    %c1_100 = arith.constant 1 : index
    %c0_101 = arith.constant 0 : index
    %c0_102 = arith.constant 0 : index
    %216 = vector.load %arg12[%c1_100, %c0_101, %c0_102] : memref<2x256x128xf32, #tpu.memory_space<vmem>>, vector<1x256x128xf32>
    %217 = vector.shape_cast %216 : vector<1x256x128xf32> to vector<256x128xf32>
    %c1_103 = arith.constant 1 : index
    %c0_104 = arith.constant 0 : index
    %c0_105 = arith.constant 0 : index
    %218 = vector.load %arg13[%c1_103, %c0_104, %c0_105] : memref<2x1x128xf32, #tpu.memory_space<vmem>>, vector<1x1x128xf32>
    %219 = vector.shape_cast %218 : vector<1x1x128xf32> to vector<1x128xf32>
    %cst_106 = arith.constant dense<0.000000e+00> : vector<32xf32>
    %220 = vector.multi_reduction <add>, %197, %cst_106 [1] : vector<32x128xf32> to vector<32xf32>
    %221 = vector.shape_cast %220 : vector<32xf32> to vector<32x1xf32>
    %cst_107 = arith.constant 1.280000e+02 : f32
    %222 = vector.broadcast %cst_107 : f32 to vector<32x1xf32>
    %223 = arith.divf %221, %222 : vector<32x1xf32>
    %224 = vector.broadcast %223 : vector<32x1xf32> to vector<32x128xf32>
    %225 = arith.subf %197, %224 : vector<32x128xf32>
    %226 = arith.mulf %225, %225 : vector<32x128xf32>
    %cst_108 = arith.constant dense<0.000000e+00> : vector<32xf32>
    %227 = vector.multi_reduction <add>, %226, %cst_108 [1] : vector<32x128xf32> to vector<32xf32>
    %228 = vector.shape_cast %227 : vector<32xf32> to vector<32x1xf32>
    %cst_109 = arith.constant 1.280000e+02 : f32
    %229 = vector.broadcast %cst_109 : f32 to vector<32x1xf32>
    %230 = arith.divf %228, %229 : vector<32x1xf32>
    %231 = vector.broadcast %223 : vector<32x1xf32> to vector<32x128xf32>
    %232 = arith.subf %197, %231 : vector<32x128xf32>
    %cst_110 = arith.constant 9.99999997E-7 : f32
    %233 = vector.broadcast %cst_110 : f32 to vector<32x1xf32>
    %234 = arith.addf %230, %233 : vector<32x1xf32>
    %235 = math.rsqrt %234 : vector<32x1xf32>
    %236 = vector.broadcast %235 : vector<32x1xf32> to vector<32x128xf32>
    %237 = arith.mulf %232, %236 : vector<32x128xf32>
    %238 = vector.broadcast %200 : vector<1x128xf32> to vector<32x128xf32>
    %239 = arith.mulf %237, %238 : vector<32x128xf32>
    %240 = vector.broadcast %201 : vector<1x128xf32> to vector<32x128xf32>
    %241 = arith.addf %239, %240 : vector<32x128xf32>
    %cst_111 = arith.constant dense<0.000000e+00> : vector<32x384xf32>
    %242 = tpu.matmul %241, %205, %cst_111 {dimension_numbers = #tpu.dot_dimension_numbers<[1], [0], [0], [1], [0, 0, 1, 1], [], []>} : vector<32x128xf32>, vector<128x384xf32>, vector<32x384xf32> -> vector<32x384xf32>
    %243 = vector.broadcast %207 : vector<1x384xf32> to vector<32x384xf32>
    %244 = arith.addf %242, %243 : vector<32x384xf32>
    %245 = vector.extract_strided_slice %244 {offsets = [0, 0], sizes = [32, 32], strides = [1, 1]} : vector<32x384xf32> to vector<32x32xf32>
    %246 = vector.extract_strided_slice %244 {offsets = [0, 128], sizes = [32, 32], strides = [1, 1]} : vector<32x384xf32> to vector<32x32xf32>
    %247 = vector.extract_strided_slice %244 {offsets = [0, 256], sizes = [32, 32], strides = [1, 1]} : vector<32x384xf32> to vector<32x32xf32>
    %248 = tpu.transpose %246, [1, 0] : vector<32x32xf32> -> vector<32x32xf32>
    %cst_112 = arith.constant dense<0.000000e+00> : vector<32x32xf32>
    %249 = tpu.matmul %245, %248, %cst_112 {dimension_numbers = #tpu.dot_dimension_numbers<[1], [0], [0], [1], [0, 0, 1, 1], [], []>} : vector<32x32xf32>, vector<32x32xf32>, vector<32x32xf32> -> vector<32x32xf32>
    %cst_113 = arith.constant 0.176776692 : f32
    %250 = vector.broadcast %cst_113 : f32 to vector<32x32xf32>
    %251 = arith.mulf %249, %250 : vector<32x32xf32>
    %252 = arith.addf %251, %8 : vector<32x32xf32>
    %cst_114 = arith.constant dense<0xFF800000> : vector<32xf32>
    %253 = vector.multi_reduction <maximumf>, %252, %cst_114 [1] : vector<32x32xf32> to vector<32xf32>
    %254 = vector.shape_cast %253 : vector<32xf32> to vector<32x1xf32>
    %255 = vector.broadcast %254 : vector<32x1xf32> to vector<32x32xf32>
    %256 = arith.subf %252, %255 : vector<32x32xf32>
    %257 = math.exp %256 : vector<32x32xf32>
    %cst_115 = arith.constant dense<0.000000e+00> : vector<32xf32>
    %258 = vector.multi_reduction <add>, %257, %cst_115 [1] : vector<32x32xf32> to vector<32xf32>
    %259 = vector.shape_cast %258 : vector<32xf32> to vector<32x1xf32>
    %260 = tpu.reciprocal %259 {approx = true} : vector<32x1xf32> -> vector<32x1xf32>
    %261 = vector.broadcast %260 : vector<32x1xf32> to vector<32x32xf32>
    %262 = arith.mulf %257, %261 : vector<32x32xf32>
    %cst_116 = arith.constant dense<0.000000e+00> : vector<32x32xf32>
    %263 = tpu.matmul %262, %247, %cst_116 {dimension_numbers = #tpu.dot_dimension_numbers<[1], [0], [0], [1], [0, 0, 1, 1], [], []>} : vector<32x32xf32>, vector<32x32xf32>, vector<32x32xf32> -> vector<32x32xf32>
    %264 = vector.extract_strided_slice %244 {offsets = [0, 32], sizes = [32, 32], strides = [1, 1]} : vector<32x384xf32> to vector<32x32xf32>
    %265 = vector.extract_strided_slice %244 {offsets = [0, 160], sizes = [32, 32], strides = [1, 1]} : vector<32x384xf32> to vector<32x32xf32>
    %266 = vector.extract_strided_slice %244 {offsets = [0, 288], sizes = [32, 32], strides = [1, 1]} : vector<32x384xf32> to vector<32x32xf32>
    %267 = tpu.transpose %265, [1, 0] : vector<32x32xf32> -> vector<32x32xf32>
    %cst_117 = arith.constant dense<0.000000e+00> : vector<32x32xf32>
    %268 = tpu.matmul %264, %267, %cst_117 {dimension_numbers = #tpu.dot_dimension_numbers<[1], [0], [0], [1], [0, 0, 1, 1], [], []>} : vector<32x32xf32>, vector<32x32xf32>, vector<32x32xf32> -> vector<32x32xf32>
    %cst_118 = arith.constant 0.176776692 : f32
    %269 = vector.broadcast %cst_118 : f32 to vector<32x32xf32>
    %270 = arith.mulf %268, %269 : vector<32x32xf32>
    %271 = arith.addf %270, %8 : vector<32x32xf32>
    %cst_119 = arith.constant dense<0xFF800000> : vector<32xf32>
    %272 = vector.multi_reduction <maximumf>, %271, %cst_119 [1] : vector<32x32xf32> to vector<32xf32>
    %273 = vector.shape_cast %272 : vector<32xf32> to vector<32x1xf32>
    %274 = vector.broadcast %273 : vector<32x1xf32> to vector<32x32xf32>
    %275 = arith.subf %271, %274 : vector<32x32xf32>
    %276 = math.exp %275 : vector<32x32xf32>
    %cst_120 = arith.constant dense<0.000000e+00> : vector<32xf32>
    %277 = vector.multi_reduction <add>, %276, %cst_120 [1] : vector<32x32xf32> to vector<32xf32>
    %278 = vector.shape_cast %277 : vector<32xf32> to vector<32x1xf32>
    %279 = tpu.reciprocal %278 {approx = true} : vector<32x1xf32> -> vector<32x1xf32>
    %280 = vector.broadcast %279 : vector<32x1xf32> to vector<32x32xf32>
    %281 = arith.mulf %276, %280 : vector<32x32xf32>
    %cst_121 = arith.constant dense<0.000000e+00> : vector<32x32xf32>
    %282 = tpu.matmul %281, %266, %cst_121 {dimension_numbers = #tpu.dot_dimension_numbers<[1], [0], [0], [1], [0, 0, 1, 1], [], []>} : vector<32x32xf32>, vector<32x32xf32>, vector<32x32xf32> -> vector<32x32xf32>
    %283 = vector.extract_strided_slice %244 {offsets = [0, 64], sizes = [32, 32], strides = [1, 1]} : vector<32x384xf32> to vector<32x32xf32>
    %284 = vector.extract_strided_slice %244 {offsets = [0, 192], sizes = [32, 32], strides = [1, 1]} : vector<32x384xf32> to vector<32x32xf32>
    %285 = vector.extract_strided_slice %244 {offsets = [0, 320], sizes = [32, 32], strides = [1, 1]} : vector<32x384xf32> to vector<32x32xf32>
    %286 = tpu.transpose %284, [1, 0] : vector<32x32xf32> -> vector<32x32xf32>
    %cst_122 = arith.constant dense<0.000000e+00> : vector<32x32xf32>
    %287 = tpu.matmul %283, %286, %cst_122 {dimension_numbers = #tpu.dot_dimension_numbers<[1], [0], [0], [1], [0, 0, 1, 1], [], []>} : vector<32x32xf32>, vector<32x32xf32>, vector<32x32xf32> -> vector<32x32xf32>
    %cst_123 = arith.constant 0.176776692 : f32
    %288 = vector.broadcast %cst_123 : f32 to vector<32x32xf32>
    %289 = arith.mulf %287, %288 : vector<32x32xf32>
    %290 = arith.addf %289, %8 : vector<32x32xf32>
    %cst_124 = arith.constant dense<0xFF800000> : vector<32xf32>
    %291 = vector.multi_reduction <maximumf>, %290, %cst_124 [1] : vector<32x32xf32> to vector<32xf32>
    %292 = vector.shape_cast %291 : vector<32xf32> to vector<32x1xf32>
    %293 = vector.broadcast %292 : vector<32x1xf32> to vector<32x32xf32>
    %294 = arith.subf %290, %293 : vector<32x32xf32>
    %295 = math.exp %294 : vector<32x32xf32>
    %cst_125 = arith.constant dense<0.000000e+00> : vector<32xf32>
    %296 = vector.multi_reduction <add>, %295, %cst_125 [1] : vector<32x32xf32> to vector<32xf32>
    %297 = vector.shape_cast %296 : vector<32xf32> to vector<32x1xf32>
    %298 = tpu.reciprocal %297 {approx = true} : vector<32x1xf32> -> vector<32x1xf32>
    %299 = vector.broadcast %298 : vector<32x1xf32> to vector<32x32xf32>
    %300 = arith.mulf %295, %299 : vector<32x32xf32>
    %cst_126 = arith.constant dense<0.000000e+00> : vector<32x32xf32>
    %301 = tpu.matmul %300, %285, %cst_126 {dimension_numbers = #tpu.dot_dimension_numbers<[1], [0], [0], [1], [0, 0, 1, 1], [], []>} : vector<32x32xf32>, vector<32x32xf32>, vector<32x32xf32> -> vector<32x32xf32>
    %302 = vector.extract_strided_slice %244 {offsets = [0, 96], sizes = [32, 32], strides = [1, 1]} : vector<32x384xf32> to vector<32x32xf32>
    %303 = vector.extract_strided_slice %244 {offsets = [0, 224], sizes = [32, 32], strides = [1, 1]} : vector<32x384xf32> to vector<32x32xf32>
    %304 = vector.extract_strided_slice %244 {offsets = [0, 352], sizes = [32, 32], strides = [1, 1]} : vector<32x384xf32> to vector<32x32xf32>
    %305 = tpu.transpose %303, [1, 0] : vector<32x32xf32> -> vector<32x32xf32>
    %cst_127 = arith.constant dense<0.000000e+00> : vector<32x32xf32>
    %306 = tpu.matmul %302, %305, %cst_127 {dimension_numbers = #tpu.dot_dimension_numbers<[1], [0], [0], [1], [0, 0, 1, 1], [], []>} : vector<32x32xf32>, vector<32x32xf32>, vector<32x32xf32> -> vector<32x32xf32>
    %cst_128 = arith.constant 0.176776692 : f32
    %307 = vector.broadcast %cst_128 : f32 to vector<32x32xf32>
    %308 = arith.mulf %306, %307 : vector<32x32xf32>
    %309 = arith.addf %308, %8 : vector<32x32xf32>
    %cst_129 = arith.constant dense<0xFF800000> : vector<32xf32>
    %310 = vector.multi_reduction <maximumf>, %309, %cst_129 [1] : vector<32x32xf32> to vector<32xf32>
    %311 = vector.shape_cast %310 : vector<32xf32> to vector<32x1xf32>
    %312 = vector.broadcast %311 : vector<32x1xf32> to vector<32x32xf32>
    %313 = arith.subf %309, %312 : vector<32x32xf32>
    %314 = math.exp %313 : vector<32x32xf32>
    %cst_130 = arith.constant dense<0.000000e+00> : vector<32xf32>
    %315 = vector.multi_reduction <add>, %314, %cst_130 [1] : vector<32x32xf32> to vector<32xf32>
    %316 = vector.shape_cast %315 : vector<32xf32> to vector<32x1xf32>
    %317 = tpu.reciprocal %316 {approx = true} : vector<32x1xf32> -> vector<32x1xf32>
    %318 = vector.broadcast %317 : vector<32x1xf32> to vector<32x32xf32>
    %319 = arith.mulf %314, %318 : vector<32x32xf32>
    %cst_131 = arith.constant dense<0.000000e+00> : vector<32x32xf32>
    %320 = tpu.matmul %319, %304, %cst_131 {dimension_numbers = #tpu.dot_dimension_numbers<[1], [0], [0], [1], [0, 0, 1, 1], [], []>} : vector<32x32xf32>, vector<32x32xf32>, vector<32x32xf32> -> vector<32x32xf32>
    %321 = tpu.concatenate %263, %282, %301, %320 in 1 : vector<32x32xf32>, vector<32x32xf32>, vector<32x32xf32>, vector<32x32xf32> -> vector<32x128xf32>
    %cst_132 = arith.constant dense<0.000000e+00> : vector<32x128xf32>
    %322 = tpu.matmul %321, %209, %cst_132 {dimension_numbers = #tpu.dot_dimension_numbers<[1], [0], [0], [1], [0, 0, 1, 1], [], []>} : vector<32x128xf32>, vector<128x128xf32>, vector<32x128xf32> -> vector<32x128xf32>
    %323 = vector.broadcast %211 : vector<1x128xf32> to vector<32x128xf32>
    %324 = arith.addf %322, %323 : vector<32x128xf32>
    %325 = arith.addf %197, %324 : vector<32x128xf32>
    %cst_133 = arith.constant dense<0.000000e+00> : vector<32x256xf32>
    %326 = tpu.matmul %325, %213, %cst_133 {dimension_numbers = #tpu.dot_dimension_numbers<[1], [0], [0], [1], [0, 0, 1, 1], [], []>} : vector<32x128xf32>, vector<128x256xf32>, vector<32x256xf32> -> vector<32x256xf32>
    %327 = vector.broadcast %215 : vector<1x256xf32> to vector<32x256xf32>
    %328 = arith.addf %326, %327 : vector<32x256xf32>
    %cst_134 = arith.constant 5.000000e-01 : f32
    %329 = vector.broadcast %cst_134 : f32 to vector<32x256xf32>
    %330 = arith.mulf %329, %328 : vector<32x256xf32>
    %cst_135 = arith.constant 4.471500e-02 : f32
    %331 = vector.broadcast %cst_135 : f32 to vector<32x256xf32>
    %332 = arith.mulf %331, %328 : vector<32x256xf32>
    %333 = arith.mulf %332, %328 : vector<32x256xf32>
    %334 = arith.mulf %333, %328 : vector<32x256xf32>
    %335 = arith.addf %328, %334 : vector<32x256xf32>
    %cst_136 = arith.constant 0.797884583 : f32
    %336 = vector.broadcast %cst_136 : f32 to vector<32x256xf32>
    %337 = arith.mulf %336, %335 : vector<32x256xf32>
    %338 = math.tanh %337 : vector<32x256xf32>
    %cst_137 = arith.constant 1.000000e+00 : f32
    %339 = vector.broadcast %cst_137 : f32 to vector<32x256xf32>
    %340 = arith.addf %339, %338 : vector<32x256xf32>
    %341 = arith.mulf %330, %340 : vector<32x256xf32>
    %cst_138 = arith.constant dense<0.000000e+00> : vector<32x128xf32>
    %342 = tpu.matmul %341, %217, %cst_138 {dimension_numbers = #tpu.dot_dimension_numbers<[1], [0], [0], [1], [0, 0, 1, 1], [], []>} : vector<32x256xf32>, vector<256x128xf32>, vector<32x128xf32> -> vector<32x128xf32>
    %343 = vector.broadcast %219 : vector<1x128xf32> to vector<32x128xf32>
    %344 = arith.addf %342, %343 : vector<32x128xf32>
    %cst_139 = arith.constant dense<0.000000e+00> : vector<32xf32>
    %345 = vector.multi_reduction <add>, %344, %cst_139 [1] : vector<32x128xf32> to vector<32xf32>
    %346 = vector.shape_cast %345 : vector<32xf32> to vector<32x1xf32>
    %cst_140 = arith.constant 1.280000e+02 : f32
    %347 = vector.broadcast %cst_140 : f32 to vector<32x1xf32>
    %348 = arith.divf %346, %347 : vector<32x1xf32>
    %349 = vector.broadcast %348 : vector<32x1xf32> to vector<32x128xf32>
    %350 = arith.subf %344, %349 : vector<32x128xf32>
    %351 = arith.mulf %350, %350 : vector<32x128xf32>
    %cst_141 = arith.constant dense<0.000000e+00> : vector<32xf32>
    %352 = vector.multi_reduction <add>, %351, %cst_141 [1] : vector<32x128xf32> to vector<32xf32>
    %353 = vector.shape_cast %352 : vector<32xf32> to vector<32x1xf32>
    %cst_142 = arith.constant 1.280000e+02 : f32
    %354 = vector.broadcast %cst_142 : f32 to vector<32x1xf32>
    %355 = arith.divf %353, %354 : vector<32x1xf32>
    %356 = vector.broadcast %348 : vector<32x1xf32> to vector<32x128xf32>
    %357 = arith.subf %344, %356 : vector<32x128xf32>
    %cst_143 = arith.constant 9.99999997E-7 : f32
    %358 = vector.broadcast %cst_143 : f32 to vector<32x1xf32>
    %359 = arith.addf %355, %358 : vector<32x1xf32>
    %360 = math.rsqrt %359 : vector<32x1xf32>
    %361 = vector.broadcast %360 : vector<32x1xf32> to vector<32x128xf32>
    %362 = arith.mulf %357, %361 : vector<32x128xf32>
    %363 = vector.broadcast %202 : vector<1x128xf32> to vector<32x128xf32>
    %364 = arith.mulf %362, %363 : vector<32x128xf32>
    %365 = vector.broadcast %203 : vector<1x128xf32> to vector<32x128xf32>
    %366 = arith.addf %364, %365 : vector<32x128xf32>
    %cst_144 = arith.constant dense<0.000000e+00> : vector<32x256xf32>
    %367 = tpu.matmul %366, %213, %cst_144 {dimension_numbers = #tpu.dot_dimension_numbers<[1], [0], [0], [1], [0, 0, 1, 1], [], []>} : vector<32x128xf32>, vector<128x256xf32>, vector<32x256xf32> -> vector<32x256xf32>
    %368 = vector.broadcast %215 : vector<1x256xf32> to vector<32x256xf32>
    %369 = arith.addf %367, %368 : vector<32x256xf32>
    %cst_145 = arith.constant 5.000000e-01 : f32
    %370 = vector.broadcast %cst_145 : f32 to vector<32x256xf32>
    %371 = arith.mulf %370, %369 : vector<32x256xf32>
    %cst_146 = arith.constant 4.471500e-02 : f32
    %372 = vector.broadcast %cst_146 : f32 to vector<32x256xf32>
    %373 = arith.mulf %372, %369 : vector<32x256xf32>
    %374 = arith.mulf %373, %369 : vector<32x256xf32>
    %375 = arith.mulf %374, %369 : vector<32x256xf32>
    %376 = arith.addf %369, %375 : vector<32x256xf32>
    %cst_147 = arith.constant 0.797884583 : f32
    %377 = vector.broadcast %cst_147 : f32 to vector<32x256xf32>
    %378 = arith.mulf %377, %376 : vector<32x256xf32>
    %379 = math.tanh %378 : vector<32x256xf32>
    %cst_148 = arith.constant 1.000000e+00 : f32
    %380 = vector.broadcast %cst_148 : f32 to vector<32x256xf32>
    %381 = arith.addf %380, %379 : vector<32x256xf32>
    %382 = arith.mulf %371, %381 : vector<32x256xf32>
    %cst_149 = arith.constant dense<0.000000e+00> : vector<32x128xf32>
    %383 = tpu.matmul %382, %217, %cst_149 {dimension_numbers = #tpu.dot_dimension_numbers<[1], [0], [0], [1], [0, 0, 1, 1], [], []>} : vector<32x256xf32>, vector<256x128xf32>, vector<32x128xf32> -> vector<32x128xf32>
    %384 = vector.broadcast %219 : vector<1x128xf32> to vector<32x128xf32>
    %385 = arith.addf %383, %384 : vector<32x128xf32>
    %386 = arith.addf %325, %385 : vector<32x128xf32>
    %c0_150 = arith.constant 0 : index
    %c0_151 = arith.constant 0 : index
    %387 = vector.load %arg14[%c0_150, %c0_151] : memref<2x128xf32, #tpu.memory_space<vmem>>, vector<1x128xf32>
    %c1_152 = arith.constant 1 : index
    %c0_153 = arith.constant 0 : index
    %388 = vector.load %arg14[%c1_152, %c0_153] : memref<2x128xf32, #tpu.memory_space<vmem>>, vector<1x128xf32>
    %cst_154 = arith.constant dense<0.000000e+00> : vector<32xf32>
    %389 = vector.multi_reduction <add>, %386, %cst_154 [1] : vector<32x128xf32> to vector<32xf32>
    %390 = vector.shape_cast %389 : vector<32xf32> to vector<32x1xf32>
    %cst_155 = arith.constant 1.280000e+02 : f32
    %391 = vector.broadcast %cst_155 : f32 to vector<32x1xf32>
    %392 = arith.divf %390, %391 : vector<32x1xf32>
    %393 = vector.broadcast %392 : vector<32x1xf32> to vector<32x128xf32>
    %394 = arith.subf %386, %393 : vector<32x128xf32>
    %395 = arith.mulf %394, %394 : vector<32x128xf32>
    %cst_156 = arith.constant dense<0.000000e+00> : vector<32xf32>
    %396 = vector.multi_reduction <add>, %395, %cst_156 [1] : vector<32x128xf32> to vector<32xf32>
    %397 = vector.shape_cast %396 : vector<32xf32> to vector<32x1xf32>
    %cst_157 = arith.constant 1.280000e+02 : f32
    %398 = vector.broadcast %cst_157 : f32 to vector<32x1xf32>
    %399 = arith.divf %397, %398 : vector<32x1xf32>
    %400 = vector.broadcast %392 : vector<32x1xf32> to vector<32x128xf32>
    %401 = arith.subf %386, %400 : vector<32x128xf32>
    %cst_158 = arith.constant 9.99999997E-7 : f32
    %402 = vector.broadcast %cst_158 : f32 to vector<32x1xf32>
    %403 = arith.addf %399, %402 : vector<32x1xf32>
    %404 = math.rsqrt %403 : vector<32x1xf32>
    %405 = vector.broadcast %404 : vector<32x1xf32> to vector<32x128xf32>
    %406 = arith.mulf %401, %405 : vector<32x128xf32>
    %407 = vector.broadcast %387 : vector<1x128xf32> to vector<32x128xf32>
    %408 = arith.mulf %406, %407 : vector<32x128xf32>
    %409 = vector.broadcast %388 : vector<1x128xf32> to vector<32x128xf32>
    %410 = arith.addf %408, %409 : vector<32x128xf32>
    %c0_159 = arith.constant 0 : index
    %c0_160 = arith.constant 0 : index
    %411 = vector.load %arg15[%c0_159, %c0_160] : memref<32x128xf32, #tpu.memory_space<vmem>>, vector<32x128xf32>
    tpu.vector_store %arg15[%c0_159, %c0_160], %410 {strides = array<i32>} : memref<32x128xf32, #tpu.memory_space<vmem>>, vector<32x128xf32>,
    return
  }
}

</mosaic_0001>

<bundles_post_ra>
// kernel: siglip_vision_forward.1
= control target key start
LH: loop header
LB: loop body
LE: loop exit
PB: predicated region body
PF: predicated region fallthrough
CT: control target
= control target key end

     0   :  { %s9087_s0 = inlined_call_operand.vmem [shape: f32[32,256], index: 0, kind: input, shape index: {}]   ;;  %s9088_s1 = inlined_call_operand.vmem [shape: f32[32,128], index: 1, kind: input, shape index: {}]   ;;  %s9089_s2 = inlined_call_operand.vmem [shape: f32[32,32], index: 2, kind: input, shape index: {}]   ;;  %s9090_s3 = inlined_call_operand.vmem [shape: f32[256,128], index: 3, kind: input, shape index: {}]   ;;  %s9091_s4 = inlined_call_operand.vmem [shape: f32[1,128], index: 4, kind: input, shape index: {}]   ;;  %s9092_s5 = inlined_call_operand.vmem [shape: f32[2,4,128], index: 5, kind: input, shape index: {}]   ;;  %s9093_s6 = inlined_call_operand.vmem [shape: f32[2,128,384], index: 6, kind: input, shape index: {}]   ;;  %s9094_s7 = inlined_call_operand.vmem [shape: f32[2,1,384], index: 7, kind: input, shape index: {}]   ;;  %s9095_s8 = inlined_call_operand.vmem [shape: f32[2,128,128], index: 8, kind: input, shape index: {}]   ;;  %s9096_s9 = inlined_call_operand.vmem [shape: f32[2,1,128], index: 9, kind: input, shape index: {}]   ;;  %s9097_s10 = inlined_call_operand.vmem [shape: f32[2,128,256], index: 10, kind: input, shape index: {}]   ;;  %s9098_s11 = inlined_call_operand.vmem [shape: f32[2,1,256], index: 11, kind: input, shape index: {}]   ;;  %s9099_s12 = inlined_call_operand.vmem [shape: f32[2,256,128], index: 12, kind: input, shape index: {}]   ;;  %s9100_s13 = inlined_call_operand.vmem [shape: f32[2,1,128], index: 13, kind: input, shape index: {}]   ;;  %s9101_s14 = inlined_call_operand.vmem [shape: f32[2,128], index: 14, kind: input, shape index: {}]   ;;  %s9102_s15 = inlined_call_operand.hbm [shape: f32[32,128], index: 15, kind: output, shape index: {}]  }
   0x1   :  { %v75_v0 = vld [vmem:[%s9090_s3 + $0x80] sm:$0xff]  ;;  %v76_v1 = vld [vmem:[%s9090_s3 + $0x88] sm:$0xff]  ;;  %v77_v5 = vld [vmem:[%s9090_s3 + $0x90] sm:$0xff] }
   0x2   :  { %v59_v2 = vld [vmem:[%s9090_s3] sm:$0xff]  ;;  %v5744_v3 = vpack.c.bf16 %v76_v1, %v75_v0  ;;  %v60_v4 = vld [vmem:[%s9090_s3 + $0x8] sm:$0xff]  ;;  %v78_v6 = vld [vmem:[%s9090_s3 + $0x98] sm:$0xff] }
   0x3   :  { %v5746_v7 = vpack.c.bf16 %v60_v4, %v59_v2  ;;  %v5748_v8 = vpack.c.bf16 %v78_v6, %v77_v5  ;;  %v61_v9 = vld [vmem:[%s9090_s3 + $0x10] sm:$0xff]  ;;  %v62_v10 = vld [vmem:[%s9090_s3 + $0x18] sm:$0xff]  ;;  %v79_v11 = vld [vmem:[%s9090_s3 + $0xa0] sm:$0xff] }
   0x4   :  { %5745 = vmatprep.subr.bf16.mxu0 %v5744_v3  ;;  %v80_v12 = vld [vmem:[%s9090_s3 + $0xa8] sm:$0xff]  ;;  %v5750_v13 = vpack.c.bf16 %v62_v10, %v61_v9  ;;  %v63_v15 = vld [vmem:[%s9090_s3 + $0x20] sm:$0xff]  ;;  %v81_v17 = vld [vmem:[%s9090_s3 + $0xb0] sm:$0xff] }
   0x5   :  { %5747 = vmatpush3.bf16.msra.mxu0 %v5746_v7  ;;  %v5752_v14 = vpack.c.bf16 %v80_v12, %v79_v11  ;;  %v64_v16 = vld [vmem:[%s9090_s3 + $0x28] sm:$0xff]  ;;  %v82_v18 = vld [vmem:[%s9090_s3 + $0xb8] sm:$0xff]  ;;  %v65_v21 = vld [vmem:[%s9090_s3 + $0x30] sm:$0xff] }
   0x6   :  { %5749 = vmatprep.subr.bf16.mxu0 %v5748_v8  ;;  %v5754_v19 = vpack.c.bf16 %v64_v16, %v63_v15  ;;  %v5756_v20 = vpack.c.bf16 %v82_v18, %v81_v17  ;;  %v66_v22 = vld [vmem:[%s9090_s3 + $0x38] sm:$0xff]  ;;  %v83_v23 = vld [vmem:[%s9090_s3 + $0xc0] sm:$0xff]  ;;  %v84_v24 = vld [vmem:[%s9090_s3 + $0xc8] sm:$0xff] }
   0x7   :  { %v52_v25 = vld [vmem:[%s9087_s0 + $0x8] sm:$0xff]  ;;  %v5758_v26 = vpack.c.bf16 %v66_v22, %v65_v21  ;;  %v5760_v27 = vpack.c.bf16 %v84_v24, %v83_v23  ;;  %v67_v28 = vld [vmem:[%s9090_s3 + $0x40] sm:$0xff] }
   0x8   :  { %162 = vmatprep.mubr.f32.mxu0 %v52_v25  ;;  %v68_v29 = vld [vmem:[%s9090_s3 + $0x48] sm:$0xff] }
   0x9   :  { %5751 = vmatpush3.bf16.msra.mxu0 %v5750_v13 }
   0xa   :  { %5753 = vmatprep.subr.bf16.mxu0 %v5752_v14 }
   0xd   :  { %5755 = vmatpush3.bf16.msra.mxu0 %v5754_v19 }
   0xe   :  { %5757 = vmatprep.subr.bf16.mxu0 %v5756_v20 }
   0xf   :  { %20 = vsyncpa [#allocation3], 0  ;;  %v85_v30 = vld [vmem:[%s9090_s3 + $0xd0] sm:$0xff]  ;;  %v86_v31 = vld [vmem:[%s9090_s3 + $0xd8] sm:$0xff]  ;;  %v5762_v32 = vpack.c.bf16 %v68_v29, %v67_v28  ;;  %vm579_vm0 = vcmask 261120   ;;  %s6834_s26 = smov 96  }
  0x10   :  { %v5764_v33 = vpack.c.bf16 %v86_v31, %v85_v30  ;;  %v69_v34 = vld [vmem:[%s9090_s3 + $0x50] sm:$0xff]  ;;  %v70_v35 = vld [vmem:[%s9090_s3 + $0x58] sm:$0xff]  ;;  %v87_v36 = vld [vmem:[%s9090_s3 + $0xe0] sm:$0xff]  ;;  %vm1728_vm2 = vcmask 523264   ;;  %vm1733_vm3 = vcmask 785408   ;;  %s6837_s17 = smov [#allocation2]  }
  0x11   :  { %5759 = vmatpush3.bf16.msra.mxu0 %v5758_v26  ;;  %v88_v37 = vld [vmem:[%s9090_s3 + $0xe8] sm:$0xff]  ;;  %v5766_v38 = vpack.c.bf16 %v70_v35, %v69_v34  ;;  %v71_v40 = vld [vmem:[%s9090_s3 + $0x60] sm:$0xff]  ;;  %v89_v42 = vld [vmem:[%s9090_s3 + $0xf0] sm:$0xff]  ;;  %s4693_s18 = sshll.u32 %s6837_s17, 4  ;;  %s4694_s18 = int_to_ptr.vmem [resolvable:$true] %s4693_s18 }
  0x12   :  { %5761 = vmatprep.subr.bf16.mxu0 %v5760_v27  ;;  %v5768_v39 = vpack.c.bf16 %v88_v37, %v87_v36  ;;  %v72_v41 = vld [vmem:[%s9090_s3 + $0x68] sm:$0xff]  ;;  %v90_v43 = vld [vmem:[%s9090_s3 + $0xf8] sm:$0xff]  ;;  %v73_v46 = vld [vmem:[%s9090_s3 + $0x70] sm:$0xff]  ;;  %p6814_p1 = scmp.lt.s32.totalorder %s4694_s18, %s4694_s18 }
  0x13   :  { %v5770_v44 = vpack.c.bf16 %v72_v41, %v71_v40  ;;  %v5772_v45 = vpack.c.bf16 %v90_v43, %v89_v42  ;;  %v74_v47 = vld [vmem:[%s9090_s3 + $0x78] sm:$0xff]  ;;  %v51_v49 = vld [vmem:[%s9087_s0] sm:$0xff]  ;;  %v53_v51 = vld [vmem:[%s9087_s0 + $0x10] sm:$0xff] }
  0x14   :  { %v5774_v48 = vpack.c.bf16 %v74_v47, %v73_v46  ;;  %v54_v50 = vld [vmem:[%s9087_s0 + $0x18] sm:$0xff]  ;;  %v56_v52 = vld [vmem:[%s9087_s0 + $0x28] sm:$0xff]  ;;  %v55_v53 = vld [vmem:[%s9087_s0 + $0x20] sm:$0xff] }
  0x15   :  { %5763 = vmatpush3.bf16.msra.mxu0 %v5762_v32  ;;  %v58_v54 = vld [vmem:[%s9087_s0 + $0x38] sm:$0xff]  ;;  %v57_v55 = vld [vmem:[%s9087_s0 + $0x30] sm:$0xff]  ;;  %v4704_v57 = vld [vmem:[%s9091_s4] ss:$0 sm:$0xff]  ;;  %s6835_s0 = smov 64   ;;  %s6836_s4 = smov 32  }
  0x16   :  { %5765 = vmatprep.subr.bf16.mxu0 %v5764_v33  ;;  %v183_v60 = vld [vmem:[%s9088_s1] sm:$0xff]  ;;  %v184_v2 = vld [vmem:[%s9088_s1 + $0x8] sm:$0xff]  ;;  %v185_v8 = vld [vmem:[%s9088_s1 + $0x10] sm:$0xff] }
  0x17   :  { %v186_v14 = vld [vmem:[%s9088_s1 + $0x18] sm:$0xff]  ;;  %v197_v17 = vld [vmem:[%s9093_s6 + $0x8] sm:$0xff]  ;;  %v200_v18 = vld [vmem:[%s9093_s6 + $0x20] sm:$0xff] }
  0x18   :  { %v196_v19 = vld [vmem:[%s9093_s6] sm:$0xff]  ;;  %v5776_v20 = vpack.c.bf16 %v200_v18, %v197_v17  ;;  %v199_v21 = vld [vmem:[%s9093_s6 + $0x18] sm:$0xff]  ;;  %v206_v23 = vld [vmem:[%s9093_s6 + $0x50] sm:$0xff] }
  0x19   :  { %5767 = vmatpush3.bf16.msra.mxu0 %v5766_v38  ;;  %v203_v22 = vld [vmem:[%s9093_s6 + $0x38] sm:$0xff]  ;;  %v5778_v24 = vpack.c.bf16 %v199_v21, %v196_v19  ;;  %v198_v26 = vld [vmem:[%s9093_s6 + $0x10] sm:$0xff]  ;;  %v201_v27 = vld [vmem:[%s9093_s6 + $0x28] sm:$0xff] }
  0x1a   :  { %5769 = vmatprep.subr.bf16.mxu0 %v5768_v39  ;;  %v5780_v25 = vpack.c.bf16 %v206_v23, %v203_v22  ;;  %v202_v28 = vld [vmem:[%s9093_s6 + $0x30] sm:$0xff]  ;;  %5777 = vmatprep.subr.bf16.mxu1 %v5776_v20  ;;  %v5808_v29 = vpack.c.bf16 %v201_v27, %v198_v26  ;;  %v205_v30 = vld [vmem:[%s9093_s6 + $0x48] sm:$0xff]  ;;  %v212_v32 = vld [vmem:[%s9093_s6 + $0x80] sm:$0xff] }
  0x1b   :  { %v209_v31 = vld [vmem:[%s9093_s6 + $0x68] sm:$0xff]  ;;  %5779 = vmatpush1.bf16.msra.mxu1 %v5778_v24  ;;  %v5782_v33 = vpack.c.bf16 %v205_v30, %v202_v28  ;;  %v204_v34 = vld [vmem:[%s9093_s6 + $0x40] sm:$0xff]  ;;  %v207_v35 = vld [vmem:[%s9093_s6 + $0x58] sm:$0xff] }
  0x1c   :  { %5781 = vmatprep.subr.bf16.mxu1 %v5780_v25  ;;  %v5784_v36 = vpack.c.bf16 %v212_v32, %v209_v31  ;;  %v5812_v37 = vpack.c.bf16 %v207_v35, %v204_v34  ;;  %v208_v38 = vld [vmem:[%s9093_s6 + $0x60] sm:$0xff]  ;;  %v211_v39 = vld [vmem:[%s9093_s6 + $0x78] sm:$0xff]  ;;  %v222_v17 = vld [vmem:[%s9093_s6 + $0xd0] sm:$0xff] }
  0x1d   :  { %5771 = vmatpush3.bf16.msra.mxu0 %v5770_v44  ;;  %v5786_v40 = vpack.c.bf16 %v211_v39, %v208_v38  ;;  %v225_v19 = vld [vmem:[%s9093_s6 + $0xe8] sm:$0xff]  ;;  %v226_v20 = vld [vmem:[%s9093_s6 + $0xf0] sm:$0xff]  ;;  %v236_v25 = vld [vmem:[%s9093_s6 + $0x140] sm:$0xff] }
  0x1e   :  { %5773 = vmatprep.subr.bf16.mxu0 %v5772_v45  ;;  %v229_v21 = vld [vmem:[%s9093_s6 + $0x108] sm:$0xff]  ;;  %v5824_v22 = vpack.c.bf16 %v225_v19, %v222_v17  ;;  %v228_v26 = vld [vmem:[%s9093_s6 + $0x100] sm:$0xff]  ;;  %v231_v28 = vld [vmem:[%s9093_s6 + $0x118] sm:$0xff] }
  0x1f   :  { %5783 = vmatpush1.bf16.msra.mxu1 %v5782_v33  ;;  %v5798_v23 = vpack.c.bf16 %v229_v21, %v226_v20  ;;  %v233_v24 = vld [vmem:[%s9093_s6 + $0x128] sm:$0xff]  ;;  %v235_v30 = vld [vmem:[%s9093_s6 + $0x138] sm:$0xff]  ;;  %v5828_v31 = vpack.c.bf16 %v231_v28, %v228_v26  ;;  %v242_v34 = vld [vmem:[%s9093_s6 + $0x170] sm:$0xff] }
  0x20   :  { %5785 = vmatprep.subr.bf16.mxu1 %v5784_v36  ;;  %v5800_v27 = vpack.c.bf16 %v236_v25, %v233_v24  ;;  %v239_v33 = vld [vmem:[%s9093_s6 + $0x158] sm:$0xff]  ;;  %v234_v35 = vld [vmem:[%s9093_s6 + $0x130] sm:$0xff]  ;;  %v241_v39 = vld [vmem:[%s9093_s6 + $0x168] sm:$0xff] }
  0x21   :  { %5775 = vmatpush3.bf16.msra.mxu0 %v5774_v48  ;;  %v5804_v36 = vpack.c.bf16 %v242_v34, %v239_v33  ;;  %v238_v38 = vld [vmem:[%s9093_s6 + $0x150] sm:$0xff]  ;;  %vm7267_vm1 = vmpackc.low %vm579_vm0, %vm579_vm0 }
  0x22   :  { %5809 = vmatprep.subr.bf16.mxu0 %v5808_v29 }
  0x23   :  { %5787 = vmatpush1.bf16.msra.mxu1 %v5786_v40 }
  0x24   :  { %163 = vmatmul.mubr.f32.vlgmr.msra.gmra.mrb[0].mxu0 %v51_v49 }
  0x25   :  { %167 = vmatprep.mubr.f32.mxu0 %v54_v50  ;;  %5811 = vmatpush3.bf16.msra.mxu0 %v5808_v29  ;;  %v232_v29 = vld [vmem:[%s9093_s6 + $0x120] sm:$0xff] }
  0x26   :  { %5813 = vmatprep.subr.bf16.mxu0 %v5812_v37  ;;  %v5802_v32 = vpack.c.bf16 %v235_v30, %v232_v29 }
  0x28   :  { %168 = vmatmul.mubr.f32.gmra.mrb[2].mxu0 %v53_v51 }
  0x29   :  { %172 = vmatprep.mubr.f32.mxu0 %v56_v52  ;;  %5815 = vmatpush3.bf16.msra.mxu0 %v5812_v37  ;;  %v237_v37 = vld [vmem:[%s9093_s6 + $0x148] sm:$0xff] }
  0x2a   :  { %v5832_v40 = vpack.c.bf16 %v237_v37, %v234_v35 }
  0x2c   :  { %173 = vmatmul.mubr.f32.gmra.mrb[4].mxu0 %v55_v53 }
  0x2d   :  { %177 = vmatprep.mubr.f32.mxu0 %v58_v54 }
  0x30   :  { %178 = vmatmul.mubr.f32.gmra.mrb[6].mxu0 %v57_v55 }
  0xf7   :  { %v4972_v56 = vpop.f32.mrb[0].mxu0 }
  0xf8   :  { %v4973_v58 = vpop.f32.mrb[1].mxu0 }
  0xf9   :  { %v4974_v59 = vadd.f32 %v4973_v58, %v4972_v56  ;;  %v218_v58 = vld [vmem:[%s9093_s6 + $0xb0] sm:$0xff] }
  0xfb   :  { %v165_v61 = vadd.f32 %v4974_v59, %v4704_v57  ;;  %v4975_v62 = vpop.f32.mrb[2].mxu0  ;;  %v210_v59 = vld [vmem:[%s9093_s6 + $0x70] sm:$0xff] }
  0xfc   :  { %v4976_v63 = vpop.f32.mrb[3].mxu0 }
  0xfd   :  { %v4977_v0 = vadd.f32 %v4976_v63, %v4975_v62  ;;  %v7046_v1 = vadd.f32 %v183_v60, %v165_v61  ;;  %v213_v61 = vld [vmem:[%s9093_s6 + $0x88] sm:$0xff]  ;;  %v214_v62 = vld [vmem:[%s9093_s6 + $0x90] sm:$0xff] }
  0xfe   :  { %v217_v63 = vld [vmem:[%s9093_s6 + $0xa8] sm:$0xff] }
  0xff   :  { %v170_v3 = vadd.f32 %v4977_v0, %v4704_v57  ;;  %v4978_v4 = vpop.f32.mrb[4].mxu0  ;;  %328 = vadd.xlane.f32.xlu0 %v7046_v1  ;;  %v5816_v0 = vpack.c.bf16 %v213_v61, %v210_v59 }
 0x100   :  { %v4979_v5 = vpop.f32.mrb[5].mxu0 }
 0x101   :  { %v4980_v6 = vadd.f32 %v4979_v5, %v4978_v4  ;;  %v7052_v7 = vadd.f32 %v184_v2, %v170_v3  ;;  %v5790_v2 = vpack.c.bf16 %v217_v63, %v214_v62  ;;  %5817 = vmatprep.subr.bf16.mxu0 %v5816_v0  ;;  %v221_v3 = vld [vmem:[%s9093_s6 + $0xc8] sm:$0xff]  ;;  %v224_v4 = vld [vmem:[%s9093_s6 + $0xe0] sm:$0xff] }
 0x102   :  { %v216_v5 = vld [vmem:[%s9093_s6 + $0xa0] sm:$0xff]  ;;  %5819 = vmatpush3.bf16.msra.mxu0 %v5816_v0 }
 0x103   :  { %v175_v9 = vadd.f32 %v4980_v6, %v4704_v57  ;;  %v4981_v10 = vpop.f32.mrb[6].mxu0  ;;  %330 = vadd.xlane.f32.xlu0 %v7052_v7  ;;  %v5792_v6 = vpack.c.bf16 %v224_v4, %v221_v3  ;;  %v195_v62 = vld [vmem:[%s9092_s5] sm:$0xf] }
 0x104   :  { %v4982_v11 = vpop.f32.mrb[7].mxu0 }
 0x105   :  { %v4983_v12 = vadd.f32 %v4982_v11, %v4981_v10  ;;  %v7058_v13 = vadd.f32 %v185_v8, %v175_v9  ;;  %v219_v8 = vld [vmem:[%s9093_s6 + $0xb8] sm:$0xff]  ;;  %v220_v9 = vld [vmem:[%s9093_s6 + $0xc0] sm:$0xff] }
 0x106   :  { %v223_v10 = vld [vmem:[%s9093_s6 + $0xd8] sm:$0xff]  ;;  %v5820_v11 = vpack.c.bf16 %v219_v8, %v216_v5 }
 0x107   :  { %v180_v15 = vadd.f32 %v4983_v12, %v4704_v57  ;;  %332 = vadd.xlane.f32.xlu1 %v7058_v13  ;;  %v215_v57 = vld [vmem:[%s9093_s6 + $0x98] sm:$0xff]  ;;  %v5794_v12 = vpack.c.bf16 %v223_v10, %v220_v9 }
 0x108   :  { %v5788_v60 = vpack.c.bf16 %v218_v58, %v215_v57  ;;  %5821 = vmatprep.subr.bf16.mxu0 %v5820_v11 }
 0x109   :  { %v7064_v16 = vadd.f32 %v186_v14, %v180_v15  ;;  %v227_v14 = vld [vmem:[%s9093_s6 + $0xf8] sm:$0xff]  ;;  %v230_v15 = vld [vmem:[%s9093_s6 + $0x110] sm:$0xff]  ;;  %5823 = vmatpush3.bf16.msra.mxu0 %v5820_v11 }
 0x10a   :  { %5789 = vmatprep.subr.bf16.mxu1 %v5788_v60  ;;  %v5796_v18 = vpack.c.bf16 %v230_v15, %v227_v14  ;;  %5825 = vmatprep.subr.bf16.mxu0 %v5824_v22 }
 0x10b   :  { %334 = vadd.xlane.f32.xlu1 %v7064_v16  ;;  %5791 = vmatpush1.bf16.msra.mxu1 %v5790_v2 }
 0x10c   :  { %5793 = vmatprep.subr.bf16.mxu1 %v5792_v6 }
 0x10d   :  { %5827 = vmatpush3.bf16.msra.mxu0 %v5824_v22 }
 0x10e   :  { %5829 = vmatprep.subr.bf16.mxu0 %v5828_v31 }
 0x10f   :  { %5795 = vmatpush1.bf16.msra.mxu1 %v5794_v12 }
 0x110   :  { %5797 = vmatprep.subr.bf16.mxu1 %v5796_v18 }
 0x111   :  { %5831 = vmatpush3.bf16.msra.mxu0 %v5828_v31 }
 0x112   :  { %5833 = vmatprep.subr.bf16.mxu0 %v5832_v40 }
 0x113   :  { %5799 = vmatpush1.bf16.msra.mxu1 %v5798_v23 }
 0x114   :  { %5801 = vmatprep.subr.bf16.mxu1 %v5800_v27 }
 0x115   :  { %5835 = vmatpush3.bf16.msra.mxu0 %v5832_v40 }
 0x117   :  { %5803 = vmatpush1.bf16.msra.mxu1 %v5802_v32 }
 0x118   :  { %5805 = vmatprep.subr.bf16.mxu1 %v5804_v36 }
 0x18c   :  { %v329_v41 = vpop.xlane.xlu0 %328 }
 0x18d   :  { %v337_v42 = vmul.f32 0.0078125, %v329_v41  ;;  %v5806_v41 = vpack.c.bf16 %v241_v39, %v238_v38 }
 0x18f   :  { %v7116_v43 = vsub.f32 %v7046_v1, %v337_v42  ;;  %v6833_v42 = vmov 0.0   ;;  %5807 = vmatpush1.bf16.msra.mxu1 %v5806_v41 }
 0x190   :  { %v331_v44 = vpop.xlane.xlu0 %330  ;;  %469 = vmatprep.mubr.f32.mxu1 %v6833_v42 }
 0x191   :  { %v338_v45 = vmul.f32 0.0078125, %v331_v44  ;;  %v345_v46 = vmul.f32 %v7116_v43, %v7116_v43  ;;  %v240_v44 = vld [vmem:[%s9093_s6 + $0x160] sm:$0xff] }
 0x193   :  { %349 = vadd.xlane.f32.xlu0 %v345_v46  ;;  %v7121_v47 = vsub.f32 %v7052_v7, %v338_v45  ;;  %v243_v45 = vld [vmem:[%s9093_s6 + $0x178] sm:$0xff] }
 0x194   :  { %v333_v48 = vpop.xlane.xlu1 %332  ;;  %v5836_v46 = vpack.c.bf16 %v243_v45, %v240_v44 }
 0x195   :  { %v339_v49 = vmul.f32 0.0078125, %v333_v48  ;;  %v346_v50 = vmul.f32 %v7121_v47, %v7121_v47 }
 0x196   :  { %5837 = vmatprep.subr.bf16.mxu0 %v5836_v46 }
 0x197   :  { %351 = vadd.xlane.f32.xlu1 %v346_v50  ;;  %v7126_v51 = vsub.f32 %v7058_v13, %v339_v49  ;;  %5839 = vmatpush3.bf16.msra.mxu0 %v5836_v46  ;;  %v373_v50 = vlaneseq }
 0x198   :  { %v335_v52 = vpop.xlane.xlu1 %334 }
 0x199   :  { %v340_v53 = vmul.f32 0.0078125, %v335_v52  ;;  %v347_v54 = vmul.f32 %v7126_v51, %v7126_v51 }
 0x19b   :  { %353 = vadd.xlane.f32.xlu0 %v347_v54  ;;  %v7131_v55 = vsub.f32 %v7064_v16, %v340_v53 }
 0x19d   :  { %v348_v56 = vmul.f32 %v7131_v55, %v7131_v55 }
 0x19f   :  { %355 = vadd.xlane.f32.xlu1 %v348_v56  ;;  %v7232_v56 = vshrl.u32 %v373_v50, 7 }
 0x1a1   :  { %v7235_v60 = vsub.s32 0, %v7232_v56  ;;  %v7241_v0 = vsub.s32 1, %v7232_v56  ;;  %v7257_v24 = vsub.s32 2, %v7232_v56 }
 0x1a3   :  { %v376_v3 = vrot.slane %v195_v62, %v7235_v60  ;;  %v384_v8 = vrot.slane %v195_v62, %v7241_v0 }
 0x220   :  { %v350_v48 = vpop.xlane.xlu0 %349 }
 0x221   :  { %v357_v49 = vmul.f32 0.0078125, %v350_v48 }
 0x223   :  { %v361_v52 = vadd.f32 1e-06, %v357_v49 }
 0x224   :  { %v352_v53 = vpop.xlane.xlu1 %351 }
 0x225   :  { %6571 = vrsqrt.f32 %v361_v52  ;;  %v358_v54 = vmul.f32 0.0078125, %v352_v53 }
 0x227   :  { %v362_v57 = vadd.f32 1e-06, %v358_v54 }
 0x228   :  { %v354_v58 = vpop.xlane.xlu0 %353 }
 0x229   :  { %6573 = vrsqrt.f32 %v362_v57  ;;  %v359_v59 = vmul.f32 0.0078125, %v354_v58 }
 0x22b   :  { %v363_v61 = vadd.f32 1e-06, %v359_v59 }
 0x22c   :  { %v356_v63 = vpop.xlane.xlu1 %355 }
 0x22d   :  { %6575 = vrsqrt.f32 %v363_v61  ;;  %v360_v2 = vmul.f32 0.0078125, %v356_v63 }
 0x22f   :  { %v6572_v4 = vpop.eup %6571  ;;  %v364_v5 = vadd.f32 1e-06, %v360_v2 }
 0x230   :  { %v369_v6 = vmul.f32 %v6572_v4, %v7116_v43 }
 0x231   :  { %6577 = vrsqrt.f32 %v364_v5  ;;  %v7302_v5 = vld [vmem:[%s9089_s2 + $0x8] sm:$0xff] }
 0x232   :  { %v377_v9 = vmul.f32 %v376_v3, %v369_v6 }
 0x233   :  { %v6574_v10 = vpop.eup %6573 }
 0x234   :  { %v385_v11 = vadd.f32 %v384_v8, %v377_v9  ;;  %v370_v12 = vmul.f32 %v6574_v10, %v7121_v47  ;;  %v7307_v9 = vld [vmem:[%s9089_s2] sm:$0xff] }
 0x236   :  { %470 = vmatmul.mubr.f32.vlgmr.msra.gmra.mrb[0].mxu1 %v385_v11  ;;  %5400 = vmatprep.mubr.f32.mxu0 %v385_v11  ;;  %v378_v14 = vmul.f32 %v376_v3, %v370_v12 }
 0x237   :  { %v6576_v15 = vpop.eup %6575  ;;  %475 = vmatprep.mubr.f32.mxu1 %v6833_v42 }
 0x238   :  { %v386_v17 = vadd.f32 %v384_v8, %v378_v14  ;;  %v371_v18 = vmul.f32 %v6576_v15, %v7126_v51  ;;  %v244_v51 = vld [vmem:[%s9094_s7] sm:$0x7]  ;;  %v7314_v15 = vld [vmem:[%s9089_s2 + $0x18] sm:$0xff] }
 0x239   :  { %v393_v23 = vrot.slane %v244_v51, %v7235_v60  ;;  %v401_v27 = vrot.slane %v244_v51, %v7257_v24  ;;  %v397_v28 = vrot.slane %v244_v51, %v7241_v0 }
 0x23a   :  { %476 = vmatmul.mubr.f32.gmra.mrb[2].mxu1 %v386_v17  ;;  %5401 = vmatmul.mubr.f32.vlgmr.msra.gmra.mrb[8].mxu0 %v386_v17  ;;  %v379_v43 = vmul.f32 %v376_v3, %v371_v18 }
 0x23b   :  { %v6578_v19 = vpop.eup %6577  ;;  %481 = vmatprep.mubr.f32.mxu1 %v6833_v42 }
 0x23c   :  { %v387_v20 = vadd.f32 %v384_v8, %v379_v43  ;;  %v372_v21 = vmul.f32 %v6578_v19, %v7131_v55  ;;  %v7320_v19 = vld [vmem:[%s9089_s2 + $0x10] sm:$0xff] }
 0x23e   :  { %482 = vmatmul.mubr.f32.gmra.mrb[4].mxu1 %v387_v20  ;;  %5403 = vmatprep.mubr.f32.mxu0 %v387_v20  ;;  %v380_v47 = vmul.f32 %v376_v3, %v372_v21 }
 0x23f   :  { %487 = vmatprep.mubr.f32.mxu1 %v6833_v42 }
 0x240   :  { %v388_v22 = vadd.f32 %v384_v8, %v380_v47 }
 0x242   :  { %488 = vmatmul.mubr.f32.gmra.mrb[6].mxu1 %v388_v22  ;;  %5404 = vmatmul.mubr.f32.gmra.mrb[10].mxu0 %v388_v22 }
 0x309   :  { %v471_v25 = vpop.f32.mrb[0].mxu1 }
 0x30a   :  { %v7259_v55 = vadd.f32 %v471_v25, %v393_v23  ;;  %v473_v26 = vpop.f32.mrb[1].mxu1 }
 0x30b   :  { %v474_v34 = vadd.f32 %v473_v26, %v397_v28 }
 0x30c   :  { %5414 = vmatprep.mubr.msk.f32.mxu1 %vm579_vm0, %v7259_v55 }
 0x30d   :  { %v477_v29 = vpop.f32.mrb[2].mxu1  ;;  %v5402_v30 = vpop.f32.mrb[8].mxu0 }
 0x30e   :  { %v566_v31 = vadd.f32 %v5402_v30, %v401_v27  ;;  %v479_v32 = vpop.f32.mrb[3].mxu1  ;;  %v560_v33 = vpop.f32.mrb[9].mxu0  ;;  %v7287_v63 = vadd.f32 %v477_v29, %v393_v23 }
 0x30f   :  { %v480_v35 = vadd.f32 %v479_v32, %v397_v28  ;;  %v561_v36 = vadd.f32 %v560_v33, %v401_v27 }
 0x311   :  { %v483_v38 = vpop.f32.mrb[4].mxu1  ;;  %v5840_v39 = vpack.c.bf16 %v480_v35, %v474_v34  ;;  %v5852_v40 = vpack.c.bf16 %v566_v31, %v561_v36  ;;  %v7271_v41 = vpack.i.bf16 %v480_v35, %v474_v34  ;;  %v7273_v45 = vpack.i.bf16 %v566_v31, %v561_v36 }
 0x312   :  { %v485_v44 = vpop.f32.mrb[5].mxu1  ;;  %v7289_v2 = vadd.f32 %v483_v38, %v393_v23 }
 0x313   :  { %5842 = vmatprep.subr.msk.bf16.mxu1 %vm7267_vm1, %v5840_v39  ;;  %v486_v53 = vadd.f32 %v485_v44, %v397_v28 }
 0x314   :  { %5845 = vmatpush3.bf16.xpose.msk.msra.mxu1 %vm7267_vm1, %v5840_v39 }
 0x315   :  { %v489_v46 = vpop.f32.mrb[6].mxu1  ;;  %v5405_v48 = vpop.f32.mrb[10].mxu0 }
 0x316   :  { %v576_v49 = vadd.f32 %v5405_v48, %v401_v27  ;;  %v491_v50 = vpop.f32.mrb[7].mxu1  ;;  %v570_v52 = vpop.f32.mrb[11].mxu0  ;;  %v7295_v3 = vadd.f32 %v489_v46, %v393_v23 }
 0x317   :  { %v492_v54 = vadd.f32 %v491_v50, %v397_v28  ;;  %v571_v57 = vadd.f32 %v570_v52, %v401_v27 }
 0x319   :  { %v5846_v58 = vpack.c.bf16 %v492_v54, %v486_v53  ;;  %v5856_v59 = vpack.c.bf16 %v576_v49, %v571_v57  ;;  %v7279_v61 = vpack.i.bf16 %v492_v54, %v486_v53  ;;  %v7281_v62 = vpack.i.bf16 %v576_v49, %v571_v57 }
 0x31b   :  { %5848 = vmatprep.subr.msk.bf16.mxu1 %vm7267_vm1, %v5846_v58 }
 0x31c   :  { %5851 = vmatpush3.bf16.xpose.msk.msra.mxu1 %vm7267_vm1, %v5846_v58 }
 0x31d   :  { %5853 = vmatprep.subr.bf16.mxu1 %v5852_v40 }
 0x323   :  { %5415 = vmatmul.mubr.msk.f32.vlgmr.msra.gmra.mrb[8].mxu1 %vm579_vm0, %v7287_v63 }
 0x324   :  { %5417 = vmatprep.mubr.msk.f32.mxu1 %vm579_vm0, %v7289_v2  ;;  %5855 = vmatpush3.bf16.msra.mxu1 %v5852_v40 }
 0x325   :  { %5857 = vmatprep.subr.bf16.mxu1 %v5856_v59 }
 0x327   :  { %5418 = vmatmul.mubr.msk.f32.gmra.mrb[10].mxu1 %vm579_vm0, %v7295_v3 }
 0x328   :  { %5859 = vmatpush3.bf16.msra.mxu1 %v5856_v59 }
 0x3f6   :  { %v5416_v4 = vpop.f32.mrb[8].mxu1 }
 0x3f7   :  { %v690_v6 = vmul.f32 0.17677669, %v5416_v4  ;;  %v670_v8 = vpop.f32.mrb[9].mxu1 }
 0x3f8   :  { %v689_v10 = vmul.f32 0.17677669, %v670_v8 }
 0x3f9   :  { %v694_v11 = vadd.f32 %v690_v6, %v7302_v5 }
 0x3fa   :  { %v5419_v12 = vpop.f32.mrb[10].mxu1  ;;  %v693_v14 = vadd.f32 %v689_v10, %v7307_v9 }
 0x3fb   :  { %v692_v17 = vmul.f32 0.17677669, %v5419_v12  ;;  %v680_v18 = vpop.f32.mrb[11].mxu1  ;;  %v700_v43 = vsel %vm579_vm0, %v694_v11, -inf }
 0x3fc   :  { %v691_v20 = vmul.f32 0.17677669, %v680_v18  ;;  %701 = vmax.xlane.f32.xlu1 %v700_v43  ;;  %v697_v21 = vsel %vm579_vm0, %v693_v14, -inf }
 0x3fd   :  { %698 = vmax.xlane.f32.xlu0 %v697_v21  ;;  %v696_v47 = vadd.f32 %v692_v17, %v7314_v15 }
 0x3fe   :  { %v695_v22 = vadd.f32 %v691_v20, %v7320_v19 }
 0x3ff   :  { %v706_v51 = vsel %vm579_vm0, %v696_v47, -inf }
 0x400   :  { %707 = vmax.xlane.f32.xlu1 %v706_v51  ;;  %v703_v23 = vsel %vm579_vm0, %v695_v22, -inf }
 0x401   :  { %704 = vmax.xlane.f32.xlu0 %v703_v23 }
 0x489   :  { %v702_v25 = vpop.xlane.xlu1 %701 }
 0x48a   :  { %v710_v26 = vsub.f32 %v694_v11, %v702_v25  ;;  %v699_v27 = vpop.xlane.xlu0 %698 }
 0x48b   :  { %v709_v28 = vsub.f32 %v693_v14, %v699_v27 }
 0x48c   :  { %v715_v29 = vmul.f32 1.442695, %v710_v26 }
 0x48d   :  { %v713_v30 = vmul.f32 1.442695, %v709_v28  ;;  %v708_v31 = vpop.xlane.xlu1 %707 }
 0x48e   :  { %6579 = vpow2.f32 %v715_v29  ;;  %v712_v32 = vsub.f32 %v696_v47, %v708_v31  ;;  %v705_v33 = vpop.xlane.xlu0 %704 }
 0x48f   :  { %6581 = vpow2.f32 %v713_v30  ;;  %v711_v34 = vsub.f32 %v695_v22, %v705_v33 }
 0x490   :  { %v719_v35 = vmul.f32 1.442695, %v712_v32 }
 0x491   :  { %v717_v36 = vmul.f32 1.442695, %v711_v34 }
 0x492   :  { %6583 = vpow2.f32 %v719_v35 }
 0x493   :  { %6585 = vpow2.f32 %v717_v36 }
 0x498   :  { %v6580_v38 = vpop.eup %6579 }
 0x499   :  { %v6582_v39 = vpop.eup %6581  ;;  %v724_v40 = vsel %vm579_vm0, %v6580_v38, 0.0 }
 0x49a   :  { %725 = vadd.xlane.f32.xlu1 %v724_v40  ;;  %v721_v44 = vsel %vm579_vm0, %v6582_v39, 0.0 }
 0x49b   :  { %722 = vadd.xlane.f32.xlu0 %v721_v44 }
 0x49c   :  { %v6584_v46 = vpop.eup %6583 }
 0x49d   :  { %v6586_v48 = vpop.eup %6585  ;;  %v730_v49 = vsel %vm579_vm0, %v6584_v46, 0.0 }
 0x49e   :  { %731 = vadd.xlane.f32.xlu1 %v730_v49  ;;  %v727_v50 = vsel %vm579_vm0, %v6586_v48, 0.0 }
 0x49f   :  { %728 = vadd.xlane.f32.xlu0 %v727_v50 }
 0x4af   :  { %6397 = vrot.lane.b32.xlu1 %v7279_v61, %s6834_s26 }
 0x4b3   :  { %6402 = vrot.lane.b32.xlu1 %v7271_v41, %s6835_s0 }
 0x4b5   :  { %6392 = vrot.lane.b32.xlu0 %v7271_v41, %s6834_s26 }
 0x4b7   :  { %838 = vrot.lane.b32.xlu1 %v7259_v55, %s6834_s26 }
 0x4b9   :  { %840 = vrot.lane.b32.xlu0 %v7287_v63, %s6834_s26 }
 0x4bb   :  { %6407 = vrot.lane.b32.xlu1 %v7279_v61, %s6835_s0 }
 0x4bd   :  { %842 = vrot.lane.b32.xlu0 %v7289_v2, %s6834_s26 }
 0x4bf   :  { %844 = vrot.lane.b32.xlu1 %v7295_v3, %s6834_s26 }
 0x4c1   :  { %1120 = vrot.lane.b32.xlu0 %v7259_v55, %s6835_s0 }
 0x4c3   :  { %1122 = vrot.lane.b32.xlu1 %v7287_v63, %s6835_s0 }
 0x4c5   :  { %1124 = vrot.lane.b32.xlu0 %v7289_v2, %s6835_s0 }
 0x4c7   :  { %1126 = vrot.lane.b32.xlu1 %v7295_v3, %s6835_s0 }
 0x527   :  { %v726_v52 = vpop.xlane.xlu1 %725 }
 0x528   :  { %6587 = vrcp.f32 %v726_v52  ;;  %v723_v53 = vpop.xlane.xlu0 %722 }
 0x529   :  { %6589 = vrcp.f32 %v723_v53 }
 0x52b   :  { %v732_v54 = vpop.xlane.xlu1 %731 }
 0x52c   :  { %6591 = vrcp.f32 %v732_v54  ;;  %v729_v57 = vpop.xlane.xlu0 %728 }
 0x52d   :  { %6593 = vrcp.f32 %v729_v57 }
 0x52f   :  { %v6398_v58 = vpop.permute.xlu1 %6397 }
 0x530   :  { %v6393_v59 = vpop.permute.xlu0 %6392  ;;  %v6400_v11 = vunpack.i.h.bf16 %v6398_v58  ;;  %v6399_v12 = vunpack.i.l.bf16 %v6398_v58 }
 0x531   :  { %v6395_v4 = vunpack.i.h.bf16 %v6393_v59  ;;  %v6394_v6 = vunpack.i.l.bf16 %v6393_v59 }
 0x532   :  { %v6588_v8 = vpop.eup %6587  ;;  %v5866_v47 = vpack.c.bf16 %v6400_v11, %v6399_v12 }
 0x533   :  { %v6590_v10 = vpop.eup %6589  ;;  %v5860_v14 = vpack.c.bf16 %v6395_v4, %v6394_v6  ;;  %v6403_v17 = vpop.permute.xlu1 %6402  ;;  %v738_v43 = vmul.f32 %v6588_v8, %v6580_v38 }
 0x534   :  { %v737_v18 = vmul.f32 %v6590_v10, %v6582_v39  ;;  %v6405_v25 = vunpack.i.h.bf16 %v6403_v17  ;;  %v6404_v26 = vunpack.i.l.bf16 %v6403_v17  ;;  %v841_v28 = vpop.permute.xlu0 %840 }
 0x535   :  { %5862 = vmatprep.subr.msk.bf16.mxu1 %vm7267_vm1, %v5860_v14 }
 0x536   :  { %v6592_v20 = vpop.eup %6591  ;;  %5428 = vmatprep.mubr.msk.f32.mxu1 %vm579_vm0, %v737_v18  ;;  %v5880_v27 = vpack.c.bf16 %v6405_v25, %v6404_v26 }
 0x537   :  { %v6594_v21 = vpop.eup %6593  ;;  %5429 = vmatmul.mubr.msk.f32.vlgmr.msra.gmra.mrb[12].mxu1 %vm579_vm0, %v738_v43  ;;  %v740_v51 = vmul.f32 %v6592_v20, %v6584_v46  ;;  %v839_v23 = vpop.permute.xlu1 %838 }
 0x538   :  { %5865 = vmatpush3.bf16.xpose.msk.msra.mxu1 %vm7267_vm1, %v5860_v14  ;;  %v739_v22 = vmul.f32 %v6594_v21, %v6586_v48  ;;  %v843_v32 = vpop.permute.xlu0 %842 }
 0x539   :  { %5868 = vmatprep.subr.msk.bf16.mxu1 %vm7267_vm1, %v5866_v47 }
 0x53a   :  { %5431 = vmatprep.mubr.msk.f32.mxu1 %vm579_vm0, %v739_v22 }
 0x53b   :  { %5432 = vmatmul.mubr.msk.f32.gmra.mrb[14].mxu1 %vm579_vm0, %v740_v51  ;;  %v6408_v29 = vpop.permute.xlu1 %6407 }
 0x53c   :  { %5442 = vmatprep.mubr.msk.f32.mxu1 %vm579_vm0, %v839_v23  ;;  %v6410_v30 = vunpack.i.h.bf16 %v6408_v29  ;;  %v6409_v31 = vunpack.i.l.bf16 %v6408_v29  ;;  %v1121_v35 = vpop.permute.xlu0 %1120 }
 0x53e   :  { %v5886_v33 = vpack.c.bf16 %v6410_v30, %v6409_v31 }
 0x53f   :  { %v845_v34 = vpop.permute.xlu1 %844 }
 0x540   :  { %5871 = vmatpush3.bf16.xpose.msk.msra.mxu1 %vm7267_vm1, %v5866_v47  ;;  %v1125_v38 = vpop.permute.xlu0 %1124 }
 0x541   :  { %5882 = vmatprep.subr.msk.bf16.mxu1 %vm7267_vm1, %v5880_v27 }
 0x543   :  { %v1123_v36 = vpop.permute.xlu1 %1122 }
 0x547   :  { %5443 = vmatmul.mubr.msk.f32.vlgmr.msra.gmra.mrb[16].mxu1 %vm579_vm0, %v841_v28  ;;  %v1127_v39 = vpop.permute.xlu1 %1126 }
 0x548   :  { %5445 = vmatprep.mubr.msk.f32.mxu1 %vm579_vm0, %v843_v32  ;;  %5885 = vmatpush3.bf16.xpose.msk.msra.mxu1 %vm7267_vm1, %v5880_v27 }
 0x549   :  { %5888 = vmatprep.subr.msk.bf16.mxu1 %vm7267_vm1, %v5886_v33 }
 0x54b   :  { %5446 = vmatmul.mubr.msk.f32.gmra.mrb[18].mxu1 %vm579_vm0, %v845_v34 }
 0x54c   :  { %5470 = vmatprep.mubr.msk.f32.mxu1 %vm579_vm0, %v1121_v35 }
 0x550   :  { %5891 = vmatpush3.bf16.xpose.msk.msra.mxu1 %vm7267_vm1, %v5886_v33 }
 0x557   :  { %5471 = vmatmul.mubr.msk.f32.vlgmr.msra.gmra.mrb[20].mxu1 %vm579_vm0, %v1123_v36 }
 0x558   :  { %5473 = vmatprep.mubr.msk.f32.mxu1 %vm579_vm0, %v1125_v38 }
 0x55b   :  { %5474 = vmatmul.mubr.msk.f32.gmra.mrb[22].mxu1 %vm579_vm0, %v1127_v39 }
 0x60a   :  { %v7383_v40 = vpop.f32.mrb[12].mxu1 }
 0x60b   :  { %v7385_v44 = vpop.f32.mrb[13].mxu1 }
 0x60e   :  { %v7387_v46 = vpop.f32.mrb[14].mxu1 }
 0x60f   :  { %v7389_v48 = vpop.f32.mrb[15].mxu1 }
 0x61a   :  { %v7391_v49 = vpop.f32.mrb[16].mxu1 }
 0x61b   :  { %v936_v50 = vpop.f32.mrb[17].mxu1 }
 0x61e   :  { %v5447_v52 = vpop.f32.mrb[18].mxu1 }
 0x61f   :  { %v946_v53 = vpop.f32.mrb[19].mxu1 }
 0x62a   :  { %v5472_v54 = vpop.f32.mrb[20].mxu1 }
 0x62b   :  { %v1238_v57 = vmul.f32 0.17677669, %v5472_v54  ;;  %v1218_v58 = vpop.f32.mrb[21].mxu1 }
 0x62c   :  { %v1237_v59 = vmul.f32 0.17677669, %v1218_v58 }
 0x62d   :  { %v1242_v4 = vadd.f32 %v1238_v57, %v7302_v5  ;;  %v957_v57 = vmul.f32 0.17677669, %v946_v53 }
 0x62e   :  { %v5475_v6 = vpop.f32.mrb[22].mxu1  ;;  %v1241_v8 = vadd.f32 %v1237_v59, %v7307_v9  ;;  %v956_v59 = vmul.f32 0.17677669, %v7391_v49 }
 0x62f   :  { %v1228_v10 = vpop.f32.mrb[23].mxu1  ;;  %v1248_v11 = vsel %vm579_vm0, %v1242_v4, -inf  ;;  %v1240_v12 = vmul.f32 0.17677669, %v5475_v6  ;;  %v7440_v6 = vadd.f32 %v957_v57, %v7320_v19 }
 0x630   :  { %v1239_v14 = vmul.f32 0.17677669, %v1228_v10  ;;  %1249 = vmax.xlane.f32.xlu1 %v1248_v11  ;;  %v1245_v17 = vsel %vm579_vm0, %v1241_v8, -inf }
 0x631   :  { %1246 = vmax.xlane.f32.xlu0 %v1245_v17  ;;  %v1244_v20 = vadd.f32 %v1240_v12, %v7314_v15 }
 0x632   :  { %v1243_v18 = vadd.f32 %v1239_v14, %v7320_v19 }
 0x633   :  { %v1254_v21 = vsel %vm579_vm0, %v1244_v20, -inf }
 0x634   :  { %v1251_v43 = vsel %vm579_vm0, %v1243_v18, -inf }
 0x635   :  { %1252 = vmax.xlane.f32.xlu0 %v1251_v43 }
 0x639   :  { %1255 = vmax.xlane.f32.xlu0 %v1254_v21 }
 0x6bd   :  { %v1250_v47 = vpop.xlane.xlu1 %1249 }
 0x6be   :  { %v1258_v22 = vsub.f32 %v1242_v4, %v1250_v47  ;;  %v1247_v51 = vpop.xlane.xlu0 %1246  ;;  %v958_v4 = vmul.f32 0.17677669, %v5447_v52 }
 0x6bf   :  { %v1257_v23 = vsub.f32 %v1241_v8, %v1247_v51 }
 0x6c0   :  { %v1263_v25 = vmul.f32 1.442695, %v1258_v22 }
 0x6c1   :  { %v1261_v26 = vmul.f32 1.442695, %v1257_v23 }
 0x6c2   :  { %6595 = vpow2.f32 %v1263_v25  ;;  %v1253_v31 = vpop.xlane.xlu0 %1252 }
 0x6c3   :  { %6597 = vpow2.f32 %v1261_v26  ;;  %v1259_v32 = vsub.f32 %v1243_v18, %v1253_v31 }
 0x6c5   :  { %v1265_v33 = vmul.f32 1.442695, %v1259_v32 }
 0x6c6   :  { %v1256_v34 = vpop.xlane.xlu0 %1255 }
 0x6c7   :  { %v1260_v35 = vsub.f32 %v1244_v20, %v1256_v34  ;;  %6599 = vpow2.f32 %v1265_v33 }
 0x6c9   :  { %v1267_v36 = vmul.f32 1.442695, %v1260_v35 }
 0x6cb   :  { %6601 = vpow2.f32 %v1267_v36 }
 0x6cc   :  { %v7401_v27 = vpop.eup %6595 }
 0x6cd   :  { %v7403_v28 = vpop.eup %6597  ;;  %v1272_v29 = vsel %vm579_vm0, %v7401_v27, 0.0 }
 0x6ce   :  { %1273 = vadd.xlane.f32.xlu1 %v1272_v29  ;;  %v1269_v30 = vsel %vm579_vm0, %v7403_v28, 0.0 }
 0x6cf   :  { %1270 = vadd.xlane.f32.xlu0 %v1269_v30 }
 0x6d1   :  { %v7417_v38 = vpop.eup %6599 }
 0x6d2   :  { %v1275_v39 = vsel %vm579_vm0, %v7417_v38, 0.0 }
 0x6df   :  { %6417 = vrot.lane.b32.xlu1 %v7281_v62, %s6835_s0 }
 0x6e3   :  { %6422 = vrot.lane.b32.xlu1 %v7271_v41, %s6836_s4  ;;  %v7421_v41 = vpop.eup %6601 }
 0x6e4   :  { %v1278_v54 = vsel %vm579_vm0, %v7421_v41, 0.0 }
 0x6e5   :  { %6412 = vrot.lane.b32.xlu0 %v7273_v45, %s6835_s0 }
 0x6e7   :  { %6427 = vrot.lane.b32.xlu1 %v7279_v61, %s6836_s4  ;;  %v955_v61 = vmul.f32 0.17677669, %v936_v50 }
 0x6e9   :  { %v7434_v58 = vadd.f32 %v955_v61, %v7307_v9 }
 0x704   :  { %1276 = vadd.xlane.f32.xlu0 %v1275_v39 }
 0x70b   :  { %1279 = vadd.xlane.f32.xlu1 %v1278_v54 }
 0x71a   :  { %1398 = vrot.lane.b32.xlu0 %v7259_v55, %s6836_s4  ;;  %v963_v55 = vsel %vm579_vm0, %v7434_v58, -inf }
 0x71c   :  { %1400 = vrot.lane.b32.xlu1 %v7287_v63, %s6836_s4  ;;  %v7443_v63 = vadd.f32 %v956_v59, %v7302_v5 }
 0x71e   :  { %1402 = vrot.lane.b32.xlu0 %v7289_v2, %s6836_s4  ;;  %v969_v2 = vsel %vm579_vm0, %v7440_v6, -inf  ;;  %v966_v49 = vsel %vm579_vm0, %v7443_v63, -inf }
 0x720   :  { %1404 = vrot.lane.b32.xlu1 %v7295_v3, %s6836_s4  ;;  %v7448_v3 = vadd.f32 %v958_v4, %v7314_v15 }
 0x722   :  { %v972_v50 = vsel %vm579_vm0, %v7448_v3, -inf }
 0x73d   :  { %964 = vmax.xlane.f32.xlu0 %v963_v55 }
 0x741   :  { %970 = vmax.xlane.f32.xlu0 %v969_v2 }
 0x744   :  { %967 = vmax.xlane.f32.xlu1 %v966_v49 }
 0x745   :  { %973 = vmax.xlane.f32.xlu0 %v972_v50 }
 0x75b   :  { %v1274_v52 = vpop.xlane.xlu1 %1273 }
 0x75c   :  { %v1271_v53 = vpop.xlane.xlu0 %1270 }
 0x75d   :  { %6603 = vrcp.f32 %v1271_v53 }
 0x75e   :  { %6605 = vrcp.f32 %v1274_v52 }
 0x75f   :  { %v6418_v8 = vpop.permute.xlu1 %6417 }
 0x760   :  { %v6413_v10 = vpop.permute.xlu0 %6412  ;;  %v6420_v11 = vunpack.i.h.bf16 %v6418_v8  ;;  %v6419_v12 = vunpack.i.l.bf16 %v6418_v8 }
 0x761   :  { %v6415_v14 = vunpack.i.h.bf16 %v6413_v10  ;;  %v6414_v17 = vunpack.i.l.bf16 %v6413_v10 }
 0x762   :  { %v5896_v47 = vpack.c.bf16 %v6420_v11, %v6419_v12 }
 0x763   :  { %v6423_v18 = vpop.permute.xlu1 %6422  ;;  %v5892_v43 = vpack.c.bf16 %v6415_v14, %v6414_v17 }
 0x764   :  { %v6425_v20 = vunpack.i.h.bf16 %v6423_v18  ;;  %v6424_v21 = vunpack.i.l.bf16 %v6423_v18 }
 0x765   :  { %5893 = vmatprep.subr.bf16.mxu1 %v5892_v43 }
 0x766   :  { %5895 = vmatpush3.bf16.msra.mxu1 %v5892_v43  ;;  %v5900_v25 = vpack.c.bf16 %v6425_v20, %v6424_v21 }
 0x767   :  { %v6604_v22 = vpop.eup %6603  ;;  %5897 = vmatprep.subr.bf16.mxu1 %v5896_v47  ;;  %v6428_v29 = vpop.permute.xlu1 %6427 }
 0x768   :  { %v6606_v51 = vpop.eup %6605  ;;  %v1285_v23 = vmul.f32 %v6604_v22, %v7403_v28  ;;  %v6430_v30 = vunpack.i.h.bf16 %v6428_v29  ;;  %v6429_v31 = vunpack.i.l.bf16 %v6428_v29 }
 0x769   :  { %v1286_v26 = vmul.f32 %v6606_v51, %v7401_v27 }
 0x76a   :  { %5899 = vmatpush3.bf16.msra.mxu1 %v5896_v47  ;;  %5484 = vmatprep.mubr.msk.f32.mxu1 %vm579_vm0, %v1285_v23  ;;  %v5906_v32 = vpack.c.bf16 %v6430_v30, %v6429_v31 }
 0x76b   :  { %5902 = vmatprep.subr.msk.bf16.mxu1 %vm7267_vm1, %v5900_v25 }
 0x76d   :  { %5485 = vmatmul.mubr.msk.f32.vlgmr.msra.gmra.mrb[24].mxu1 %vm579_vm0, %v1286_v26 }
 0x773   :  { %5905 = vmatpush3.bf16.xpose.msk.msra.mxu1 %vm7267_vm1, %v5900_v25 }
 0x774   :  { %5908 = vmatprep.subr.msk.bf16.mxu1 %vm7267_vm1, %v5906_v32 }
 0x77b   :  { %5911 = vmatpush3.bf16.xpose.msk.msra.mxu1 %vm7267_vm1, %v5906_v32 }
 0x791   :  { %v1277_v28 = vpop.xlane.xlu0 %1276 }
 0x792   :  { %6607 = vrcp.f32 %v1277_v28 }
 0x795   :  { %v1399_v36 = vpop.permute.xlu0 %1398 }
 0x798   :  { %v1280_v27 = vpop.xlane.xlu1 %1279 }
 0x799   :  { %6609 = vrcp.f32 %v1280_v27  ;;  %v1403_v61 = vpop.permute.xlu0 %1402 }
 0x79c   :  { %v6608_v33 = vpop.eup %6607  ;;  %v1401_v54 = vpop.permute.xlu1 %1400 }
 0x79d   :  { %v1287_v34 = vmul.f32 %v6608_v33, %v7417_v38 }
 0x79f   :  { %5487 = vmatprep.mubr.msk.f32.mxu1 %vm579_vm0, %v1287_v34 }
 0x7a0   :  { %v1405_v57 = vpop.permute.xlu1 %1404 }
 0x7a3   :  { %v6610_v35 = vpop.eup %6609 }
 0x7a4   :  { %v1288_v39 = vmul.f32 %v6610_v35, %v7421_v41 }
 0x7a6   :  { %5488 = vmatmul.mubr.msk.f32.gmra.mrb[26].mxu1 %vm579_vm0, %v1288_v39 }
 0x7a7   :  { %5498 = vmatprep.mubr.msk.f32.mxu1 %vm579_vm0, %v1399_v36 }
 0x7aa   :  { %5499 = vmatmul.mubr.msk.f32.vlgmr.msra.gmra.mrb[28].mxu1 %vm579_vm0, %v1401_v54 }
 0x7ab   :  { %5501 = vmatprep.mubr.msk.f32.mxu1 %vm579_vm0, %v1403_v61 }
 0x7ae   :  { %5502 = vmatmul.mubr.msk.f32.gmra.mrb[30].mxu1 %vm579_vm0, %v1405_v57 }
 0x7af   :  { %1908 = vmatprep.mubr.f32.mxu1 %v6833_v42 }
 0x7ca   :  { %v965_v4 = vpop.xlane.xlu0 %964 }
 0x7cb   :  { %v975_v50 = vsub.f32 %v7434_v58, %v965_v4 }
 0x7cd   :  { %v979_v11 = vmul.f32 1.442695, %v975_v50 }
 0x7ce   :  { %v971_v55 = vpop.xlane.xlu0 %970 }
 0x7cf   :  { %v977_v12 = vsub.f32 %v7440_v6, %v971_v55 }
 0x7d1   :  { %v968_v2 = vpop.xlane.xlu1 %967 }
 0x7d2   :  { %v976_v49 = vsub.f32 %v7443_v63, %v968_v2  ;;  %v974_v52 = vpop.xlane.xlu0 %973  ;;  %v983_v63 = vmul.f32 1.442695, %v977_v12 }
 0x7d3   :  { %v978_v8 = vsub.f32 %v7448_v3, %v974_v52 }
 0x7d4   :  { %v981_v53 = vmul.f32 1.442695, %v976_v49 }
 0x7d5   :  { %v985_v18 = vmul.f32 1.442695, %v978_v8 }
 0x7d6   :  { %6611 = vpow2.f32 %v981_v53 }
 0x7d7   :  { %6613 = vpow2.f32 %v979_v11 }
 0x7d8   :  { %6615 = vpow2.f32 %v985_v18 }
 0x7d9   :  { %6617 = vpow2.f32 %v983_v63 }
 0x7e0   :  { %v7498_v31 = vpop.eup %6611 }
 0x7e1   :  { %v6614_v32 = vpop.eup %6613  ;;  %v990_v28 = vsel %vm579_vm0, %v7498_v31, 0.0 }
 0x7e2   :  { %v7503_v27 = vpop.eup %6615  ;;  %v987_v33 = vsel %vm579_vm0, %v6614_v32, 0.0 }
 0x840   :  { %v7475_v38 = vpop.f32.mrb[24].mxu1 }
 0x841   :  { %v7477_v59 = vpop.f32.mrb[25].mxu1 }
 0x842   :  { %v6456_v41 = vpack.i.bf16 %v7475_v38, %v7477_v59 }
 0x879   :  { %v7484_v10 = vpop.f32.mrb[26].mxu1 }
 0x87a   :  { %v7487_v14 = vpop.f32.mrb[27].mxu1 }
 0x87b   :  { %v6471_v17 = vpack.i.bf16 %v7484_v10, %v7487_v14  ;;  %v279_v10 = vld [vmem:[%s9097_s10 + $0x88] sm:$0xff]  ;;  %v281_v14 = vld [vmem:[%s9097_s10 + $0x98] sm:$0xff] }
 0x87d   :  { %v5500_v43 = vpop.f32.mrb[28].mxu1 }
 0x87e   :  { %v1516_v58 = vmul.f32 0.17677669, %v5500_v43  ;;  %v1496_v20 = vpop.f32.mrb[29].mxu1 }
 0x87f   :  { %v1515_v21 = vmul.f32 0.17677669, %v1496_v20 }
 0x880   :  { %v1520_v3 = vadd.f32 %v1516_v58, %v7302_v5 }
 0x881   :  { %v5503_v47 = vpop.f32.mrb[30].mxu1  ;;  %v1519_v22 = vadd.f32 %v1515_v21, %v7307_v9 }
 0x882   :  { %v1518_v6 = vmul.f32 0.17677669, %v5503_v47  ;;  %v1506_v51 = vpop.f32.mrb[31].mxu1  ;;  %v1526_v23 = vsel %vm579_vm0, %v1520_v3, -inf }
 0x883   :  { %v1517_v25 = vmul.f32 0.17677669, %v1506_v51  ;;  %1527 = vmax.xlane.f32.xlu1 %v1526_v23  ;;  %v1523_v26 = vsel %vm579_vm0, %v1519_v22, -inf }
 0x884   :  { %1524 = vmax.xlane.f32.xlu0 %v1523_v26  ;;  %v1522_v29 = vadd.f32 %v1518_v6, %v7314_v15  ;;  %v7506_v15 = vpop.eup %6617 }
 0x885   :  { %v1521_v30 = vadd.f32 %v1517_v25, %v7320_v19  ;;  %v996_v19 = vsel %vm579_vm0, %v7503_v27, 0.0  ;;  %v993_v34 = vsel %vm579_vm0, %v7506_v15, 0.0 }
 0x886   :  { %v1532_v5 = vsel %vm579_vm0, %v1522_v29, -inf }
 0x887   :  { %1533 = vmax.xlane.f32.xlu1 %v1532_v5  ;;  %v1529_v9 = vsel %vm579_vm0, %v1521_v30, -inf }
 0x888   :  { %1530 = vmax.xlane.f32.xlu0 %v1529_v9 }
 0x88b   :  { %991 = vadd.xlane.f32.xlu1 %v990_v28 }
 0x88c   :  { %988 = vadd.xlane.f32.xlu0 %v987_v33 }
 0x88f   :  { %997 = vadd.xlane.f32.xlu1 %v996_v19 }
 0x890   :  { %994 = vadd.xlane.f32.xlu0 %v993_v34 }
 0x910   :  { %v1528_v35 = vpop.xlane.xlu1 %1527 }
 0x911   :  { %v1536_v36 = vsub.f32 %v1520_v3, %v1528_v35  ;;  %v1525_v39 = vpop.xlane.xlu0 %1524 }
 0x912   :  { %v1535_v54 = vsub.f32 %v1519_v22, %v1525_v39 }
 0x913   :  { %v1541_v61 = vmul.f32 1.442695, %v1536_v36 }
 0x914   :  { %v1539_v57 = vmul.f32 1.442695, %v1535_v54  ;;  %v1534_v4 = vpop.xlane.xlu1 %1533 }
 0x915   :  { %6619 = vpow2.f32 %v1541_v61  ;;  %v1538_v55 = vsub.f32 %v1522_v29, %v1534_v4  ;;  %v1531_v2 = vpop.xlane.xlu0 %1530 }
 0x916   :  { %6621 = vpow2.f32 %v1539_v57  ;;  %v1537_v49 = vsub.f32 %v1521_v30, %v1531_v2 }
 0x917   :  { %v1545_v50 = vmul.f32 1.442695, %v1538_v55 }
 0x918   :  { %v1543_v52 = vmul.f32 1.442695, %v1537_v49  ;;  %v992_v47 = vpop.xlane.xlu1 %991 }
 0x919   :  { %6623 = vpow2.f32 %v1545_v50  ;;  %v989_v53 = vpop.xlane.xlu0 %988 }
 0x91a   :  { %6625 = vpow2.f32 %v1543_v52 }
 0x91b   :  { %6627 = vrcp.f32 %v989_v53 }
 0x91c   :  { %v998_v22 = vpop.xlane.xlu1 %997  ;;  %6629 = vrcp.f32 %v992_v47  ;;  %v252_v47 = vld [vmem:[%s9095_s8 + $0x38] sm:$0xff] }
 0x91d   :  { %v995_v6 = vpop.xlane.xlu0 %994 }
 0x91e   :  { %6631 = vrcp.f32 %v995_v6  ;;  %v253_v6 = vld [vmem:[%s9095_s8 + $0x40] sm:$0xff] }
 0x91f   :  { %v7512_v8 = vpop.eup %6619  ;;  %6633 = vrcp.f32 %v998_v22 }
 0x920   :  { %v7514_v11 = vpop.eup %6621  ;;  %v1550_v12 = vsel %vm579_vm0, %v7512_v8, 0.0 }
 0x921   :  { %1551 = vadd.xlane.f32.xlu1 %v1550_v12  ;;  %v1547_v18 = vsel %vm579_vm0, %v7514_v11, 0.0  ;;  %v246_v12 = vld [vmem:[%s9095_s8 + $0x8] sm:$0xff] }
 0x922   :  { %1548 = vadd.xlane.f32.xlu0 %v1547_v18 }
 0x923   :  { %v7520_v43 = vpop.eup %6623 }
 0x924   :  { %v7522_v63 = vpop.eup %6625  ;;  %v1556_v58 = vsel %vm579_vm0, %v7520_v43, 0.0 }
 0x925   :  { %1557 = vadd.xlane.f32.xlu1 %v1556_v58  ;;  %v1553_v20 = vsel %vm579_vm0, %v7522_v63, 0.0  ;;  %v6628_v21 = vpop.eup %6627  ;;  %v249_v58 = vld [vmem:[%s9095_s8 + $0x20] sm:$0xff] }
 0x926   :  { %1554 = vadd.xlane.f32.xlu0 %v1553_v20  ;;  %v1003_v3 = vmul.f32 %v6628_v21, %v6614_v32  ;;  %v6630_v19 = vpop.eup %6629  ;;  %v250_v20 = vld [vmem:[%s9095_s8 + $0x28] sm:$0xff] }
 0x927   :  { %v1004_v54 = vmul.f32 %v6630_v19, %v7498_v31  ;;  %v5928_v21 = vpack.c.bf16 %v250_v20, %v249_v58  ;;  %v275_v58 = vld [vmem:[%s9097_s10 + $0x68] sm:$0xff]  ;;  %v277_v20 = vld [vmem:[%s9097_s10 + $0x78] sm:$0xff] }
 0x928   :  { %5456 = vmatprep.mubr.msk.f32.mxu0 %vm579_vm0, %v1003_v3  ;;  %v6632_v34 = vpop.eup %6631  ;;  %v251_v3 = vld [vmem:[%s9095_s8 + $0x30] sm:$0xff] }
 0x929   :  { %v6634_v61 = vpop.eup %6633  ;;  %v1005_v57 = vmul.f32 %v6632_v34, %v7506_v15  ;;  %v5932_v22 = vpack.c.bf16 %v252_v47, %v251_v3  ;;  %v7670_v3 = vpack.c.bf16 %v277_v20, %v275_v58  ;;  %v274_v47 = vld [vmem:[%s9097_s10 + $0x60] sm:$0xff] }
 0x92a   :  { %v1006_v2 = vmul.f32 %v6634_v61, %v7503_v27 }
 0x936   :  { %6437 = vrot.lane.b32.xlu1 %v7281_v62, %s6834_s26 }
 0x93a   :  { %6442 = vrot.lane.b32.xlu1 %v7273_v45, %s6836_s4 }
 0x93c   :  { %6432 = vrot.lane.b32.xlu0 %v7273_v45, %s6834_s26 }
 0x93e   :  { %6447 = vrot.lane.b32.xlu1 %v7281_v62, %s6836_s4 }
 0x942   :  { %6457 = vrot.lane.b32.xlu1 %v6456_v41, %s6835_s0 }
 0x9ae   :  { %v1552_v51 = vpop.xlane.xlu1 %1551 }
 0x9af   :  { %v1549_v23 = vpop.xlane.xlu0 %1548 }
 0x9b0   :  { %6635 = vrcp.f32 %v1549_v23 }
 0x9b1   :  { %6637 = vrcp.f32 %v1552_v51  ;;  %v254_v51 = vld [vmem:[%s9095_s8 + $0x48] sm:$0xff] }
 0x9b2   :  { %v1558_v25 = vpop.xlane.xlu1 %1557  ;;  %v5936_v23 = vpack.c.bf16 %v254_v51, %v253_v6  ;;  %v7688_v6 = vpack.c.bf16 %v281_v14, %v279_v10  ;;  %v278_v51 = vld [vmem:[%s9097_s10 + $0x80] sm:$0xff] }
 0x9b3   :  { %v1555_v26 = vpop.xlane.xlu0 %1554 }
 0x9b4   :  { %6639 = vrcp.f32 %v1555_v26  ;;  %v256_v26 = vld [vmem:[%s9095_s8 + $0x58] sm:$0xff] }
 0x9b5   :  { %6641 = vrcp.f32 %v1558_v25  ;;  %v255_v25 = vld [vmem:[%s9095_s8 + $0x50] sm:$0xff] }
 0x9b6   :  { %v6438_v29 = vpop.permute.xlu1 %6437 }
 0x9b7   :  { %v6433_v30 = vpop.permute.xlu0 %6432  ;;  %v6440_v45 = vunpack.i.h.bf16 %v6438_v29  ;;  %v6439_v5 = vunpack.i.l.bf16 %v6438_v29  ;;  %v5940_v29 = vpack.c.bf16 %v256_v26, %v255_v25  ;;  %v283_v25 = vld [vmem:[%s9097_s10 + $0xa8] sm:$0xff]  ;;  %v285_v26 = vld [vmem:[%s9097_s10 + $0xb8] sm:$0xff] }
 0x9b8   :  { %v6435_v9 = vunpack.i.h.bf16 %v6433_v30  ;;  %v6434_v62 = vunpack.i.l.bf16 %v6433_v30  ;;  %v257_v30 = vld [vmem:[%s9095_s8 + $0x60] sm:$0xff] }
 0x9b9   :  { %v5876_v28 = vpack.c.bf16 %v6440_v45, %v6439_v5  ;;  %v258_v45 = vld [vmem:[%s9095_s8 + $0x68] sm:$0xff] }
 0x9ba   :  { %v6443_v32 = vpop.permute.xlu1 %6442  ;;  %v5872_v38 = vpack.c.bf16 %v6435_v9, %v6434_v62  ;;  %v6636_v4 = vpop.eup %6635  ;;  %v5944_v5 = vpack.c.bf16 %v258_v45, %v257_v30  ;;  %v259_v9 = vld [vmem:[%s9095_s8 + $0x70] sm:$0xff]  ;;  %v260_v62 = vld [vmem:[%s9095_s8 + $0x78] sm:$0xff]  ;;  %v7706_v30 = vpack.c.bf16 %v285_v26, %v283_v25  ;;  %v282_v45 = vld [vmem:[%s9097_s10 + $0xa0] sm:$0xff] }
 0x9bb   :  { %v6445_v59 = vunpack.i.h.bf16 %v6443_v32  ;;  %v6444_v41 = vunpack.i.l.bf16 %v6443_v32  ;;  %v6638_v49 = vpop.eup %6637  ;;  %v1563_v50 = vmul.f32 %v6636_v4, %v7514_v11  ;;  %v245_v11 = vld [vmem:[%s9095_s8] sm:$0xff]  ;;  %v5948_v32 = vpack.c.bf16 %v260_v62, %v259_v9  ;;  %v267_v4 = vld [vmem:[%s9097_s10 + $0x28] sm:$0xff]  ;;  %v289_v62 = vld [vmem:[%s9097_s10 + $0xd8] sm:$0xff] }
 0x9bc   :  { %5873 = vmatprep.subr.bf16.mxu0 %v5872_v38  ;;  %v1564_v31 = vmul.f32 %v6638_v49, %v7512_v8  ;;  %v247_v8 = vld [vmem:[%s9095_s8 + $0x10] sm:$0xff]  ;;  %v5920_v18 = vpack.c.bf16 %v246_v12, %v245_v11  ;;  %v287_v9 = vld [vmem:[%s9097_s10 + $0xc8] sm:$0xff] }
 0x9bd   :  { %5875 = vmatpush3.bf16.msra.mxu0 %v5872_v38  ;;  %v5912_v39 = vpack.c.bf16 %v6445_v59, %v6444_v41  ;;  %v291_v25 = vld [vmem:[%s9097_s10 + $0xe8] sm:$0xff] }
 0x9be   :  { %v6448_v33 = vpop.permute.xlu1 %6447  ;;  %5877 = vmatprep.subr.bf16.mxu0 %v5876_v28  ;;  %v6640_v52 = vpop.eup %6639 }
 0x9bf   :  { %v6450_v35 = vunpack.i.h.bf16 %v6448_v33  ;;  %v6449_v36 = vunpack.i.l.bf16 %v6448_v33  ;;  %v6642_v15 = vpop.eup %6641  ;;  %v1565_v53 = vmul.f32 %v6640_v52, %v7522_v63  ;;  %v248_v63 = vld [vmem:[%s9095_s8 + $0x18] sm:$0xff]  ;;  %v266_v52 = vld [vmem:[%s9097_s10 + $0x20] sm:$0xff] }
 0x9c0   :  { %v1566_v27 = vmul.f32 %v6642_v15, %v7520_v43  ;;  %v5924_v43 = vpack.c.bf16 %v248_v63, %v247_v8  ;;  %v271_v15 = vld [vmem:[%s9097_s10 + $0x48] sm:$0xff]  ;;  %v270_v63 = vld [vmem:[%s9097_s10 + $0x40] sm:$0xff] }
 0x9c1   :  { %5879 = vmatpush3.bf16.msra.mxu0 %v5876_v28  ;;  %v5916_v55 = vpack.c.bf16 %v6450_v35, %v6449_v36  ;;  %v263_v35 = vld [vmem:[%s9097_s10 + $0x8] sm:$0xff]  ;;  %v265_v36 = vld [vmem:[%s9097_s10 + $0x18] sm:$0xff] }
 0x9c2   :  { %5913 = vmatprep.subr.bf16.mxu0 %v5912_v39  ;;  %v7614_v61 = vpack.c.bf16 %v265_v36, %v263_v35 }
 0x9c4   :  { %5457 = vmatmul.mubr.msk.f32.vlgmr.msra.gmra.mrb[12].mxu0 %vm579_vm0, %v1004_v54  ;;  %5953 = vmatprep.subr.bf16.mxu1 %v7614_v61 }
 0x9c5   :  { %5459 = vmatprep.mubr.msk.f32.mxu0 %vm579_vm0, %v1005_v57  ;;  %5915 = vmatpush3.bf16.msra.mxu0 %v5912_v39  ;;  %v262_v39 = vld [vmem:[%s9097_s10] sm:$0xff]  ;;  %v264_v57 = vld [vmem:[%s9097_s10 + $0x10] sm:$0xff] }
 0x9c6   :  { %5917 = vmatprep.subr.bf16.mxu0 %v5916_v55  ;;  %v7625_v49 = vpack.c.bf16 %v264_v57, %v262_v39 }
 0x9c8   :  { %5460 = vmatmul.mubr.msk.f32.gmra.mrb[14].mxu0 %vm579_vm0, %v1006_v2  ;;  %5955 = vmatpush1.bf16.msra.mxu1 %v7625_v49 }
 0x9c9   :  { %5919 = vmatpush3.bf16.msra.mxu0 %v5916_v55  ;;  %5512 = vmatprep.mubr.msk.f32.mxu0 %vm579_vm0, %v1563_v50  ;;  %v269_v55 = vld [vmem:[%s9097_s10 + $0x38] sm:$0xff] }
 0x9ca   :  { %5921 = vmatprep.subr.bf16.mxu0 %v5920_v18  ;;  %v7627_v50 = vpack.c.bf16 %v269_v55, %v267_v4 }
 0x9cc   :  { %5513 = vmatmul.mubr.msk.f32.vlgmr.msra.gmra.mrb[16].mxu0 %vm579_vm0, %v1564_v31  ;;  %v268_v31 = vld [vmem:[%s9097_s10 + $0x30] sm:$0xff]  ;;  %5957 = vmatprep.subr.bf16.mxu1 %v7627_v50 }
 0x9cd   :  { %5515 = vmatprep.mubr.msk.f32.mxu0 %vm579_vm0, %v1565_v53  ;;  %5923 = vmatpush3.bf16.msra.mxu0 %v5920_v18  ;;  %v273_v53 = vld [vmem:[%s9097_s10 + $0x58] sm:$0xff]  ;;  %v7645_v12 = vpack.c.bf16 %v268_v31, %v266_v52 }
 0x9ce   :  { %5925 = vmatprep.subr.bf16.mxu0 %v5924_v43  ;;  %v7647_v18 = vpack.c.bf16 %v273_v53, %v271_v15 }
 0x9cf   :  { %5959 = vmatpush1.bf16.msra.mxu1 %v7645_v12 }
 0x9d0   :  { %5516 = vmatmul.mubr.msk.f32.gmra.mrb[18].mxu0 %vm579_vm0, %v1566_v27  ;;  %5961 = vmatprep.subr.bf16.mxu1 %v7647_v18 }
 0x9d1   :  { %5927 = vmatpush3.bf16.msra.mxu0 %v5924_v43  ;;  %v272_v43 = vld [vmem:[%s9097_s10 + $0x50] sm:$0xff] }
 0x9d2   :  { %5929 = vmatprep.subr.bf16.mxu0 %v5928_v21 }
 0x9d5   :  { %5931 = vmatpush3.bf16.msra.mxu0 %v5928_v21  ;;  %v7667_v21 = vpack.c.bf16 %v272_v43, %v270_v63 }
 0x9d6   :  { %5933 = vmatprep.subr.bf16.mxu0 %v5932_v22 }
 0x9d7   :  { %5963 = vmatpush1.bf16.msra.mxu1 %v7667_v21 }
 0x9d8   :  { %5965 = vmatprep.subr.bf16.mxu1 %v7670_v3 }
 0x9d9   :  { %5935 = vmatpush3.bf16.msra.mxu0 %v5932_v22  ;;  %v276_v22 = vld [vmem:[%s9097_s10 + $0x70] sm:$0xff] }
 0x9da   :  { %5937 = vmatprep.subr.bf16.mxu0 %v5936_v23 }
 0x9dd   :  { %5939 = vmatpush3.bf16.msra.mxu0 %v5936_v23  ;;  %v280_v23 = vld [vmem:[%s9097_s10 + $0x90] sm:$0xff] }
 0x9de   :  { %5941 = vmatprep.subr.bf16.mxu0 %v5940_v29 }
 0x9e1   :  { %5943 = vmatpush3.bf16.msra.mxu0 %v5940_v29  ;;  %v7703_v29 = vpack.c.bf16 %v280_v23, %v278_v51 }
 0x9e2   :  { %5945 = vmatprep.subr.bf16.mxu0 %v5944_v5 }
 0x9e5   :  { %5947 = vmatpush3.bf16.msra.mxu0 %v5944_v5  ;;  %v284_v5 = vld [vmem:[%s9097_s10 + $0xb0] sm:$0xff] }
 0x9e6   :  { %5949 = vmatprep.subr.bf16.mxu0 %v5948_v32 }
 0x9e9   :  { %5951 = vmatpush3.bf16.msra.mxu0 %v5948_v32  ;;  %v7721_v32 = vpack.c.bf16 %v284_v5, %v282_v45  ;;  %v292_v45 = vld [vmem:[%s9097_s10 + $0xf0] sm:$0xff] }
 0xa97   :  { %v5458_v38 = vpop.f32.mrb[12].mxu0 }
 0xa98   :  { %v1101_v59 = vpop.f32.mrb[13].mxu0 }
 0xa99   :  { %v6451_v41 = vpack.i.bf16 %v5458_v38, %v1101_v59  ;;  %v7724_v38 = vpack.c.bf16 %v289_v62, %v287_v9  ;;  %v286_v59 = vld [vmem:[%s9097_s10 + $0xc0] sm:$0xff]  ;;  %v312_v62 = vld [vmem:[%s9099_s12 + $0x88] sm:$0xff] }
 0xa9a   :  { %v311_v9 = vld [vmem:[%s9099_s12 + $0x80] sm:$0xff] }
 0xa9b   :  { %6452 = vrot.lane.b32.xlu0 %v6451_v41, %s6836_s4  ;;  %v5461_v28 = vpop.f32.mrb[14].mxu0  ;;  %v288_v41 = vld [vmem:[%s9097_s10 + $0xd0] sm:$0xff] }
 0xa9c   :  { %v1111_v33 = vpop.f32.mrb[15].mxu0 }
 0xa9d   :  { %v6466_v19 = vpack.i.bf16 %v5461_v28, %v1111_v33  ;;  %v7733_v28 = vpack.c.bf16 %v288_v41, %v286_v59  ;;  %v295_v59 = vld [vmem:[%s9099_s12] sm:$0xff]  ;;  %v7775_v41 = vpack.c.bf16 %v312_v62, %v311_v9  ;;  %v309_v9 = vld [vmem:[%s9099_s12 + $0x70] sm:$0xff]  ;;  %v310_v62 = vld [vmem:[%s9099_s12 + $0x78] sm:$0xff] }
 0xa9f   :  { %6467 = vrot.lane.b32.xlu1 %v6466_v19, %s6836_s4  ;;  %v5514_v34 = vpop.f32.mrb[16].mxu0  ;;  %v6458_v19 = vpop.permute.xlu1 %6457  ;;  %5985 = vmatprep.subr.bf16.mxu0 %v7775_v41 }
 0xaa0   :  { %v1657_v54 = vpop.f32.mrb[17].mxu0  ;;  %v6460_v57 = vunpack.i.h.bf16 %v6458_v19  ;;  %v6459_v4 = vunpack.i.l.bf16 %v6458_v19 }
 0xaa1   :  { %v6461_v2 = vpack.i.bf16 %v5514_v34, %v1657_v54 }
 0xaa3   :  { %6462 = vrot.lane.b32.xlu0 %v6461_v2, %s6834_s26  ;;  %v5517_v27 = vpop.f32.mrb[18].mxu0 }
 0xaa4   :  { %v1667_v11 = vpop.f32.mrb[19].mxu0 }
 0xaa5   :  { %v6476_v8 = vpack.i.bf16 %v5517_v27, %v1667_v11 }
 0xaa7   :  { %6472 = vrot.lane.b32.xlu0 %v6471_v17, %s6835_s0  ;;  %6477 = vrot.lane.b32.xlu1 %v6476_v8, %s6834_s26  ;;  %v7685_v17 = vpack.c.bf16 %v276_v22, %v274_v47 }
 0xaa9   :  { %5967 = vmatpush1.bf16.msra.mxu1 %v7685_v17 }
 0xaaa   :  { %5969 = vmatprep.subr.bf16.mxu1 %v7688_v6 }
 0xaad   :  { %5971 = vmatpush1.bf16.msra.mxu1 %v7703_v29 }
 0xaae   :  { %5973 = vmatprep.subr.bf16.mxu1 %v7706_v30 }
 0xab1   :  { %5975 = vmatpush1.bf16.msra.mxu1 %v7721_v32 }
 0xab2   :  { %5977 = vmatprep.subr.bf16.mxu1 %v7724_v38 }
 0xab5   :  { %5979 = vmatpush1.bf16.msra.mxu1 %v7733_v28 }
 0xb0d   :  { %v6453_v33 = vpop.permute.xlu0 %6452 }
 0xb0e   :  { %v6455_v34 = vunpack.i.h.bf16 %v6453_v33  ;;  %v6454_v35 = vunpack.i.l.bf16 %v6453_v33  ;;  %v296_v33 = vld [vmem:[%s9099_s12 + $0x8] sm:$0xff] }
 0xb0f   :  { %v7780_v19 = vpack.c.bf16 %v296_v33, %v295_v59  ;;  %v7942_v59 = vpack.c.bf16 %v310_v62, %v309_v9  ;;  %v294_v33 = vld [vmem:[%s9098_s11] sm:$0x3] }
 0xb10   :  { %v1725_v36 = vsel %vm579_vm0, %v7383_v40, %v6455_v34  ;;  %v1724_v54 = vsel %vm579_vm0, %v7385_v44, %v6454_v35 }
 0xb11   :  { %v6468_v39 = vpop.permute.xlu1 %6467  ;;  %v1729_v53 = vsel %vm1728_vm2, %v1724_v54, %v6459_v4  ;;  %v1730_v27 = vsel %vm1728_vm2, %v1725_v36, %v6460_v57 }
 0xb12   :  { %v6470_v31 = vunpack.i.h.bf16 %v6468_v39  ;;  %v6469_v15 = vunpack.i.l.bf16 %v6468_v39 }
 0xb14   :  { %v1726_v47 = vsel %vm579_vm0, %v7389_v48, %v6469_v15  ;;  %v1727_v22 = vsel %vm579_vm0, %v7387_v46, %v6470_v31  ;;  %v293_v48 = vld [vmem:[%s9097_s10 + $0xf8] sm:$0xff]  ;;  %v290_v46 = vld [vmem:[%s9097_s10 + $0xe0] sm:$0xff]  ;;  %v301_v31 = vld [vmem:[%s9099_s12 + $0x30] sm:$0xff] }
 0xb15   :  { %v6463_v55 = vpop.permute.xlu0 %6462  ;;  %v5980_v26 = vpack.c.bf16 %v293_v48, %v291_v25  ;;  %v5982_v5 = vpack.c.bf16 %v292_v45, %v290_v46  ;;  %v302_v15 = vld [vmem:[%s9099_s12 + $0x38] sm:$0xff]  ;;  %v308_v25 = vld [vmem:[%s9099_s12 + $0x68] sm:$0xff] }
 0xb16   :  { %v6465_v2 = vunpack.i.h.bf16 %v6463_v55  ;;  %v6464_v52 = vunpack.i.l.bf16 %v6463_v55  ;;  %v326_v46 = vld [vmem:[%s9099_s12 + $0xf8] sm:$0xff] }
 0xb17   :  { %5981 = vmatprep.subr.bf16.mxu1 %v5980_v26 }
 0xb18   :  { %v1734_v11 = vsel %vm1733_vm3, %v1729_v53, %v6464_v52  ;;  %v1735_v40 = vsel %vm1733_vm3, %v1730_v27, %v6465_v2  ;;  %5983 = vmatpush1.bf16.msra.mxu1 %v5982_v5  ;;  %v7870_v53 = vpack.c.bf16 %v302_v15, %v301_v31  ;;  %v319_v27 = vld [vmem:[%s9099_s12 + $0xc0] sm:$0xff] }
 0xb19   :  { %v6473_v8 = vpop.permute.xlu0 %6472  ;;  %5550 = vmatprep.mubr.f32.mxu0 %v1734_v11  ;;  %v6478_v44 = vpop.permute.xlu1 %6477  ;;  %6017 = vmatprep.subr.bf16.mxu1 %v7614_v61  ;;  %v4753_v61 = vld [vmem:[%s9096_s9] ss:$0 sm:$0xff]  ;;  %v320_v11 = vld [vmem:[%s9099_s12 + $0xc8] sm:$0xff] }
 0xb1a   :  { %v6475_v63 = vunpack.i.h.bf16 %v6473_v8  ;;  %v6474_v43 = vunpack.i.l.bf16 %v6473_v8  ;;  %v6480_v58 = vunpack.i.h.bf16 %v6478_v44  ;;  %v6479_v20 = vunpack.i.l.bf16 %v6478_v44  ;;  %5551 = vmatmul.mubr.f32.vlgmr.msra.gmra.mrb[20].mxu0 %v1735_v40  ;;  %v303_v8 = vld [vmem:[%s9099_s12 + $0x40] sm:$0xff]  ;;  %v304_v44 = vld [vmem:[%s9099_s12 + $0x48] sm:$0xff] }
 0xb1b   :  { %5987 = vmatpush3.bf16.msra.mxu0 %v7780_v19  ;;  %v7880_v40 = vpack.c.bf16 %v320_v11, %v319_v27 }
 0xb1c   :  { %v1731_v10 = vsel %vm1728_vm2, %v1726_v47, %v6474_v43  ;;  %v1732_v14 = vsel %vm1728_vm2, %v1727_v22, %v6475_v63  ;;  %v7888_v63 = vpack.c.bf16 %v304_v44, %v303_v8  ;;  %v321_v43 = vld [vmem:[%s9099_s12 + $0xd0] sm:$0xff]  ;;  %v306_v22 = vld [vmem:[%s9099_s12 + $0x58] sm:$0xff] }
 0xb1d   :  { %v1736_v51 = vsel %vm1733_vm3, %v1731_v10, %v6479_v20  ;;  %v1737_v23 = vsel %vm1733_vm3, %v1732_v14, %v6480_v58  ;;  %v322_v58 = vld [vmem:[%s9099_s12 + $0xd8] sm:$0xff]  ;;  %v305_v47 = vld [vmem:[%s9099_s12 + $0x50] sm:$0xff]  ;;  %v323_v10 = vld [vmem:[%s9099_s12 + $0xe0] sm:$0xff] }
 0xb1e   :  { %5553 = vmatprep.mubr.f32.mxu0 %v1736_v51  ;;  %v7898_v20 = vpack.c.bf16 %v322_v58, %v321_v43  ;;  %v7909_v14 = vpack.c.bf16 %v306_v22, %v305_v47  ;;  %v324_v51 = vld [vmem:[%s9099_s12 + $0xe8] sm:$0xff] }
 0xb1f   :  { %5554 = vmatmul.mubr.f32.gmra.mrb[22].mxu0 %v1737_v23  ;;  %v307_v23 = vld [vmem:[%s9099_s12 + $0x60] sm:$0xff]  ;;  %v7921_v48 = vpack.c.bf16 %v324_v51, %v323_v10 }
 0xb20   :  { %v7930_v45 = vpack.c.bf16 %v308_v25, %v307_v23 }
 0xbed   :  { %v5552_v34 = vpop.f32.mrb[20].mxu0 }
 0xbee   :  { %v1810_v35 = vpop.f32.mrb[21].mxu0  ;;  %v1816_v39 = vadd.f32 %v5552_v34, %v4753_v61  ;;  %v7954_v34 = vrot.slane %v294_v33, %v7241_v0 }
 0xbef   :  { %v1811_v36 = vadd.f32 %v4753_v61, %v1810_v35 }
 0xbf0   :  { %v7794_v55 = vadd.f32 %v1816_v39, %v7052_v7 }
 0xbf1   :  { %v7788_v54 = vadd.f32 %v1811_v36, %v7046_v1 }
 0xbf2   :  { %v5555_v57 = vpop.f32.mrb[22].mxu0 }
 0xbf3   :  { %v1820_v4 = vpop.f32.mrb[23].mxu0  ;;  %1909 = vmatmul.mubr.f32.vlgmr.msra.gmra.mrb[32].mxu1 %v7788_v54  ;;  %v1826_v1 = vadd.f32 %v5555_v57, %v4753_v61 }
 0xbf4   :  { %1914 = vmatprep.mubr.f32.mxu1 %v6833_v42  ;;  %6019 = vmatpush1.bf16.msra.mxu1 %v7625_v49  ;;  %v1821_v2 = vadd.f32 %v4753_v61, %v1820_v4  ;;  %v7951_v61 = vrot.slane %v294_v33, %v7235_v60 }
 0xbf5   :  { %6021 = vmatprep.subr.bf16.mxu1 %v7627_v50  ;;  %v7808_v7 = vadd.f32 %v1826_v1, %v7064_v16  ;;  %v314_v16 = vld [vmem:[%s9099_s12 + $0x98] sm:$0xff]  ;;  %v297_v50 = vld [vmem:[%s9099_s12 + $0x10] sm:$0xff] }
 0xbf6   :  { %v7801_v52 = vadd.f32 %v1821_v2, %v7058_v13  ;;  %v313_v13 = vld [vmem:[%s9099_s12 + $0x90] sm:$0xff] }
 0xbf7   :  { %1915 = vmatmul.mubr.f32.gmra.mrb[34].mxu1 %v7794_v55  ;;  %v7826_v49 = vpack.c.bf16 %v314_v16, %v313_v13 }
 0xbf8   :  { %1920 = vmatprep.mubr.f32.mxu1 %v6833_v42  ;;  %6023 = vmatpush1.bf16.msra.mxu1 %v7645_v12  ;;  %v298_v12 = vld [vmem:[%s9099_s12 + $0x18] sm:$0xff] }
 0xbf9   :  { %6025 = vmatprep.subr.bf16.mxu1 %v7647_v18  ;;  %v7834_v18 = vpack.c.bf16 %v298_v12, %v297_v50  ;;  %5989 = vmatprep.subr.bf16.mxu0 %v7826_v49 }
 0xbfb   :  { %1921 = vmatmul.mubr.f32.gmra.mrb[36].mxu1 %v7801_v52  ;;  %5991 = vmatpush3.bf16.msra.mxu0 %v7834_v18 }
 0xbfc   :  { %1926 = vmatprep.mubr.f32.mxu1 %v6833_v42  ;;  %6027 = vmatpush1.bf16.msra.mxu1 %v7667_v21  ;;  %v315_v21 = vld [vmem:[%s9099_s12 + $0xa0] sm:$0xff] }
 0xbfd   :  { %6029 = vmatprep.subr.bf16.mxu1 %v7670_v3  ;;  %v316_v3 = vld [vmem:[%s9099_s12 + $0xa8] sm:$0xff] }
 0xbff   :  { %1927 = vmatmul.mubr.f32.gmra.mrb[38].mxu1 %v7808_v7 }
 0xc00   :  { %6031 = vmatpush1.bf16.msra.mxu1 %v7685_v17  ;;  %2220 = vmatprep.mubr.f32.mxu1 %v6833_v42  ;;  %v7844_v17 = vpack.c.bf16 %v316_v3, %v315_v21 }
 0xc01   :  { %6033 = vmatprep.subr.bf16.mxu1 %v7688_v6  ;;  %v299_v6 = vld [vmem:[%s9099_s12 + $0x20] sm:$0xff] }
 0xc02   :  { %5993 = vmatprep.subr.bf16.mxu0 %v7844_v17 }
 0xc04   :  { %6035 = vmatpush1.bf16.msra.mxu1 %v7703_v29  ;;  %v300_v29 = vld [vmem:[%s9099_s12 + $0x28] sm:$0xff] }
 0xc05   :  { %6037 = vmatprep.subr.bf16.mxu1 %v7706_v30  ;;  %v7852_v30 = vpack.c.bf16 %v300_v29, %v299_v6 }
 0xc07   :  { %5995 = vmatpush3.bf16.msra.mxu0 %v7852_v30 }
 0xc08   :  { %6039 = vmatpush1.bf16.msra.mxu1 %v7721_v32  ;;  %v317_v32 = vld [vmem:[%s9099_s12 + $0xb0] sm:$0xff] }
 0xc09   :  { %6041 = vmatprep.subr.bf16.mxu1 %v7724_v38  ;;  %v318_v38 = vld [vmem:[%s9099_s12 + $0xb8] sm:$0xff] }
 0xc0c   :  { %6043 = vmatpush1.bf16.msra.mxu1 %v7733_v28  ;;  %v7862_v28 = vpack.c.bf16 %v318_v38, %v317_v32 }
 0xc0d   :  { %6045 = vmatprep.subr.bf16.mxu1 %v5980_v26  ;;  %v325_v26 = vld [vmem:[%s9099_s12 + $0xf0] sm:$0xff] }
 0xc0e   :  { %5997 = vmatprep.subr.bf16.mxu0 %v7862_v28 }
 0xc0f   :  { %5999 = vmatpush3.bf16.msra.mxu0 %v7870_v53 }
 0xc10   :  { %6047 = vmatpush1.bf16.msra.mxu1 %v5982_v5  ;;  %6001 = vmatprep.subr.bf16.mxu0 %v7880_v40  ;;  %v7933_v5 = vpack.c.bf16 %v326_v46, %v325_v26 }
 0xc13   :  { %6003 = vmatpush3.bf16.msra.mxu0 %v7888_v63 }
 0xc14   :  { %6005 = vmatprep.subr.bf16.mxu0 %v7898_v20 }
 0xc17   :  { %6007 = vmatpush3.bf16.msra.mxu0 %v7909_v14 }
 0xc18   :  { %6009 = vmatprep.subr.bf16.mxu0 %v7921_v48 }
 0xc1b   :  { %6011 = vmatpush3.bf16.msra.mxu0 %v7930_v45 }
 0xc1c   :  { %6013 = vmatprep.subr.bf16.mxu0 %v7933_v5 }
 0xc1f   :  { %6015 = vmatpush3.bf16.msra.mxu0 %v7942_v59 }
 0xc20   :  { %6049 = vmatprep.subr.bf16.mxu0 %v7775_v41 }
 0xcc6   :  { %v1910_v35 = vpop.f32.mrb[32].mxu1 }
 0xcc7   :  { %v7957_v36 = vadd.f32 %v1910_v35, %v7951_v61  ;;  %v1912_v39 = vpop.f32.mrb[33].mxu1 }
 0xcc8   :  { %v1913_v57 = vadd.f32 %v1912_v39, %v7954_v34 }
 0xcc9   :  { %v1941_v4 = vmul.f32 0.044715, %v7957_v36 }
 0xcca   :  { %v1942_v41 = vmul.f32 0.044715, %v1913_v57  ;;  %v1916_v2 = vpop.f32.mrb[34].mxu1 }
 0xccb   :  { %v1949_v1 = vmul.f32 %v1941_v4, %v7957_v36  ;;  %v7963_v13 = vadd.f32 %v1916_v2, %v7951_v61  ;;  %v1918_v16 = vpop.f32.mrb[35].mxu1 }
 0xccc   :  { %v1950_v50 = vmul.f32 %v1942_v41, %v1913_v57  ;;  %v7966_v12 = vadd.f32 %v1918_v16, %v7954_v34 }
 0xccd   :  { %v1957_v21 = vmul.f32 %v1949_v1, %v7957_v36  ;;  %v1943_v3 = vmul.f32 0.044715, %v7963_v13 }
 0xcce   :  { %v1944_v6 = vmul.f32 0.044715, %v7966_v12  ;;  %v1922_v29 = vpop.f32.mrb[36].mxu1  ;;  %v1958_v32 = vmul.f32 %v1950_v50, %v1913_v57 }
 0xccf   :  { %v1965_v38 = vadd.f32 %v1957_v21, %v7957_v36  ;;  %v1951_v31 = vmul.f32 %v1943_v3, %v7963_v13  ;;  %v7974_v15 = vadd.f32 %v1922_v29, %v7951_v61  ;;  %v1924_v27 = vpop.f32.mrb[37].mxu1 }
 0xcd0   :  { %v1952_v11 = vmul.f32 %v1944_v6, %v7966_v12  ;;  %v7978_v8 = vadd.f32 %v1924_v27, %v7954_v34  ;;  %v1966_v44 = vadd.f32 %v1958_v32, %v1913_v57 }
 0xcd1   :  { %v1973_v43 = vmul.f32 0.7978846, %v1965_v38  ;;  %v1945_v58 = vmul.f32 0.044715, %v7974_v15  ;;  %v1959_v47 = vmul.f32 %v1951_v31, %v7963_v13 }
 0xcd2   :  { %v1946_v22 = vmul.f32 0.044715, %v7978_v8  ;;  %v1928_v10 = vpop.f32.mrb[38].mxu1  ;;  %v1974_v51 = vmul.f32 0.7978846, %v1966_v44  ;;  %v1960_v23 = vmul.f32 %v1952_v11, %v7966_v12 }
 0xcd3   :  { %6643 = vtanh.f32 %v1973_v43  ;;  %v1953_v25 = vmul.f32 %v1945_v58, %v7974_v15  ;;  %v7986_v26 = vadd.f32 %v1928_v10, %v7951_v61  ;;  %v1930_v46 = vpop.f32.mrb[39].mxu1  ;;  %v1967_v9 = vadd.f32 %v1959_v47, %v7963_v13 }
 0xcd4   :  { %v1954_v62 = vmul.f32 %v1946_v22, %v7978_v8  ;;  %v1931_v33 = vadd.f32 %v1930_v46, %v7954_v34  ;;  %6645 = vtanh.f32 %v1974_v51  ;;  %v1968_v35 = vadd.f32 %v1960_v23, %v7966_v12 }
 0xcd5   :  { %v1947_v39 = vmul.f32 0.044715, %v7986_v26  ;;  %v1975_v4 = vmul.f32 0.7978846, %v1967_v9  ;;  %v1961_v41 = vmul.f32 %v1953_v25, %v7974_v15  ;;  %v1934_v10 = vmul.f32 0.5, %v1913_v57 }
 0xcd6   :  { %v1948_v2 = vmul.f32 0.044715, %v1931_v33  ;;  %v1976_v1 = vmul.f32 0.7978846, %v1968_v35  ;;  %v1962_v16 = vmul.f32 %v1954_v62, %v7978_v8  ;;  %v1933_v23 = vmul.f32 0.5, %v7957_v36 }
 0xcd7   :  { %v1955_v50 = vmul.f32 %v1947_v39, %v7986_v26  ;;  %6647 = vtanh.f32 %v1975_v4  ;;  %v1969_v21 = vadd.f32 %v1961_v41, %v7974_v15  ;;  %v1936_v39 = vmul.f32 0.5, %v7966_v12 }
 0xcd8   :  { %v1956_v3 = vmul.f32 %v1948_v2, %v1931_v33  ;;  %6649 = vtanh.f32 %v1976_v1  ;;  %v1970_v6 = vadd.f32 %v1962_v16, %v7978_v8  ;;  %v1935_v41 = vmul.f32 0.5, %v7963_v13 }
 0xcd9   :  { %v1977_v29 = vmul.f32 0.7978846, %v1969_v21  ;;  %v1963_v32 = vmul.f32 %v1955_v50, %v7986_v26  ;;  %v1938_v50 = vmul.f32 0.5, %v7978_v8  ;;  %v1937_v12 = vmul.f32 0.5, %v7974_v15 }
 0xcda   :  { %v1978_v38 = vmul.f32 0.7978846, %v1970_v6  ;;  %v1964_v31 = vmul.f32 %v1956_v3, %v1931_v33 }
 0xcdb   :  { %6651 = vtanh.f32 %v1977_v29  ;;  %v1971_v27 = vadd.f32 %v1963_v32, %v7986_v26 }
 0xcdc   :  { %6653 = vtanh.f32 %v1978_v38  ;;  %v1972_v11 = vadd.f32 %v1964_v31, %v1931_v33 }
 0xcdd   :  { %v6644_v44 = vpop.eup %6643  ;;  %v1979_v43 = vmul.f32 0.7978846, %v1971_v27 }
 0xcde   :  { %v6646_v58 = vpop.eup %6645  ;;  %v1989_v47 = vadd.f32 1.0, %v6644_v44  ;;  %v1980_v22 = vmul.f32 0.7978846, %v1972_v11 }
 0xcdf   :  { %v1990_v51 = vadd.f32 1.0, %v6646_v58  ;;  %6655 = vtanh.f32 %v1979_v43 }
 0xce0   :  { %6657 = vtanh.f32 %v1980_v22  ;;  %v1997_v62 = vmul.f32 %v1989_v47, %v1933_v23 }
 0xce1   :  { %v6648_v25 = vpop.eup %6647  ;;  %v1998_v46 = vmul.f32 %v1990_v51, %v1934_v10 }
 0xce2   :  { %v6650_v9 = vpop.eup %6649  ;;  %v1991_v35 = vadd.f32 1.0, %v6648_v25 }
 0xce3   :  { %2075 = vmatprep.mubr.f32.mxu0 %v1998_v46  ;;  %v1992_v4 = vadd.f32 1.0, %v6650_v9 }
 0xce4   :  { %2076 = vmatmul.mubr.f32.vlgmr.msra.gmra.mrb[24].mxu0 %v1997_v62  ;;  %v1999_v16 = vmul.f32 %v1991_v35, %v1935_v41 }
 0xce5   :  { %v6652_v2 = vpop.eup %6651  ;;  %v2000_v1 = vmul.f32 %v1992_v4, %v1936_v39  ;;  %6051 = vmatpush3.bf16.msra.mxu0 %v7780_v19  ;;  %v1940_v19 = vmul.f32 0.5, %v1931_v33 }
 0xce6   :  { %v6654_v57 = vpop.eup %6653  ;;  %v1993_v36 = vadd.f32 1.0, %v6652_v2  ;;  %6053 = vmatprep.subr.bf16.mxu0 %v7826_v49  ;;  %v1939_v49 = vmul.f32 0.5, %v7986_v26 }
 0xce7   :  { %2080 = vmatprep.mubr.f32.mxu0 %v2000_v1  ;;  %v1994_v21 = vadd.f32 1.0, %v6654_v57 }
 0xce8   :  { %2081 = vmatmul.mubr.f32.gmra.mrb[26].mxu0 %v1999_v16  ;;  %v2001_v29 = vmul.f32 %v1993_v36, %v1937_v12 }
 0xce9   :  { %v6656_v3 = vpop.eup %6655  ;;  %v2002_v6 = vmul.f32 %v1994_v21, %v1938_v50  ;;  %6055 = vmatpush3.bf16.msra.mxu0 %v7834_v18 }
 0xcea   :  { %v6658_v13 = vpop.eup %6657  ;;  %v1995_v32 = vadd.f32 1.0, %v6656_v3  ;;  %6057 = vmatprep.subr.bf16.mxu0 %v7844_v17 }
 0xceb   :  { %2085 = vmatprep.mubr.f32.mxu0 %v2002_v6  ;;  %v1996_v38 = vadd.f32 1.0, %v6658_v13  ;;  %v2150_v6 = vsub.s32 3, %v7232_v56 }
 0xcec   :  { %2086 = vmatmul.mubr.f32.gmra.mrb[28].mxu0 %v2001_v29  ;;  %v2003_v31 = vmul.f32 %v1995_v32, %v1939_v49  ;;  %v6803_v29 = vld [vmem:[%s9092_s5] sm:$0xf] }
 0xced   :  { %v2004_v8 = vmul.f32 %v1996_v38, %v1940_v19  ;;  %6059 = vmatpush3.bf16.msra.mxu0 %v7852_v30  ;;  %v8024_v30 = vld [vmem:[%s9100_s13] ss:$0 sm:$0xff]  ;;  %v2143_v32 = vrot.slane %v6803_v29, %v7257_v24 }
 0xcee   :  { %6061 = vmatprep.subr.bf16.mxu0 %v7862_v28 }
 0xcef   :  { %2090 = vmatprep.mubr.f32.mxu0 %v2004_v8  ;;  %v2151_v8 = vrot.slane %v6803_v29, %v2150_v6 }
 0xcf0   :  { %2091 = vmatmul.mubr.f32.gmra.mrb[30].mxu0 %v2003_v31 }
 0xcf1   :  { %6063 = vmatpush3.bf16.msra.mxu0 %v7870_v53 }
 0xcf2   :  { %6065 = vmatprep.subr.bf16.mxu0 %v7880_v40 }
 0xcf5   :  { %6067 = vmatpush3.bf16.msra.mxu0 %v7888_v63 }
 0xcf6   :  { %6069 = vmatprep.subr.bf16.mxu0 %v7898_v20 }
 0xcf9   :  { %6071 = vmatpush3.bf16.msra.mxu0 %v7909_v14 }
 0xcfa   :  { %6073 = vmatprep.subr.bf16.mxu0 %v7921_v48 }
 0xcfd   :  { %6075 = vmatpush3.bf16.msra.mxu0 %v7930_v45 }
 0xcfe   :  { %6077 = vmatprep.subr.bf16.mxu0 %v7933_v5 }
 0xd01   :  { %6079 = vmatpush3.bf16.msra.mxu0 %v7942_v59 }
 0xdb7   :  { %v5120_v18 = vpop.f32.mrb[24].mxu0 }
 0xdb8   :  { %v5121_v17 = vpop.f32.mrb[25].mxu0 }
 0xdb9   :  { %v5122_v28 = vadd.f32 %v5121_v17, %v5120_v18 }
 0xdbb   :  { %v5123_v53 = vpop.f32.mrb[26].mxu0  ;;  %v2078_v40 = vadd.f32 %v5122_v28, %v8024_v30 }
 0xdbc   :  { %v5124_v63 = vpop.f32.mrb[27].mxu0 }
 0xdbd   :  { %v5125_v20 = vadd.f32 %v5124_v63, %v5123_v53  ;;  %2096 = vadd.xlane.f32.xlu0 %v2078_v40 }
 0xdbf   :  { %v5126_v14 = vpop.f32.mrb[28].mxu0  ;;  %v2083_v48 = vadd.f32 %v5125_v20, %v8024_v30 }
 0xdc0   :  { %v5127_v45 = vpop.f32.mrb[29].mxu0 }
 0xdc1   :  { %v5128_v5 = vadd.f32 %v5127_v45, %v5126_v14  ;;  %2098 = vadd.xlane.f32.xlu1 %v2083_v48 }
 0xdc3   :  { %v5129_v59 = vpop.f32.mrb[30].mxu0  ;;  %v2088_v15 = vadd.f32 %v5128_v5, %v8024_v30 }
 0xdc4   :  { %v5130_v26 = vpop.f32.mrb[31].mxu0 }
 0xdc5   :  { %v5131_v33 = vadd.f32 %v5130_v26, %v5129_v59  ;;  %2100 = vadd.xlane.f32.xlu0 %v2088_v15 }
 0xdc7   :  { %v2093_v27 = vadd.f32 %v5131_v33, %v8024_v30 }
 0xdc9   :  { %2102 = vadd.xlane.f32.xlu0 %v2093_v27 }
 0xe4a   :  { %v2097_v11 = vpop.xlane.xlu0 %2096 }
 0xe4b   :  { %v2104_v44 = vmul.f32 0.0078125, %v2097_v11 }
 0xe4d   :  { %v2108_v43 = vsub.f32 %v2078_v40, %v2104_v44 }
 0xe4e   :  { %v2099_v58 = vpop.xlane.xlu1 %2098 }
 0xe4f   :  { %v2105_v47 = vmul.f32 0.0078125, %v2099_v58  ;;  %v2112_v22 = vmul.f32 %v2108_v43, %v2108_v43 }
 0xe51   :  { %v2109_v10 = vsub.f32 %v2083_v48, %v2105_v47  ;;  %2116 = vadd.xlane.f32.xlu0 %v2112_v22 }
 0xe52   :  { %v2101_v51 = vpop.xlane.xlu0 %2100 }
 0xe53   :  { %v2106_v23 = vmul.f32 0.0078125, %v2101_v51  ;;  %v2113_v25 = vmul.f32 %v2109_v10, %v2109_v10 }
 0xe55   :  { %v2110_v46 = vsub.f32 %v2088_v15, %v2106_v23  ;;  %2118 = vadd.xlane.f32.xlu1 %v2113_v25 }
 0xe56   :  { %v2103_v9 = vpop.xlane.xlu0 %2102 }
 0xe57   :  { %v2107_v62 = vmul.f32 0.0078125, %v2103_v9  ;;  %v2114_v35 = vmul.f32 %v2110_v46, %v2110_v46 }
 0xe59   :  { %v2111_v39 = vsub.f32 %v2093_v27, %v2107_v62  ;;  %2120 = vadd.xlane.f32.xlu0 %v2114_v35 }
 0xe5b   :  { %v2115_v4 = vmul.f32 %v2111_v39, %v2111_v39 }
 0xe5d   :  { %2122 = vadd.xlane.f32.xlu1 %v2115_v4 }
 0xede   :  { %v2117_v41 = vpop.xlane.xlu0 %2116 }
 0xedf   :  { %v2124_v2 = vmul.f32 0.0078125, %v2117_v41 }
 0xee1   :  { %v2128_v1 = vadd.f32 1e-06, %v2124_v2 }
 0xee2   :  { %v2119_v57 = vpop.xlane.xlu1 %2118 }
 0xee3   :  { %6659 = vrsqrt.f32 %v2128_v1  ;;  %v2125_v16 = vmul.f32 0.0078125, %v2119_v57 }
 0xee5   :  { %v2129_v36 = vadd.f32 1e-06, %v2125_v16 }
 0xee6   :  { %v2121_v50 = vpop.xlane.xlu0 %2120 }
 0xee7   :  { %6661 = vrsqrt.f32 %v2129_v36  ;;  %v2126_v21 = vmul.f32 0.0078125, %v2121_v50 }
 0xee9   :  { %v2130_v12 = vadd.f32 1e-06, %v2126_v21 }
 0xeea   :  { %v2123_v3 = vpop.xlane.xlu1 %2122 }
 0xeeb   :  { %6663 = vrsqrt.f32 %v2130_v12  ;;  %v2127_v13 = vmul.f32 0.0078125, %v2123_v3 }
 0xeed   :  { %v6660_v19 = vpop.eup %6659  ;;  %v2131_v38 = vadd.f32 1e-06, %v2127_v13 }
 0xeee   :  { %v2136_v49 = vmul.f32 %v6660_v19, %v2108_v43 }
 0xeef   :  { %6665 = vrsqrt.f32 %v2131_v38 }
 0xef0   :  { %v2144_v31 = vmul.f32 %v2143_v32, %v2136_v49 }
 0xef1   :  { %v6662_v18 = vpop.eup %6661 }
 0xef2   :  { %v2152_v17 = vadd.f32 %v2151_v8, %v2144_v31  ;;  %v2137_v28 = vmul.f32 %v6662_v18, %v2109_v10 }
 0xef4   :  { %2221 = vmatmul.mubr.f32.vlgmr.msra.gmra.mrb[40].mxu1 %v2152_v17  ;;  %v2145_v53 = vmul.f32 %v2143_v32, %v2137_v28 }
 0xef5   :  { %v6664_v40 = vpop.eup %6663  ;;  %2226 = vmatprep.mubr.f32.mxu1 %v6833_v42 }
 0xef6   :  { %v2153_v63 = vadd.f32 %v2151_v8, %v2145_v53  ;;  %v2138_v20 = vmul.f32 %v6664_v40, %v2110_v46 }
 0xef8   :  { %2227 = vmatmul.mubr.f32.gmra.mrb[42].mxu1 %v2153_v63  ;;  %v2146_v14 = vmul.f32 %v2143_v32, %v2138_v20 }
 0xef9   :  { %v6666_v48 = vpop.eup %6665  ;;  %2232 = vmatprep.mubr.f32.mxu1 %v6833_v42 }
 0xefa   :  { %v2154_v45 = vadd.f32 %v2151_v8, %v2146_v14  ;;  %v2139_v5 = vmul.f32 %v6666_v48, %v2111_v39 }
 0xefc   :  { %2233 = vmatmul.mubr.f32.gmra.mrb[44].mxu1 %v2154_v45  ;;  %v2147_v59 = vmul.f32 %v2143_v32, %v2139_v5 }
 0xefd   :  { %2238 = vmatprep.mubr.f32.mxu1 %v6833_v42 }
 0xefe   :  { %v2155_v15 = vadd.f32 %v2151_v8, %v2147_v59 }
 0xf00   :  { %2239 = vmatmul.mubr.f32.gmra.mrb[46].mxu1 %v2155_v15 }
 0xf01   :  { %2688 = vmatprep.mubr.f32.mxu1 %v6833_v42 }
 0xfc7   :  { %v2222_v26 = vpop.f32.mrb[40].mxu1 }
 0xfc8   :  { %v8042_v33 = vadd.f32 %v2222_v26, %v7951_v61  ;;  %v2224_v27 = vpop.f32.mrb[41].mxu1 }
 0xfc9   :  { %v2225_v11 = vadd.f32 %v2224_v27, %v7954_v34 }
 0xfca   :  { %v2253_v44 = vmul.f32 0.044715, %v8042_v33 }
 0xfcb   :  { %v2254_v43 = vmul.f32 0.044715, %v2225_v11  ;;  %v2228_v58 = vpop.f32.mrb[42].mxu1 }
 0xfcc   :  { %v2261_v47 = vmul.f32 %v2253_v44, %v8042_v33  ;;  %v8048_v22 = vadd.f32 %v2228_v58, %v7951_v61  ;;  %v2230_v10 = vpop.f32.mrb[43].mxu1 }
 0xfcd   :  { %v2262_v51 = vmul.f32 %v2254_v43, %v2225_v11  ;;  %v8051_v23 = vadd.f32 %v2230_v10, %v7954_v34 }
 0xfce   :  { %v2269_v25 = vmul.f32 %v2261_v47, %v8042_v33  ;;  %v2255_v46 = vmul.f32 0.044715, %v8048_v22 }
 0xfcf   :  { %v2256_v9 = vmul.f32 0.044715, %v8051_v23  ;;  %v2234_v62 = vpop.f32.mrb[44].mxu1  ;;  %v2270_v35 = vmul.f32 %v2262_v51, %v2225_v11  ;;  %v2246_v51 = vmul.f32 0.5, %v2225_v11 }
 0xfd0   :  { %v2277_v39 = vadd.f32 %v2269_v25, %v8042_v33  ;;  %v2263_v4 = vmul.f32 %v2255_v46, %v8048_v22  ;;  %v8059_v41 = vadd.f32 %v2234_v62, %v7951_v61  ;;  %v2236_v2 = vpop.f32.mrb[45].mxu1  ;;  %v2245_v46 = vmul.f32 0.5, %v8042_v33 }
 0xfd1   :  { %v2264_v1 = vmul.f32 %v2256_v9, %v8051_v23  ;;  %v8063_v57 = vadd.f32 %v2236_v2, %v7954_v34  ;;  %v2278_v16 = vadd.f32 %v2270_v35, %v2225_v11  ;;  %v2248_v2 = vmul.f32 0.5, %v8051_v23 }
 0xfd2   :  { %v2285_v36 = vmul.f32 0.7978846, %v2277_v39  ;;  %v2257_v50 = vmul.f32 0.044715, %v8059_v41  ;;  %v2271_v21 = vmul.f32 %v2263_v4, %v8048_v22 }
 0xfd3   :  { %v2258_v12 = vmul.f32 0.044715, %v8063_v57  ;;  %v2240_v3 = vpop.f32.mrb[46].mxu1  ;;  %v2286_v13 = vmul.f32 0.7978846, %v2278_v16  ;;  %v2272_v29 = vmul.f32 %v2264_v1, %v8051_v23  ;;  %v2247_v16 = vmul.f32 0.5, %v8048_v22 }
 0xfd4   :  { %6667 = vtanh.f32 %v2285_v36  ;;  %v2265_v32 = vmul.f32 %v2257_v50, %v8059_v41  ;;  %v8071_v19 = vadd.f32 %v2240_v3, %v7951_v61  ;;  %v2242_v38 = vpop.f32.mrb[47].mxu1  ;;  %v2279_v49 = vadd.f32 %v2271_v21, %v8048_v22 }
 0xfd5   :  { %v2266_v8 = vmul.f32 %v2258_v12, %v8063_v57  ;;  %v2243_v31 = vadd.f32 %v2242_v38, %v7954_v34  ;;  %6669 = vtanh.f32 %v2286_v13  ;;  %v2280_v18 = vadd.f32 %v2272_v29, %v8051_v23 }
 0xfd6   :  { %v2259_v17 = vmul.f32 0.044715, %v8071_v19  ;;  %v2287_v28 = vmul.f32 0.7978846, %v2279_v49  ;;  %v2273_v53 = vmul.f32 %v2265_v32, %v8059_v41  ;;  %v2250_v33 = vmul.f32 0.5, %v8063_v57 }
 0xfd7   :  { %v2260_v40 = vmul.f32 0.044715, %v2243_v31  ;;  %v2288_v63 = vmul.f32 0.7978846, %v2280_v18  ;;  %v2274_v61 = vmul.f32 %v2266_v8, %v8063_v57  ;;  %v2249_v13 = vmul.f32 0.5, %v8059_v41 }
 0xfd8   :  { %v2267_v20 = vmul.f32 %v2259_v17, %v8071_v19  ;;  %6671 = vtanh.f32 %v2287_v28  ;;  %v2281_v14 = vadd.f32 %v2273_v53, %v8059_v41  ;;  %v2252_v8 = vmul.f32 0.5, %v2243_v31 }
 0xfd9   :  { %v2268_v48 = vmul.f32 %v2260_v40, %v2243_v31  ;;  %6673 = vtanh.f32 %v2288_v63  ;;  %v2282_v34 = vadd.f32 %v2274_v61, %v8063_v57  ;;  %v2251_v18 = vmul.f32 0.5, %v8071_v19 }
 0xfda   :  { %v2289_v45 = vmul.f32 0.7978846, %v2281_v14  ;;  %v2275_v5 = vmul.f32 %v2267_v20, %v8071_v19 }
 0xfdb   :  { %v2290_v59 = vmul.f32 0.7978846, %v2282_v34  ;;  %v2276_v15 = vmul.f32 %v2268_v48, %v2243_v31 }
 0xfdc   :  { %6675 = vtanh.f32 %v2289_v45  ;;  %v2283_v26 = vadd.f32 %v2275_v5, %v8071_v19 }
 0xfdd   :  { %6677 = vtanh.f32 %v2290_v59  ;;  %v2284_v27 = vadd.f32 %v2276_v15, %v2243_v31 }
 0xfde   :  { %v6668_v44 = vpop.eup %6667  ;;  %v2291_v43 = vmul.f32 0.7978846, %v2283_v26 }
 0xfdf   :  { %v6670_v58 = vpop.eup %6669  ;;  %v2301_v47 = vadd.f32 1.0, %v6668_v44  ;;  %v2292_v10 = vmul.f32 0.7978846, %v2284_v27 }
 0xfe0   :  { %v2302_v25 = vadd.f32 1.0, %v6670_v58  ;;  %6679 = vtanh.f32 %v2291_v43  ;;  %v4760_v43 = vld [vmem:[%s9093_s6 + $0x1a0] sm:$0xff]  ;;  %v4763_v58 = vld [vmem:[%s9093_s6 + $0x1b8] sm:$0xff] }
 0xfe1   :  { %6681 = vtanh.f32 %v2292_v10  ;;  %v2309_v39 = vmul.f32 %v2301_v47, %v2245_v46  ;;  %v4766_v47 = vld [vmem:[%s9093_s6 + $0x1d0] sm:$0xff]  ;;  %v4761_v46 = vld [vmem:[%s9093_s6 + $0x1a8] sm:$0xff] }
 0xfe2   :  { %v6672_v9 = vpop.eup %6671  ;;  %v2310_v62 = vmul.f32 %v2302_v25, %v2246_v51  ;;  %v6084_v51 = vpack.c.bf16 %v4766_v47, %v4763_v58  ;;  %v4758_v25 = vld [vmem:[%s9093_s6 + $0x190] sm:$0xff]  ;;  %v4787_v58 = vld [vmem:[%s9093_s6 + $0x278] sm:$0xff] }
 0xfe3   :  { %v6674_v35 = vpop.eup %6673  ;;  %v2303_v4 = vadd.f32 1.0, %v6672_v9  ;;  %v4762_v9 = vld [vmem:[%s9093_s6 + $0x1b0] sm:$0xff] }
 0xfe4   :  { %2381 = vmatprep.mubr.f32.mxu0 %v2310_v62  ;;  %v2304_v1 = vadd.f32 1.0, %v6674_v35  ;;  %v6112_v62 = vpack.c.bf16 %v4761_v46, %v4758_v25  ;;  %v4765_v35 = vld [vmem:[%s9093_s6 + $0x1c8] sm:$0xff]  ;;  %v4790_v47 = vld [vmem:[%s9093_s6 + $0x290] sm:$0xff] }
 0xfe5   :  { %2382 = vmatmul.mubr.f32.vlgmr.msra.gmra.mrb[32].mxu0 %v2309_v39  ;;  %v2311_v21 = vmul.f32 %v2303_v4, %v2247_v16  ;;  %v4769_v39 = vld [vmem:[%s9093_s6 + $0x1e8] sm:$0xff]  ;;  %v4772_v4 = vld [vmem:[%s9093_s6 + $0x200] sm:$0xff]  ;;  %v4767_v16 = vld [vmem:[%s9093_s6 + $0x1d8] sm:$0xff] }
 0xfe6   :  { %v6676_v36 = vpop.eup %6675  ;;  %v2312_v50 = vmul.f32 %v2304_v1, %v2248_v2  ;;  %v6086_v2 = vpack.c.bf16 %v4765_v35, %v4762_v9  ;;  %v4764_v1 = vld [vmem:[%s9093_s6 + $0x1c0] sm:$0xff]  ;;  %6113 = vmatprep.subr.bf16.mxu0 %v6112_v62  ;;  %v4785_v25 = vld [vmem:[%s9093_s6 + $0x268] sm:$0xff]  ;;  %v4786_v46 = vld [vmem:[%s9093_s6 + $0x270] sm:$0xff] }
 0xfe7   :  { %v6678_v11 = vpop.eup %6677  ;;  %v2305_v12 = vadd.f32 1.0, %v6676_v36  ;;  %v6088_v36 = vpack.c.bf16 %v4772_v4, %v4769_v39  ;;  %6115 = vmatpush3.bf16.msra.mxu0 %v6112_v62  ;;  %v4789_v9 = vld [vmem:[%s9093_s6 + $0x288] sm:$0xff]  ;;  %v4796_v4 = vld [vmem:[%s9093_s6 + $0x2c0] sm:$0xff] }
 0xfe8   :  { %2386 = vmatprep.mubr.f32.mxu0 %v2312_v50  ;;  %v2306_v3 = vadd.f32 1.0, %v6678_v11  ;;  %v6116_v50 = vpack.c.bf16 %v4767_v16, %v4764_v1  ;;  %v4768_v11 = vld [vmem:[%s9093_s6 + $0x1e0] sm:$0xff]  ;;  %v6102_v35 = vpack.c.bf16 %v4789_v9, %v4786_v46  ;;  %v4793_v39 = vld [vmem:[%s9093_s6 + $0x2a8] sm:$0xff]  ;;  %v4791_v16 = vld [vmem:[%s9093_s6 + $0x298] sm:$0xff] }
 0xfe9   :  { %2387 = vmatmul.mubr.f32.gmra.mrb[34].mxu0 %v2311_v21  ;;  %v2313_v23 = vmul.f32 %v2305_v12, %v2249_v13  ;;  %v4771_v21 = vld [vmem:[%s9093_s6 + $0x1f8] sm:$0xff]  ;;  %v6104_v1 = vpack.c.bf16 %v4796_v4, %v4793_v39 }
 0xfea   :  { %v6680_v29 = vpop.eup %6679  ;;  %v2314_v32 = vmul.f32 %v2306_v3, %v2250_v33  ;;  %6117 = vmatprep.subr.bf16.mxu0 %v6116_v50  ;;  %v6090_v12 = vpack.c.bf16 %v4771_v21, %v4768_v11 }
 0xfeb   :  { %v6682_v38 = vpop.eup %6681  ;;  %v2307_v49 = vadd.f32 1.0, %v6680_v29  ;;  %6119 = vmatpush3.bf16.msra.mxu0 %v6116_v50  ;;  %v4795_v50 = vld [vmem:[%s9093_s6 + $0x2b8] sm:$0xff] }
 0xfec   :  { %2391 = vmatprep.mubr.f32.mxu0 %v2314_v32  ;;  %v2308_v22 = vadd.f32 1.0, %v6682_v38 }
 0xfed   :  { %2392 = vmatmul.mubr.f32.gmra.mrb[36].mxu0 %v2313_v23  ;;  %v2315_v28 = vmul.f32 %v2307_v49, %v2251_v18 }
 0xfee   :  { %v2316_v17 = vmul.f32 %v2308_v22, %v2252_v8 }
 0xff0   :  { %2396 = vmatprep.mubr.f32.mxu0 %v2316_v17 }
 0xff1   :  { %2397 = vmatmul.mubr.f32.gmra.mrb[38].mxu0 %v2315_v28 }
0x10b8   :  { %v5164_v57 = vpop.f32.mrb[32].mxu0 }
0x10b9   :  { %v5165_v53 = vpop.f32.mrb[33].mxu0 }
0x10ba   :  { %v5166_v40 = vadd.f32 %v5165_v53, %v5164_v57 }
0x10bc   :  { %v2384_v41 = vadd.f32 %v5166_v40, %v8024_v30  ;;  %v5167_v63 = vpop.f32.mrb[34].mxu0 }
0x10bd   :  { %v5168_v61 = vpop.f32.mrb[35].mxu0 }
0x10be   :  { %v5169_v20 = vadd.f32 %v5168_v61, %v5167_v63  ;;  %v8093_v14 = vadd.f32 %v2384_v41, %v7788_v54  ;;  %v4775_v41 = vld [vmem:[%s9093_s6 + $0x218] sm:$0xff]  ;;  %v4778_v63 = vld [vmem:[%s9093_s6 + $0x230] sm:$0xff] }
0x10bf   :  { %v4770_v61 = vld [vmem:[%s9093_s6 + $0x1f0] sm:$0xff] }
0x10c0   :  { %v2389_v31 = vadd.f32 %v5169_v20, %v8024_v30  ;;  %2548 = vadd.xlane.f32.xlu0 %v8093_v14  ;;  %v5170_v19 = vpop.f32.mrb[36].mxu0  ;;  %v6092_v20 = vpack.c.bf16 %v4778_v63, %v4775_v41 }
0x10c1   :  { %v5171_v48 = vpop.f32.mrb[37].mxu0 }
0x10c2   :  { %v5172_v34 = vadd.f32 %v5171_v48, %v5170_v19  ;;  %v8098_v45 = vadd.f32 %v2389_v31, %v7794_v55  ;;  %v4757_v55 = vld [vmem:[%s9093_s6 + $0x188] sm:$0xff]  ;;  %v4774_v19 = vld [vmem:[%s9093_s6 + $0x210] sm:$0xff] }
0x10c3   :  { %v4773_v31 = vld [vmem:[%s9093_s6 + $0x208] sm:$0xff] }
0x10c4   :  { %v2394_v5 = vadd.f32 %v5172_v34, %v8024_v30  ;;  %2550 = vadd.xlane.f32.xlu1 %v8098_v45  ;;  %v5173_v59 = vpop.f32.mrb[38].mxu0  ;;  %v4777_v48 = vld [vmem:[%s9093_s6 + $0x228] sm:$0xff]  ;;  %v6120_v34 = vpack.c.bf16 %v4773_v31, %v4770_v61 }
0x10c5   :  { %v5174_v15 = vpop.f32.mrb[39].mxu0 }
0x10c6   :  { %v5175_v26 = vadd.f32 %v5174_v15, %v5173_v59  ;;  %v8103_v54 = vadd.f32 %v2394_v5, %v7801_v52  ;;  %v4756_v52 = vld [vmem:[%s9093_s6 + $0x180] sm:$0xff]  ;;  %v6094_v5 = vpack.c.bf16 %v4777_v48, %v4774_v19  ;;  %6121 = vmatprep.subr.bf16.mxu0 %v6120_v34  ;;  %v4781_v59 = vld [vmem:[%s9093_s6 + $0x248] sm:$0xff] }
0x10c7   :  { %v4784_v15 = vld [vmem:[%s9093_s6 + $0x260] sm:$0xff]  ;;  %6123 = vmatpush3.bf16.msra.mxu0 %v6120_v34 }
0x10c8   :  { %v2399_v27 = vadd.f32 %v5175_v26, %v8024_v30  ;;  %2552 = vadd.xlane.f32.xlu0 %v8103_v54  ;;  %v6080_v30 = vpack.c.bf16 %v4760_v43, %v4757_v55  ;;  %v4776_v26 = vld [vmem:[%s9093_s6 + $0x220] sm:$0xff]  ;;  %v4779_v55 = vld [vmem:[%s9093_s6 + $0x238] sm:$0xff] }
0x10c9   :  { %v4780_v43 = vld [vmem:[%s9093_s6 + $0x240] sm:$0xff] }
0x10ca   :  { %v8108_v44 = vadd.f32 %v2399_v27, %v7808_v7  ;;  %v4759_v7 = vld [vmem:[%s9093_s6 + $0x198] sm:$0xff]  ;;  %6081 = vmatprep.subr.bf16.mxu1 %v6080_v30  ;;  %v6096_v27 = vpack.c.bf16 %v4784_v15, %v4781_v59  ;;  %v6124_v30 = vpack.c.bf16 %v4779_v55, %v4776_v26 }
0x10cb   :  { %v6082_v10 = vpack.c.bf16 %v4759_v7, %v4756_v52  ;;  %v4783_v52 = vld [vmem:[%s9093_s6 + $0x258] sm:$0xff] }
0x10cc   :  { %2554 = vadd.xlane.f32.xlu1 %v8108_v44  ;;  %v6098_v7 = vpack.c.bf16 %v4783_v52, %v4780_v43  ;;  %6125 = vmatprep.subr.bf16.mxu0 %v6124_v30 }
0x10cd   :  { %6083 = vmatpush1.bf16.msra.mxu1 %v6082_v10  ;;  %v4782_v10 = vld [vmem:[%s9093_s6 + $0x250] sm:$0xff]  ;;  %6127 = vmatpush3.bf16.msra.mxu0 %v6124_v30 }
0x10ce   :  { %6085 = vmatprep.subr.bf16.mxu1 %v6084_v51  ;;  %v6100_v51 = vpack.c.bf16 %v4790_v47, %v4787_v58  ;;  %v6128_v62 = vpack.c.bf16 %v4785_v25, %v4782_v10 }
0x10d0   :  { %6129 = vmatprep.subr.bf16.mxu0 %v6128_v62 }
0x10d1   :  { %6087 = vmatpush1.bf16.msra.mxu1 %v6086_v2  ;;  %v4788_v2 = vld [vmem:[%s9093_s6 + $0x280] sm:$0xff]  ;;  %6131 = vmatpush3.bf16.msra.mxu0 %v6128_v62 }
0x10d2   :  { %6089 = vmatprep.subr.bf16.mxu1 %v6088_v36  ;;  %v4792_v36 = vld [vmem:[%s9093_s6 + $0x2a0] sm:$0xff]  ;;  %v6132_v11 = vpack.c.bf16 %v4791_v16, %v4788_v2 }
0x10d3   :  { %v6106_v21 = vpack.c.bf16 %v4795_v50, %v4792_v36 }
0x10d4   :  { %6133 = vmatprep.subr.bf16.mxu0 %v6132_v11 }
0x10d5   :  { %6091 = vmatpush1.bf16.msra.mxu1 %v6090_v12  ;;  %v4799_v12 = vld [vmem:[%s9093_s6 + $0x2d8] sm:$0xff]  ;;  %6135 = vmatpush3.bf16.msra.mxu0 %v6132_v11 }
0x10d6   :  { %6093 = vmatprep.subr.bf16.mxu1 %v6092_v20 }
0x10d9   :  { %6095 = vmatpush1.bf16.msra.mxu1 %v6094_v5  ;;  %v4755_v5 = vld [vmem:[%s9092_s5 + $0x4] sm:$0xf] }
0x10da   :  { %6097 = vmatprep.subr.bf16.mxu1 %v6096_v27  ;;  %v2595_v26 = vrot.slane %v4755_v5, %v7235_v60  ;;  %v2603_v52 = vrot.slane %v4755_v5, %v7241_v0 }
0x10dd   :  { %6099 = vmatpush1.bf16.msra.mxu1 %v6098_v7 }
0x10de   :  { %6101 = vmatprep.subr.bf16.mxu1 %v6100_v51 }
0x10e1   :  { %6103 = vmatpush1.bf16.msra.mxu1 %v6102_v35 }
0x10e2   :  { %6105 = vmatprep.subr.bf16.mxu1 %v6104_v1 }
0x10e5   :  { %6107 = vmatpush1.bf16.msra.mxu1 %v6106_v21 }
0x114d   :  { %v2549_v33 = vpop.xlane.xlu0 %2548 }
0x114e   :  { %v2556_v3 = vmul.f32 0.0078125, %v2549_v33  ;;  %v4802_v33 = vld [vmem:[%s9093_s6 + $0x2f0] sm:$0xff] }
0x1150   :  { %v8160_v13 = vsub.f32 %v8093_v14, %v2556_v3  ;;  %v4794_v3 = vld [vmem:[%s9093_s6 + $0x2b0] sm:$0xff] }
0x1151   :  { %v2551_v29 = vpop.xlane.xlu1 %2550 }
0x1152   :  { %v2557_v32 = vmul.f32 0.0078125, %v2551_v29  ;;  %v2564_v38 = vmul.f32 %v8160_v13, %v8160_v13  ;;  %v6108_v29 = vpack.c.bf16 %v4802_v33, %v4799_v12 }
0x1154   :  { %v8165_v23 = vsub.f32 %v8098_v45, %v2557_v32  ;;  %2568 = vadd.xlane.f32.xlu0 %v2564_v38  ;;  %v4797_v32 = vld [vmem:[%s9093_s6 + $0x2c8] sm:$0xff]  ;;  %v4798_v38 = vld [vmem:[%s9093_s6 + $0x2d0] sm:$0xff]  ;;  %6109 = vmatprep.subr.bf16.mxu1 %v6108_v29 }
0x1155   :  { %v2553_v49 = vpop.xlane.xlu0 %2552 }
0x1156   :  { %v2558_v8 = vmul.f32 0.0078125, %v2553_v49  ;;  %v2565_v22 = vmul.f32 %v8165_v23, %v8165_v23  ;;  %v4801_v49 = vld [vmem:[%s9093_s6 + $0x2e8] sm:$0xff] }
0x1158   :  { %v8170_v18 = vsub.f32 %v8103_v54, %v2558_v8  ;;  %2570 = vadd.xlane.f32.xlu1 %v2565_v22  ;;  %v6136_v8 = vpack.c.bf16 %v4797_v32, %v4794_v3  ;;  %v6110_v22 = vpack.c.bf16 %v4801_v49, %v4798_v38 }
0x1159   :  { %v2555_v17 = vpop.xlane.xlu1 %2554 }
0x115a   :  { %v2559_v28 = vmul.f32 0.0078125, %v2555_v17  ;;  %v2566_v57 = vmul.f32 %v8170_v18, %v8170_v18  ;;  %6137 = vmatprep.subr.bf16.mxu0 %v6136_v8  ;;  %6111 = vmatpush1.bf16.msra.mxu1 %v6110_v22  ;;  %v4800_v17 = vld [vmem:[%s9093_s6 + $0x2e0] sm:$0xff] }
0x115b   :  { %6139 = vmatpush3.bf16.msra.mxu0 %v6136_v8 }
0x115c   :  { %v8175_v53 = vsub.f32 %v8108_v44, %v2559_v28  ;;  %2572 = vadd.xlane.f32.xlu0 %v2566_v57  ;;  %v4803_v28 = vld [vmem:[%s9093_s6 + $0x2f8] sm:$0xff] }
0x115d   :  { %v6140_v57 = vpack.c.bf16 %v4803_v28, %v4800_v17 }
0x115e   :  { %v2567_v40 = vmul.f32 %v8175_v53, %v8175_v53 }
0x115f   :  { %6141 = vmatprep.subr.bf16.mxu0 %v6140_v57 }
0x1160   :  { %2574 = vadd.xlane.f32.xlu1 %v2567_v40  ;;  %6143 = vmatpush3.bf16.msra.mxu0 %v6140_v57 }
0x11e1   :  { %v2569_v40 = vpop.xlane.xlu0 %2568 }
0x11e2   :  { %v2576_v41 = vmul.f32 0.0078125, %v2569_v40 }
0x11e4   :  { %v2580_v63 = vadd.f32 1e-06, %v2576_v41 }
0x11e5   :  { %v2571_v61 = vpop.xlane.xlu1 %2570 }
0x11e6   :  { %6683 = vrsqrt.f32 %v2580_v63  ;;  %v2577_v20 = vmul.f32 0.0078125, %v2571_v61 }
0x11e8   :  { %v2581_v31 = vadd.f32 1e-06, %v2577_v20 }
0x11e9   :  { %v2573_v19 = vpop.xlane.xlu0 %2572 }
0x11ea   :  { %6685 = vrsqrt.f32 %v2581_v31  ;;  %v2578_v48 = vmul.f32 0.0078125, %v2573_v19 }
0x11ec   :  { %v2582_v34 = vadd.f32 1e-06, %v2578_v48 }
0x11ed   :  { %v2575_v59 = vpop.xlane.xlu1 %2574 }
0x11ee   :  { %6687 = vrsqrt.f32 %v2582_v34  ;;  %v2579_v15 = vmul.f32 0.0078125, %v2575_v59 }
0x11f0   :  { %v6684_v27 = vpop.eup %6683  ;;  %v2583_v55 = vadd.f32 1e-06, %v2579_v15 }
0x11f1   :  { %v2588_v43 = vmul.f32 %v6684_v27, %v8160_v13 }
0x11f2   :  { %6689 = vrsqrt.f32 %v2583_v55 }
0x11f3   :  { %v2596_v30 = vmul.f32 %v2595_v26, %v2588_v43 }
0x11f4   :  { %v6686_v7 = vpop.eup %6685 }
0x11f5   :  { %v2604_v58 = vadd.f32 %v2603_v52, %v2596_v30  ;;  %v2589_v47 = vmul.f32 %v6686_v7, %v8165_v23  ;;  %v8328_v7 = vld [vmem:[%s9089_s2 + $0x8] sm:$0xff] }
0x11f7   :  { %2689 = vmatmul.mubr.f32.vlgmr.msra.gmra.mrb[48].mxu1 %v2604_v58  ;;  %5588 = vmatprep.mubr.f32.mxu0 %v2604_v58  ;;  %v2597_v10 = vmul.f32 %v2595_v26, %v2589_v47 }
0x11f8   :  { %v6688_v51 = vpop.eup %6687  ;;  %2694 = vmatprep.mubr.f32.mxu1 %v6833_v42 }
0x11f9   :  { %v2605_v25 = vadd.f32 %v2603_v52, %v2597_v10  ;;  %v2590_v46 = vmul.f32 %v6688_v51, %v8170_v18  ;;  %v4804_v18 = vld [vmem:[%s9094_s7 + $0x3] sm:$0x7] }
0x11fa   :  { %v2612_v4 = vrot.slane %v4804_v18, %v7235_v60  ;;  %v2616_v36 = vrot.slane %v4804_v18, %v7241_v0  ;;  %v8334_v10 = vld [vmem:[%s9089_s2] sm:$0xff] }
0x11fb   :  { %2695 = vmatmul.mubr.f32.gmra.mrb[50].mxu1 %v2605_v25  ;;  %5589 = vmatmul.mubr.f32.vlgmr.msra.gmra.mrb[40].mxu0 %v2605_v25  ;;  %v2598_v13 = vmul.f32 %v2595_v26, %v2590_v46 }
0x11fc   :  { %v6690_v9 = vpop.eup %6689  ;;  %2700 = vmatprep.mubr.f32.mxu1 %v6833_v42 }
0x11fd   :  { %v2606_v62 = vadd.f32 %v2603_v52, %v2598_v13  ;;  %v2591_v35 = vmul.f32 %v6690_v9, %v8175_v53  ;;  %v2620_v53 = vrot.slane %v4804_v18, %v7257_v24 }
0x11ff   :  { %2701 = vmatmul.mubr.f32.gmra.mrb[52].mxu1 %v2606_v62  ;;  %5591 = vmatprep.mubr.f32.mxu0 %v2606_v62  ;;  %v2599_v23 = vmul.f32 %v2595_v26, %v2591_v35  ;;  %v8342_v35 = vld [vmem:[%s9089_s2 + $0x18] sm:$0xff] }
0x1200   :  { %2706 = vmatprep.mubr.f32.mxu1 %v6833_v42 }
0x1201   :  { %v2607_v39 = vadd.f32 %v2603_v52, %v2599_v23 }
0x1203   :  { %2707 = vmatmul.mubr.f32.gmra.mrb[54].mxu1 %v2607_v39  ;;  %5592 = vmatmul.mubr.f32.gmra.mrb[42].mxu0 %v2607_v39  ;;  %v8348_v39 = vld [vmem:[%s9089_s2 + $0x10] sm:$0xff] }
0x12ca   :  { %v2690_v2 = vpop.f32.mrb[48].mxu1 }
0x12cb   :  { %v8291_v1 = vadd.f32 %v2690_v2, %v2612_v4  ;;  %v2692_v16 = vpop.f32.mrb[49].mxu1 }
0x12cc   :  { %v2693_v3 = vadd.f32 %v2692_v16, %v2616_v36 }
0x12cd   :  { %5602 = vmatprep.mubr.msk.f32.mxu1 %vm579_vm0, %v8291_v1 }
0x12ce   :  { %v2696_v50 = vpop.f32.mrb[50].mxu1  ;;  %v5590_v11 = vpop.f32.mrb[40].mxu0 }
0x12cf   :  { %v2785_v21 = vadd.f32 %v5590_v11, %v2620_v53  ;;  %v2698_v12 = vpop.f32.mrb[51].mxu1  ;;  %v2779_v33 = vpop.f32.mrb[41].mxu0  ;;  %v8313_v15 = vadd.f32 %v2696_v50, %v2612_v4 }
0x12d0   :  { %v2699_v29 = vadd.f32 %v2698_v12, %v2616_v36  ;;  %v2780_v32 = vadd.f32 %v2779_v33, %v2620_v53 }
0x12d2   :  { %v2702_v38 = vpop.f32.mrb[52].mxu1  ;;  %v6144_v49 = vpack.c.bf16 %v2699_v29, %v2693_v3  ;;  %v6156_v8 = vpack.c.bf16 %v2785_v21, %v2780_v32  ;;  %v8297_v22 = vpack.i.bf16 %v2699_v29, %v2693_v3  ;;  %v8299_v28 = vpack.i.bf16 %v2785_v21, %v2780_v32 }
0x12d3   :  { %v2704_v17 = vpop.f32.mrb[53].mxu1  ;;  %v8315_v26 = vadd.f32 %v2702_v38, %v2612_v4 }
0x12d4   :  { %6146 = vmatprep.subr.msk.bf16.mxu1 %vm7267_vm1, %v6144_v49  ;;  %v2705_v20 = vadd.f32 %v2704_v17, %v2616_v36 }
0x12d5   :  { %6149 = vmatpush3.bf16.xpose.msk.msra.mxu1 %vm7267_vm1, %v6144_v49 }
0x12d6   :  { %v2708_v57 = vpop.f32.mrb[54].mxu1  ;;  %v5593_v40 = vpop.f32.mrb[42].mxu0 }
0x12d7   :  { %v2795_v41 = vadd.f32 %v5593_v40, %v2620_v53  ;;  %v2710_v63 = vpop.f32.mrb[55].mxu1  ;;  %v2789_v61 = vpop.f32.mrb[43].mxu0  ;;  %v8321_v27 = vadd.f32 %v2708_v57, %v2612_v4 }
0x12d8   :  { %v2711_v31 = vadd.f32 %v2710_v63, %v2616_v36  ;;  %v2790_v19 = vadd.f32 %v2789_v61, %v2620_v53 }
0x12da   :  { %v6150_v48 = vpack.c.bf16 %v2711_v31, %v2705_v20  ;;  %v6160_v34 = vpack.c.bf16 %v2795_v41, %v2790_v19  ;;  %v8305_v5 = vpack.i.bf16 %v2711_v31, %v2705_v20  ;;  %v8307_v59 = vpack.i.bf16 %v2795_v41, %v2790_v19 }
0x12dc   :  { %6152 = vmatprep.subr.msk.bf16.mxu1 %vm7267_vm1, %v6150_v48 }
0x12dd   :  { %6155 = vmatpush3.bf16.xpose.msk.msra.mxu1 %vm7267_vm1, %v6150_v48 }
0x12de   :  { %6157 = vmatprep.subr.bf16.mxu1 %v6156_v8 }
0x12e4   :  { %5603 = vmatmul.mubr.msk.f32.vlgmr.msra.gmra.mrb[56].mxu1 %vm579_vm0, %v8313_v15 }
0x12e5   :  { %5605 = vmatprep.mubr.msk.f32.mxu1 %vm579_vm0, %v8315_v26  ;;  %6159 = vmatpush3.bf16.msra.mxu1 %v6156_v8 }
0x12e6   :  { %6161 = vmatprep.subr.bf16.mxu1 %v6160_v34 }
0x12e8   :  { %5606 = vmatmul.mubr.msk.f32.gmra.mrb[58].mxu1 %vm579_vm0, %v8321_v27 }
0x12e9   :  { %6163 = vmatpush3.bf16.msra.mxu1 %v6160_v34 }
0x13b7   :  { %v5604_v55 = vpop.f32.mrb[56].mxu1 }
0x13b8   :  { %v2908_v43 = vmul.f32 0.17677669, %v5604_v55  ;;  %v2888_v52 = vpop.f32.mrb[57].mxu1 }
0x13b9   :  { %v2907_v30 = vmul.f32 0.17677669, %v2888_v52 }
0x13ba   :  { %v2912_v58 = vadd.f32 %v8328_v7, %v2908_v43 }
0x13bb   :  { %v5607_v47 = vpop.f32.mrb[58].mxu1  ;;  %v2911_v51 = vadd.f32 %v8334_v10, %v2907_v30 }
0x13bc   :  { %v2910_v25 = vmul.f32 0.17677669, %v5607_v47  ;;  %v2898_v46 = vpop.f32.mrb[59].mxu1  ;;  %v2918_v13 = vsel %vm579_vm0, %v2912_v58, -inf }
0x13bd   :  { %v2909_v9 = vmul.f32 0.17677669, %v2898_v46  ;;  %2919 = vmax.xlane.f32.xlu1 %v2918_v13  ;;  %v2915_v62 = vsel %vm579_vm0, %v2911_v51, -inf }
0x13be   :  { %2916 = vmax.xlane.f32.xlu0 %v2915_v62  ;;  %v2914_v23 = vadd.f32 %v8342_v35, %v2910_v25 }
0x13bf   :  { %v2913_v18 = vadd.f32 %v8348_v39, %v2909_v9 }
0x13c0   :  { %v2924_v4 = vsel %vm579_vm0, %v2914_v23, -inf }
0x13c1   :  { %2925 = vmax.xlane.f32.xlu1 %v2924_v4  ;;  %v2921_v2 = vsel %vm579_vm0, %v2913_v18, -inf }
0x13c2   :  { %2922 = vmax.xlane.f32.xlu0 %v2921_v2 }
0x144a   :  { %v2920_v16 = vpop.xlane.xlu1 %2919 }
0x144b   :  { %v2928_v53 = vsub.f32 %v2912_v58, %v2920_v16  ;;  %v2917_v36 = vpop.xlane.xlu0 %2916 }
0x144c   :  { %v2927_v50 = vsub.f32 %v2911_v51, %v2917_v36 }
0x144d   :  { %v2933_v11 = vmul.f32 1.442695, %v2928_v53 }
0x144e   :  { %v2931_v21 = vmul.f32 1.442695, %v2927_v50  ;;  %v2926_v12 = vpop.xlane.xlu1 %2925 }
0x144f   :  { %6691 = vpow2.f32 %v2933_v11  ;;  %v2930_v33 = vsub.f32 %v2914_v23, %v2926_v12  ;;  %v2923_v3 = vpop.xlane.xlu0 %2922 }
0x1450   :  { %6693 = vpow2.f32 %v2931_v21  ;;  %v2929_v29 = vsub.f32 %v2913_v18, %v2923_v3 }
0x1451   :  { %v2937_v32 = vmul.f32 1.442695, %v2930_v33 }
0x1452   :  { %v2935_v38 = vmul.f32 1.442695, %v2929_v29 }
0x1453   :  { %6695 = vpow2.f32 %v2937_v32 }
0x1454   :  { %6697 = vpow2.f32 %v2935_v38 }
0x1459   :  { %v6692_v49 = vpop.eup %6691 }
0x145a   :  { %v6694_v8 = vpop.eup %6693  ;;  %v2942_v17 = vsel %vm579_vm0, %v6692_v49, 0.0 }
0x145b   :  { %2943 = vadd.xlane.f32.xlu1 %v2942_v17  ;;  %v2939_v57 = vsel %vm579_vm0, %v6694_v8, 0.0 }
0x145c   :  { %2940 = vadd.xlane.f32.xlu0 %v2939_v57 }
0x145d   :  { %v6696_v40 = vpop.eup %6695 }
0x145e   :  { %v6698_v41 = vpop.eup %6697  ;;  %v2948_v63 = vsel %vm579_vm0, %v6696_v40, 0.0 }
0x145f   :  { %2949 = vadd.xlane.f32.xlu1 %v2948_v63  ;;  %v2945_v61 = vsel %vm579_vm0, %v6698_v41, 0.0 }
0x1460   :  { %2946 = vadd.xlane.f32.xlu0 %v2945_v61 }
0x1470   :  { %6487 = vrot.lane.b32.xlu1 %v8305_v5, %s6834_s26 }
0x1474   :  { %3056 = vrot.lane.b32.xlu1 %v8291_v1, %s6834_s26 }
0x1476   :  { %6482 = vrot.lane.b32.xlu0 %v8297_v22, %s6834_s26 }
0x1478   :  { %3058 = vrot.lane.b32.xlu1 %v8313_v15, %s6834_s26 }
0x147a   :  { %3060 = vrot.lane.b32.xlu0 %v8315_v26, %s6834_s26 }
0x147c   :  { %3062 = vrot.lane.b32.xlu1 %v8321_v27, %s6834_s26 }
0x14e8   :  { %v2944_v20 = vpop.xlane.xlu1 %2943 }
0x14e9   :  { %6699 = vrcp.f32 %v2944_v20  ;;  %v2941_v31 = vpop.xlane.xlu0 %2940 }
0x14ea   :  { %6701 = vrcp.f32 %v2941_v31 }
0x14ec   :  { %v2950_v19 = vpop.xlane.xlu1 %2949 }
0x14ed   :  { %6703 = vrcp.f32 %v2950_v19  ;;  %v2947_v48 = vpop.xlane.xlu0 %2946 }
0x14ee   :  { %6705 = vrcp.f32 %v2947_v48 }
0x14f0   :  { %v6488_v34 = vpop.permute.xlu1 %6487 }
0x14f1   :  { %v6483_v55 = vpop.permute.xlu0 %6482  ;;  %v6490_v47 = vunpack.i.h.bf16 %v6488_v34  ;;  %v6489_v51 = vunpack.i.l.bf16 %v6488_v34 }
0x14f2   :  { %v6485_v43 = vunpack.i.h.bf16 %v6483_v55  ;;  %v6484_v52 = vunpack.i.l.bf16 %v6483_v55 }
0x14f3   :  { %v6700_v30 = vpop.eup %6699  ;;  %v6170_v23 = vpack.c.bf16 %v6490_v47, %v6489_v51 }
0x14f4   :  { %v6702_v58 = vpop.eup %6701  ;;  %v6164_v25 = vpack.c.bf16 %v6485_v43, %v6484_v52  ;;  %v2956_v13 = vmul.f32 %v6700_v30, %v6692_v49  ;;  %v3057_v2 = vpop.permute.xlu1 %3056 }
0x14f5   :  { %v2955_v46 = vmul.f32 %v6702_v58, %v6694_v8  ;;  %v3061_v53 = vpop.permute.xlu0 %3060 }
0x14f6   :  { %6166 = vmatprep.subr.msk.bf16.mxu1 %vm7267_vm1, %v6164_v25 }
0x14f7   :  { %v6704_v9 = vpop.eup %6703  ;;  %5616 = vmatprep.mubr.msk.f32.mxu1 %vm579_vm0, %v2955_v46 }
0x14f8   :  { %v6706_v62 = vpop.eup %6705  ;;  %5617 = vmatmul.mubr.msk.f32.vlgmr.msra.gmra.mrb[60].mxu1 %vm579_vm0, %v2956_v13  ;;  %v2958_v4 = vmul.f32 %v6704_v9, %v6696_v40  ;;  %v3059_v16 = vpop.permute.xlu1 %3058 }
0x14f9   :  { %6169 = vmatpush3.bf16.xpose.msk.msra.mxu1 %vm7267_vm1, %v6164_v25  ;;  %v2957_v18 = vmul.f32 %v6706_v62, %v6698_v41 }
0x14fa   :  { %6172 = vmatprep.subr.msk.bf16.mxu1 %vm7267_vm1, %v6170_v23 }
0x14fb   :  { %5619 = vmatprep.mubr.msk.f32.mxu1 %vm579_vm0, %v2957_v18 }
0x14fc   :  { %5620 = vmatmul.mubr.msk.f32.gmra.mrb[62].mxu1 %vm579_vm0, %v2958_v4  ;;  %v3063_v36 = vpop.permute.xlu1 %3062 }
0x14fd   :  { %5630 = vmatprep.mubr.msk.f32.mxu1 %vm579_vm0, %v3057_v2 }
0x1501   :  { %6175 = vmatpush3.bf16.xpose.msk.msra.mxu1 %vm7267_vm1, %v6170_v23 }
0x1508   :  { %5631 = vmatmul.mubr.msk.f32.vlgmr.msra.gmra.mrb[64].mxu1 %vm579_vm0, %v3059_v16 }
0x1509   :  { %5633 = vmatprep.mubr.msk.f32.mxu1 %vm579_vm0, %v3061_v53 }
0x150c   :  { %5634 = vmatmul.mubr.msk.f32.gmra.mrb[66].mxu1 %vm579_vm0, %v3063_v36 }
0x15cb   :  { %v8385_v50 = vpop.f32.mrb[60].mxu1 }
0x15cc   :  { %v8387_v11 = vpop.f32.mrb[61].mxu1 }
0x15cf   :  { %v8389_v21 = vpop.f32.mrb[62].mxu1 }
0x15d0   :  { %v8391_v12 = vpop.f32.mrb[63].mxu1 }
0x15db   :  { %v5632_v33 = vpop.f32.mrb[64].mxu1 }
0x15dc   :  { %v3174_v3 = vmul.f32 0.17677669, %v5632_v33  ;;  %v3154_v29 = vpop.f32.mrb[65].mxu1 }
0x15dd   :  { %v3173_v32 = vmul.f32 0.17677669, %v3154_v29 }
0x15de   :  { %v3178_v38 = vadd.f32 %v8328_v7, %v3174_v3 }
0x15df   :  { %v3177_v49 = vadd.f32 %v8334_v10, %v3173_v32  ;;  %v5635_v8 = vpop.f32.mrb[66].mxu1 }
0x15e0   :  { %v3164_v17 = vpop.f32.mrb[67].mxu1  ;;  %v3184_v57 = vsel %vm579_vm0, %v3178_v38, -inf  ;;  %v3176_v40 = vmul.f32 0.17677669, %v5635_v8 }
0x15e1   :  { %v3175_v41 = vmul.f32 0.17677669, %v3164_v17  ;;  %3185 = vmax.xlane.f32.xlu1 %v3184_v57  ;;  %v3181_v63 = vsel %vm579_vm0, %v3177_v49, -inf }
0x15e2   :  { %3182 = vmax.xlane.f32.xlu0 %v3181_v63  ;;  %v3180_v20 = vadd.f32 %v8342_v35, %v3176_v40 }
0x15e3   :  { %v3179_v61 = vadd.f32 %v8348_v39, %v3175_v41 }
0x15e4   :  { %v3190_v19 = vsel %vm579_vm0, %v3180_v20, -inf }
0x15e5   :  { %v3187_v31 = vsel %vm579_vm0, %v3179_v61, -inf }
0x15e6   :  { %3188 = vmax.xlane.f32.xlu0 %v3187_v31 }
0x15ea   :  { %3191 = vmax.xlane.f32.xlu0 %v3190_v19 }
0x166e   :  { %v3186_v48 = vpop.xlane.xlu1 %3185 }
0x166f   :  { %v3194_v34 = vsub.f32 %v3178_v38, %v3186_v48  ;;  %v3183_v55 = vpop.xlane.xlu0 %3182 }
0x1670   :  { %v3193_v43 = vsub.f32 %v3177_v49, %v3183_v55 }
0x1671   :  { %v3199_v52 = vmul.f32 1.442695, %v3194_v34 }
0x1672   :  { %v3197_v30 = vmul.f32 1.442695, %v3193_v43 }
0x1673   :  { %6707 = vpow2.f32 %v3199_v52  ;;  %v3189_v46 = vpop.xlane.xlu0 %3188 }
0x1674   :  { %6709 = vpow2.f32 %v3197_v30  ;;  %v3195_v13 = vsub.f32 %v3179_v61, %v3189_v46 }
0x1676   :  { %v3201_v9 = vmul.f32 1.442695, %v3195_v13 }
0x1677   :  { %v3192_v62 = vpop.xlane.xlu0 %3191 }
0x1678   :  { %v3196_v23 = vsub.f32 %v3180_v20, %v3192_v62  ;;  %6711 = vpow2.f32 %v3201_v9 }
0x167a   :  { %v3203_v18 = vmul.f32 1.442695, %v3196_v23 }
0x167c   :  { %6713 = vpow2.f32 %v3203_v18 }
0x167d   :  { %v6708_v58 = vpop.eup %6707 }
0x167e   :  { %v6710_v47 = vpop.eup %6709  ;;  %v3208_v51 = vsel %vm579_vm0, %v6708_v58, 0.0 }
0x167f   :  { %3209 = vadd.xlane.f32.xlu1 %v3208_v51  ;;  %v3205_v25 = vsel %vm579_vm0, %v6710_v47, 0.0 }
0x1680   :  { %3206 = vadd.xlane.f32.xlu0 %v3205_v25 }
0x1682   :  { %v6712_v4 = vpop.eup %6711 }
0x1683   :  { %v3211_v2 = vsel %vm579_vm0, %v6712_v4, 0.0 }
0x1686   :  { %v6714_v16 = vpop.eup %6713 }
0x1687   :  { %v3214_v53 = vsel %vm579_vm0, %v6714_v16, 0.0 }
0x1690   :  { %6497 = vrot.lane.b32.xlu1 %v8307_v59, %s6834_s26 }
0x1694   :  { %6502 = vrot.lane.b32.xlu1 %v8297_v22, %s6835_s0 }
0x1696   :  { %6492 = vrot.lane.b32.xlu0 %v8299_v28, %s6834_s26 }
0x1698   :  { %6507 = vrot.lane.b32.xlu1 %v8305_v5, %s6835_s0 }
0x16b5   :  { %3212 = vadd.xlane.f32.xlu0 %v3211_v2 }
0x16bc   :  { %3215 = vadd.xlane.f32.xlu1 %v3214_v53 }
0x16cb   :  { %3338 = vrot.lane.b32.xlu0 %v8291_v1, %s6835_s0 }
0x16cd   :  { %3340 = vrot.lane.b32.xlu1 %v8313_v15, %s6835_s0 }
0x16cf   :  { %3342 = vrot.lane.b32.xlu0 %v8315_v26, %s6835_s0 }
0x16d1   :  { %3344 = vrot.lane.b32.xlu1 %v8321_v27, %s6835_s0 }
0x170c   :  { %v3210_v36 = vpop.xlane.xlu1 %3209 }
0x170d   :  { %v3207_v33 = vpop.xlane.xlu0 %3206 }
0x170e   :  { %6715 = vrcp.f32 %v3207_v33 }
0x170f   :  { %6717 = vrcp.f32 %v3210_v36 }
0x1710   :  { %v6498_v3 = vpop.permute.xlu1 %6497 }
0x1711   :  { %v6493_v29 = vpop.permute.xlu0 %6492  ;;  %v6500_v32 = vunpack.i.h.bf16 %v6498_v3  ;;  %v6499_v38 = vunpack.i.l.bf16 %v6498_v3 }
0x1712   :  { %v6495_v49 = vunpack.i.h.bf16 %v6493_v29  ;;  %v6494_v8 = vunpack.i.l.bf16 %v6493_v29 }
0x1713   :  { %v6180_v40 = vpack.c.bf16 %v6500_v32, %v6499_v38 }
0x1714   :  { %v6176_v17 = vpack.c.bf16 %v6495_v49, %v6494_v8  ;;  %v6503_v57 = vpop.permute.xlu1 %6502 }
0x1715   :  { %v6505_v41 = vunpack.i.h.bf16 %v6503_v57  ;;  %v6504_v63 = vunpack.i.l.bf16 %v6503_v57 }
0x1716   :  { %6177 = vmatprep.subr.bf16.mxu0 %v6176_v17 }
0x1717   :  { %6179 = vmatpush3.bf16.msra.mxu0 %v6176_v17  ;;  %v6184_v19 = vpack.c.bf16 %v6505_v41, %v6504_v63 }
0x1718   :  { %v6716_v61 = vpop.eup %6715  ;;  %6181 = vmatprep.subr.bf16.mxu0 %v6180_v40  ;;  %v6508_v34 = vpop.permute.xlu1 %6507 }
0x1719   :  { %v6718_v20 = vpop.eup %6717  ;;  %v3221_v31 = vmul.f32 %v6716_v61, %v6710_v47  ;;  %v6510_v55 = vunpack.i.h.bf16 %v6508_v34  ;;  %v6509_v43 = vunpack.i.l.bf16 %v6508_v34 }
0x171a   :  { %v3222_v48 = vmul.f32 %v6718_v20, %v6708_v58 }
0x171b   :  { %6183 = vmatpush3.bf16.msra.mxu0 %v6180_v40  ;;  %5644 = vmatprep.mubr.msk.f32.mxu0 %vm579_vm0, %v3221_v31  ;;  %v6190_v52 = vpack.c.bf16 %v6510_v55, %v6509_v43 }
0x171c   :  { %6186 = vmatprep.subr.msk.bf16.mxu0 %vm7267_vm1, %v6184_v19 }
0x171e   :  { %5645 = vmatmul.mubr.msk.f32.vlgmr.msra.gmra.mrb[44].mxu0 %vm579_vm0, %v3222_v48 }
0x1724   :  { %6189 = vmatpush3.bf16.xpose.msk.msra.mxu0 %vm7267_vm1, %v6184_v19 }
0x1725   :  { %6192 = vmatprep.subr.msk.bf16.mxu0 %vm7267_vm1, %v6190_v52 }
0x172c   :  { %6195 = vmatpush3.bf16.xpose.msk.msra.mxu0 %vm7267_vm1, %v6190_v52 }
0x1742   :  { %v3213_v30 = vpop.xlane.xlu0 %3212 }
0x1743   :  { %6719 = vrcp.f32 %v3213_v30 }
0x1746   :  { %v3339_v46 = vpop.permute.xlu0 %3338 }
0x1749   :  { %v3216_v58 = vpop.xlane.xlu1 %3215 }
0x174a   :  { %6721 = vrcp.f32 %v3216_v58  ;;  %v3343_v62 = vpop.permute.xlu0 %3342 }
0x174d   :  { %v6720_v47 = vpop.eup %6719  ;;  %v3341_v9 = vpop.permute.xlu1 %3340 }
0x174e   :  { %v3223_v51 = vmul.f32 %v6720_v47, %v6712_v4 }
0x1750   :  { %5647 = vmatprep.mubr.msk.f32.mxu0 %vm579_vm0, %v3223_v51 }
0x1751   :  { %v3345_v23 = vpop.permute.xlu1 %3344 }
0x1754   :  { %v6722_v25 = vpop.eup %6721 }
0x1755   :  { %v3224_v13 = vmul.f32 %v6722_v25, %v6714_v16 }
0x1757   :  { %5648 = vmatmul.mubr.msk.f32.gmra.mrb[46].mxu0 %vm579_vm0, %v3224_v13 }
0x1758   :  { %5658 = vmatprep.mubr.msk.f32.mxu0 %vm579_vm0, %v3339_v46 }
0x175b   :  { %5659 = vmatmul.mubr.msk.f32.vlgmr.msra.gmra.mrb[48].mxu0 %vm579_vm0, %v3341_v9 }
0x175c   :  { %5661 = vmatprep.mubr.msk.f32.mxu0 %vm579_vm0, %v3343_v62 }
0x175f   :  { %5662 = vmatmul.mubr.msk.f32.gmra.mrb[50].mxu0 %vm579_vm0, %v3345_v23 }
0x17f1   :  { %v8437_v18 = vpop.f32.mrb[44].mxu0 }
0x17f2   :  { %v8439_v4 = vpop.f32.mrb[45].mxu0 }
0x17f3   :  { %v6541_v2 = vpack.i.bf16 %v8437_v18, %v8439_v4 }
0x182a   :  { %v8443_v16 = vpop.f32.mrb[46].mxu0 }
0x182b   :  { %v8445_v53 = vpop.f32.mrb[47].mxu0 }
0x182c   :  { %v6556_v36 = vpack.i.bf16 %v8443_v16, %v8445_v53 }
0x182e   :  { %v5660_v33 = vpop.f32.mrb[48].mxu0 }
0x182f   :  { %v3456_v3 = vmul.f32 0.17677669, %v5660_v33  ;;  %v3436_v29 = vpop.f32.mrb[49].mxu0 }
0x1830   :  { %v3455_v32 = vmul.f32 0.17677669, %v3436_v29 }
0x1831   :  { %v3460_v38 = vadd.f32 %v8328_v7, %v3456_v3 }
0x1832   :  { %v3459_v49 = vadd.f32 %v8334_v10, %v3455_v32  ;;  %v5663_v8 = vpop.f32.mrb[50].mxu0 }
0x1833   :  { %v3446_v17 = vpop.f32.mrb[51].mxu0  ;;  %v3466_v57 = vsel %vm579_vm0, %v3460_v38, -inf  ;;  %v3458_v40 = vmul.f32 0.17677669, %v5663_v8 }
0x1834   :  { %v3457_v41 = vmul.f32 0.17677669, %v3446_v17  ;;  %3467 = vmax.xlane.f32.xlu1 %v3466_v57  ;;  %v3463_v63 = vsel %vm579_vm0, %v3459_v49, -inf }
0x1835   :  { %3464 = vmax.xlane.f32.xlu0 %v3463_v63  ;;  %v3462_v20 = vadd.f32 %v8342_v35, %v3458_v40 }
0x1836   :  { %v3461_v61 = vadd.f32 %v8348_v39, %v3457_v41 }
0x1837   :  { %v3472_v19 = vsel %vm579_vm0, %v3462_v20, -inf }
0x1838   :  { %v3469_v31 = vsel %vm579_vm0, %v3461_v61, -inf }
0x1839   :  { %3470 = vmax.xlane.f32.xlu0 %v3469_v31 }
0x183d   :  { %3473 = vmax.xlane.f32.xlu0 %v3472_v19 }
0x18c1   :  { %v3468_v48 = vpop.xlane.xlu1 %3467 }
0x18c2   :  { %v3476_v34 = vsub.f32 %v3460_v38, %v3468_v48  ;;  %v3465_v55 = vpop.xlane.xlu0 %3464 }
0x18c3   :  { %v3475_v43 = vsub.f32 %v3459_v49, %v3465_v55 }
0x18c4   :  { %v3481_v52 = vmul.f32 1.442695, %v3476_v34 }
0x18c5   :  { %v3479_v30 = vmul.f32 1.442695, %v3475_v43 }
0x18c6   :  { %6723 = vpow2.f32 %v3481_v52  ;;  %v3471_v46 = vpop.xlane.xlu0 %3470 }
0x18c7   :  { %6725 = vpow2.f32 %v3479_v30  ;;  %v3477_v13 = vsub.f32 %v3461_v61, %v3471_v46 }
0x18c9   :  { %v3483_v9 = vmul.f32 1.442695, %v3477_v13 }
0x18ca   :  { %v3474_v62 = vpop.xlane.xlu0 %3473 }
0x18cb   :  { %v3478_v23 = vsub.f32 %v3462_v20, %v3474_v62  ;;  %6727 = vpow2.f32 %v3483_v9 }
0x18cd   :  { %v3485_v33 = vmul.f32 1.442695, %v3478_v23 }
0x18cf   :  { %6729 = vpow2.f32 %v3485_v33 }
0x18d0   :  { %v6724_v58 = vpop.eup %6723 }
0x18d1   :  { %v6726_v47 = vpop.eup %6725  ;;  %v3490_v51 = vsel %vm579_vm0, %v6724_v58, 0.0 }
0x18d2   :  { %3491 = vadd.xlane.f32.xlu1 %v3490_v51  ;;  %v3487_v25 = vsel %vm579_vm0, %v6726_v47, 0.0 }
0x18d3   :  { %3488 = vadd.xlane.f32.xlu0 %v3487_v25 }
0x18d5   :  { %v6728_v3 = vpop.eup %6727 }
0x18d6   :  { %v3493_v29 = vsel %vm579_vm0, %v6728_v3, 0.0 }
0x18d9   :  { %v6730_v32 = vpop.eup %6729 }
0x18e3   :  { %6517 = vrot.lane.b32.xlu1 %v8307_v59, %s6835_s0 }
0x18e7   :  { %6522 = vrot.lane.b32.xlu1 %v8297_v22, %s6836_s4  ;;  %v3496_v22 = vsel %vm579_vm0, %v6730_v32, 0.0 }
0x18e9   :  { %6512 = vrot.lane.b32.xlu0 %v8299_v28, %s6835_s0 }
0x18eb   :  { %6527 = vrot.lane.b32.xlu1 %v8305_v5, %s6836_s4 }
0x1908   :  { %3494 = vadd.xlane.f32.xlu0 %v3493_v29 }
0x190f   :  { %3497 = vadd.xlane.f32.xlu1 %v3496_v22 }
0x191e   :  { %3616 = vrot.lane.b32.xlu0 %v8291_v1, %s6836_s4 }
0x1920   :  { %3618 = vrot.lane.b32.xlu1 %v8313_v15, %s6836_s4 }
0x1922   :  { %3620 = vrot.lane.b32.xlu0 %v8315_v26, %s6836_s4 }
0x1924   :  { %3622 = vrot.lane.b32.xlu1 %v8321_v27, %s6836_s4 }
0x195f   :  { %v3492_v5 = vpop.xlane.xlu1 %3491 }
0x1960   :  { %v3489_v38 = vpop.xlane.xlu0 %3488 }
0x1961   :  { %6731 = vrcp.f32 %v3489_v38 }
0x1962   :  { %6733 = vrcp.f32 %v3492_v5 }
0x1963   :  { %v6518_v49 = vpop.permute.xlu1 %6517 }
0x1964   :  { %v6513_v8 = vpop.permute.xlu0 %6512  ;;  %v6520_v17 = vunpack.i.h.bf16 %v6518_v49  ;;  %v6519_v57 = vunpack.i.l.bf16 %v6518_v49 }
0x1965   :  { %v6515_v40 = vunpack.i.h.bf16 %v6513_v8  ;;  %v6514_v41 = vunpack.i.l.bf16 %v6513_v8 }
0x1966   :  { %v6200_v61 = vpack.c.bf16 %v6520_v17, %v6519_v57 }
0x1967   :  { %v6196_v1 = vpack.c.bf16 %v6515_v40, %v6514_v41  ;;  %v6523_v63 = vpop.permute.xlu1 %6522 }
0x1968   :  { %v6525_v15 = vunpack.i.h.bf16 %v6523_v63  ;;  %v6524_v20 = vunpack.i.l.bf16 %v6523_v63 }
0x1969   :  { %6197 = vmatprep.subr.bf16.mxu1 %v6196_v1 }
0x196a   :  { %6199 = vmatpush3.bf16.msra.mxu1 %v6196_v1  ;;  %v6204_v19 = vpack.c.bf16 %v6525_v15, %v6524_v20 }
0x196b   :  { %v6732_v26 = vpop.eup %6731  ;;  %6201 = vmatprep.subr.bf16.mxu1 %v6200_v61  ;;  %v6528_v34 = vpop.permute.xlu1 %6527 }
0x196c   :  { %v6734_v27 = vpop.eup %6733  ;;  %v3503_v31 = vmul.f32 %v6732_v26, %v6726_v47  ;;  %v6530_v55 = vunpack.i.h.bf16 %v6528_v34  ;;  %v6529_v43 = vunpack.i.l.bf16 %v6528_v34 }
0x196d   :  { %v3504_v48 = vmul.f32 %v6734_v27, %v6724_v58 }
0x196e   :  { %6203 = vmatpush3.bf16.msra.mxu1 %v6200_v61  ;;  %5672 = vmatprep.mubr.msk.f32.mxu1 %vm579_vm0, %v3503_v31  ;;  %v6210_v52 = vpack.c.bf16 %v6530_v55, %v6529_v43 }
0x196f   :  { %6206 = vmatprep.subr.msk.bf16.mxu1 %vm7267_vm1, %v6204_v19 }
0x1971   :  { %5673 = vmatmul.mubr.msk.f32.vlgmr.msra.gmra.mrb[68].mxu1 %vm579_vm0, %v3504_v48 }
0x1977   :  { %6209 = vmatpush3.bf16.xpose.msk.msra.mxu1 %vm7267_vm1, %v6204_v19 }
0x1978   :  { %6212 = vmatprep.subr.msk.bf16.mxu1 %vm7267_vm1, %v6210_v52 }
0x197f   :  { %6215 = vmatpush3.bf16.xpose.msk.msra.mxu1 %vm7267_vm1, %v6210_v52 }
0x1995   :  { %v3495_v30 = vpop.xlane.xlu0 %3494 }
0x1996   :  { %6735 = vrcp.f32 %v3495_v30 }
0x1999   :  { %v3617_v46 = vpop.permute.xlu0 %3616 }
0x199c   :  { %v3498_v58 = vpop.xlane.xlu1 %3497 }
0x199d   :  { %6737 = vrcp.f32 %v3498_v58  ;;  %v3621_v62 = vpop.permute.xlu0 %3620 }
0x19a0   :  { %v6736_v47 = vpop.eup %6735  ;;  %v3619_v9 = vpop.permute.xlu1 %3618 }
0x19a1   :  { %v3505_v51 = vmul.f32 %v6736_v47, %v6728_v3 }
0x19a3   :  { %5675 = vmatprep.mubr.msk.f32.mxu1 %vm579_vm0, %v3505_v51 }
0x19a4   :  { %v3623_v37 = vpop.permute.xlu1 %3622 }
0x19a7   :  { %v6738_v25 = vpop.eup %6737 }
0x19a8   :  { %v3506_v13 = vmul.f32 %v6738_v25, %v6730_v32 }
0x19aa   :  { %5676 = vmatmul.mubr.msk.f32.gmra.mrb[70].mxu1 %vm579_vm0, %v3506_v13 }
0x19ab   :  { %5686 = vmatprep.mubr.msk.f32.mxu1 %vm579_vm0, %v3617_v46 }
0x19ae   :  { %5687 = vmatmul.mubr.msk.f32.vlgmr.msra.gmra.mrb[72].mxu1 %vm579_vm0, %v3619_v9 }
0x19af   :  { %5689 = vmatprep.mubr.msk.f32.mxu1 %vm579_vm0, %v3621_v62 }
0x19b2   :  { %5690 = vmatmul.mubr.msk.f32.gmra.mrb[74].mxu1 %vm579_vm0, %v3623_v37 }
0x19b3   :  { %4124 = vmatprep.mubr.f32.mxu1 %v6833_v42 }
0x1a44   :  { %v5674_v23 = vpop.f32.mrb[68].mxu1 }
0x1a45   :  { %v3597_v33 = vpop.f32.mrb[69].mxu1 }
0x1a46   :  { %v6546_v3 = vpack.i.bf16 %v5674_v23, %v3597_v33 }
0x1a7d   :  { %v8494_v29 = vpop.f32.mrb[70].mxu1 }
0x1a7e   :  { %v8496_v32 = vpop.f32.mrb[71].mxu1 }
0x1a7f   :  { %v6561_v22 = vpack.i.bf16 %v8494_v29, %v8496_v32  ;;  %v4839_v29 = vld [vmem:[%s9097_s10 + $0x188] sm:$0xff]  ;;  %v4841_v32 = vld [vmem:[%s9097_s10 + $0x198] sm:$0xff] }
0x1a81   :  { %v5688_v5 = vpop.f32.mrb[72].mxu1 }
0x1a82   :  { %v3734_v38 = vmul.f32 0.17677669, %v5688_v5  ;;  %v3714_v49 = vpop.f32.mrb[73].mxu1 }
0x1a83   :  { %v3733_v8 = vmul.f32 0.17677669, %v3714_v49 }
0x1a84   :  { %v3738_v17 = vadd.f32 %v8328_v7, %v3734_v38 }
0x1a85   :  { %v3737_v57 = vadd.f32 %v8334_v10, %v3733_v8  ;;  %v5691_v40 = vpop.f32.mrb[74].mxu1 }
0x1a86   :  { %v3724_v41 = vpop.f32.mrb[75].mxu1  ;;  %v3744_v1 = vsel %vm579_vm0, %v3738_v17, -inf  ;;  %v3736_v63 = vmul.f32 0.17677669, %v5691_v40 }
0x1a87   :  { %v3735_v61 = vmul.f32 0.17677669, %v3724_v41  ;;  %3745 = vmax.xlane.f32.xlu1 %v3744_v1  ;;  %v3741_v15 = vsel %vm579_vm0, %v3737_v57, -inf }
0x1a88   :  { %3742 = vmax.xlane.f32.xlu0 %v3741_v15  ;;  %v3740_v26 = vadd.f32 %v8342_v35, %v3736_v63  ;;  %v4805_v63 = vld [vmem:[%s9095_s8 + $0x80] sm:$0xff]  ;;  %v4807_v15 = vld [vmem:[%s9095_s8 + $0x90] sm:$0xff] }
0x1a89   :  { %v3739_v20 = vadd.f32 %v8348_v39, %v3735_v61  ;;  %v4806_v61 = vld [vmem:[%s9095_s8 + $0x88] sm:$0xff] }
0x1a8a   :  { %v3750_v7 = vsel %vm579_vm0, %v3740_v26, -inf }
0x1a8b   :  { %v3747_v27 = vsel %vm579_vm0, %v3739_v20, -inf }
0x1a8c   :  { %3748 = vmax.xlane.f32.xlu0 %v3747_v27 }
0x1a90   :  { %3751 = vmax.xlane.f32.xlu0 %v3750_v7  ;;  %v4809_v7 = vld [vmem:[%s9095_s8 + $0xa0] sm:$0xff] }
0x1b14   :  { %v3746_v10 = vpop.xlane.xlu1 %3745 }
0x1b15   :  { %v3754_v31 = vsub.f32 %v3738_v17, %v3746_v10  ;;  %v3743_v19 = vpop.xlane.xlu0 %3742  ;;  %v4810_v10 = vld [vmem:[%s9095_s8 + $0xa8] sm:$0xff] }
0x1b16   :  { %v3753_v48 = vsub.f32 %v3737_v57, %v3743_v19  ;;  %v4811_v19 = vld [vmem:[%s9095_s8 + $0xb0] sm:$0xff] }
0x1b17   :  { %v3759_v34 = vmul.f32 1.442695, %v3754_v31  ;;  %v6232_v31 = vpack.c.bf16 %v4810_v10, %v4809_v7  ;;  %v8660_v7 = vpack.c.bf16 %v4841_v32, %v4839_v29  ;;  %v4838_v10 = vld [vmem:[%s9097_s10 + $0x180] sm:$0xff] }
0x1b18   :  { %v3757_v55 = vmul.f32 1.442695, %v3753_v48  ;;  %v4812_v48 = vld [vmem:[%s9095_s8 + $0xb8] sm:$0xff] }
0x1b19   :  { %6739 = vpow2.f32 %v3759_v34  ;;  %v3749_v43 = vpop.xlane.xlu0 %3748  ;;  %v6236_v34 = vpack.c.bf16 %v4812_v48, %v4811_v19  ;;  %v4843_v19 = vld [vmem:[%s9097_s10 + $0x1a8] sm:$0xff]  ;;  %v4845_v48 = vld [vmem:[%s9097_s10 + $0x1b8] sm:$0xff] }
0x1b1a   :  { %6741 = vpow2.f32 %v3757_v55  ;;  %v3755_v52 = vsub.f32 %v3739_v20, %v3749_v43  ;;  %v6224_v20 = vpack.c.bf16 %v4806_v61, %v4805_v63  ;;  %v4813_v55 = vld [vmem:[%s9095_s8 + $0xc0] sm:$0xff]  ;;  %v4814_v43 = vld [vmem:[%s9095_s8 + $0xc8] sm:$0xff]  ;;  %v4837_v61 = vld [vmem:[%s9097_s10 + $0x178] sm:$0xff] }
0x1b1b   :  { %v4835_v63 = vld [vmem:[%s9097_s10 + $0x168] sm:$0xff] }
0x1b1c   :  { %v3761_v30 = vmul.f32 1.442695, %v3755_v52  ;;  %v6240_v52 = vpack.c.bf16 %v4814_v43, %v4813_v55  ;;  %v8678_v55 = vpack.c.bf16 %v4845_v48, %v4843_v19  ;;  %v4842_v43 = vld [vmem:[%s9097_s10 + $0x1a0] sm:$0xff]  ;;  %v4851_v19 = vld [vmem:[%s9097_s10 + $0x1e8] sm:$0xff] }
0x1b1d   :  { %v3752_v39 = vpop.xlane.xlu0 %3751 }
0x1b1e   :  { %6743 = vpow2.f32 %v3761_v30  ;;  %v3756_v35 = vsub.f32 %v3740_v26, %v3752_v39  ;;  %v4808_v26 = vld [vmem:[%s9095_s8 + $0x98] sm:$0xff]  ;;  %v4815_v30 = vld [vmem:[%s9095_s8 + $0xd0] sm:$0xff] }
0x1b1f   :  { %v6228_v27 = vpack.c.bf16 %v4808_v26, %v4807_v15  ;;  %v4816_v39 = vld [vmem:[%s9095_s8 + $0xd8] sm:$0xff]  ;;  %v4834_v26 = vld [vmem:[%s9097_s10 + $0x160] sm:$0xff] }
0x1b20   :  { %v3763_v58 = vmul.f32 1.442695, %v3756_v35  ;;  %v6244_v35 = vpack.c.bf16 %v4816_v39, %v4815_v30  ;;  %v4847_v30 = vld [vmem:[%s9097_s10 + $0x1c8] sm:$0xff]  ;;  %v4849_v39 = vld [vmem:[%s9097_s10 + $0x1d8] sm:$0xff] }
0x1b22   :  { %6745 = vpow2.f32 %v3763_v58  ;;  %v4817_v58 = vld [vmem:[%s9095_s8 + $0xe0] sm:$0xff] }
0x1b23   :  { %v6740_v47 = vpop.eup %6739 }
0x1b24   :  { %v6742_v51 = vpop.eup %6741  ;;  %v3768_v25 = vsel %vm579_vm0, %v6740_v47, 0.0 }
0x1b25   :  { %3769 = vadd.xlane.f32.xlu1 %v3768_v25  ;;  %v3765_v46 = vsel %vm579_vm0, %v6742_v51, 0.0  ;;  %v4819_v25 = vld [vmem:[%s9095_s8 + $0xf0] sm:$0xff] }
0x1b26   :  { %3766 = vadd.xlane.f32.xlu0 %v3765_v46  ;;  %v4820_v46 = vld [vmem:[%s9095_s8 + $0xf8] sm:$0xff] }
0x1b28   :  { %v6744_v13 = vpop.eup %6743 }
0x1b29   :  { %v3771_v9 = vsel %vm579_vm0, %v6744_v13, 0.0 }
0x1b2a   :  { %3772 = vadd.xlane.f32.xlu0 %v3771_v9 }
0x1b2c   :  { %v6746_v62 = vpop.eup %6745 }
0x1b2d   :  { %v3774_v37 = vsel %vm579_vm0, %v6746_v62, 0.0 }
0x1b2e   :  { %3775 = vadd.xlane.f32.xlu1 %v3774_v37  ;;  %v4825_v37 = vld [vmem:[%s9097_s10 + $0x118] sm:$0xff] }
0x1b3f   :  { %6537 = vrot.lane.b32.xlu1 %v8307_v59, %s6836_s4 }
0x1b40   :  { %6532 = vrot.lane.b32.xlu0 %v8299_v28, %s6836_s4 }
0x1b43   :  { %6542 = vrot.lane.b32.xlu1 %v6541_v2, %s6836_s4 }
0x1b47   :  { %6547 = vrot.lane.b32.xlu1 %v6546_v3, %s6835_s0 }
0x1b4b   :  { %6557 = vrot.lane.b32.xlu1 %v6556_v36, %s6836_s4 }
0x1bb2   :  { %v3770_v33 = vpop.xlane.xlu1 %3769 }
0x1bb3   :  { %v3767_v23 = vpop.xlane.xlu0 %3766 }
0x1bb4   :  { %6747 = vrcp.f32 %v3767_v23  ;;  %v4822_v23 = vld [vmem:[%s9097_s10 + $0x100] sm:$0xff] }
0x1bb5   :  { %6749 = vrcp.f32 %v3770_v33 }
0x1bb7   :  { %v3773_v5 = vpop.xlane.xlu0 %3772 }
0x1bb8   :  { %6751 = vrcp.f32 %v3773_v5 }
0x1bbb   :  { %v3776_v59 = vpop.xlane.xlu1 %3775  ;;  %v6533_v28 = vpop.permute.xlu0 %6532 }
0x1bbc   :  { %v6535_v38 = vunpack.i.h.bf16 %v6533_v28  ;;  %v6534_v49 = vunpack.i.l.bf16 %v6533_v28  ;;  %6753 = vrcp.f32 %v3776_v59  ;;  %v4824_v59 = vld [vmem:[%s9097_s10 + $0x110] sm:$0xff]  ;;  %v4827_v28 = vld [vmem:[%s9097_s10 + $0x128] sm:$0xff] }
0x1bbe   :  { %v6748_v18 = vpop.eup %6747  ;;  %v6216_v4 = vpack.c.bf16 %v6535_v38, %v6534_v49  ;;  %v4829_v38 = vld [vmem:[%s9097_s10 + $0x138] sm:$0xff] }
0x1bbf   :  { %v6538_v2 = vpop.permute.xlu1 %6537  ;;  %v3781_v3 = vmul.f32 %v6748_v18, %v6742_v51  ;;  %v6750_v53 = vpop.eup %6749  ;;  %v8597_v18 = vpack.c.bf16 %v4824_v59, %v4822_v23 }
0x1bc0   :  { %v6540_v8 = vunpack.i.h.bf16 %v6538_v2  ;;  %v6539_v17 = vunpack.i.l.bf16 %v6538_v2  ;;  %6217 = vmatprep.subr.bf16.mxu0 %v6216_v4  ;;  %v3782_v57 = vmul.f32 %v6750_v53, %v6740_v47  ;;  %v4818_v47 = vld [vmem:[%s9095_s8 + $0xe8] sm:$0xff]  ;;  %v4826_v2 = vld [vmem:[%s9097_s10 + $0x120] sm:$0xff] }
0x1bc1   :  { %6219 = vmatpush3.bf16.msra.mxu0 %v6216_v4  ;;  %5700 = vmatprep.mubr.msk.f32.mxu0 %vm579_vm0, %v3781_v3  ;;  %v6248_v51 = vpack.c.bf16 %v4818_v47, %v4817_v58  ;;  %v8599_v4 = vpack.c.bf16 %v4829_v38, %v4827_v28  ;;  %v4828_v3 = vld [vmem:[%s9097_s10 + $0x130] sm:$0xff]  ;;  %v8696_v58 = vpack.c.bf16 %v4849_v39, %v4847_v30  ;;  %v4846_v47 = vld [vmem:[%s9097_s10 + $0x1c0] sm:$0xff]  ;;  %v4872_v39 = vld [vmem:[%s9099_s12 + $0x188] sm:$0xff] }
0x1bc2   :  { %v6220_v16 = vpack.c.bf16 %v6540_v8, %v6539_v17  ;;  %v6752_v36 = vpop.eup %6751  ;;  %v4831_v8 = vld [vmem:[%s9097_s10 + $0x148] sm:$0xff]  ;;  %v4833_v17 = vld [vmem:[%s9097_s10 + $0x158] sm:$0xff]  ;;  %v4871_v30 = vld [vmem:[%s9099_s12 + $0x180] sm:$0xff] }
0x1bc3   :  { %v3783_v41 = vmul.f32 %v6752_v36, %v6744_v13  ;;  %v6252_v13 = vpack.c.bf16 %v4820_v46, %v4819_v25  ;;  %v8617_v36 = vpack.c.bf16 %v4828_v3, %v4826_v2  ;;  %v6543_v46 = vpop.permute.xlu1 %6542 }
0x1bc4   :  { %6221 = vmatprep.subr.bf16.mxu0 %v6220_v16 }
0x1bc5   :  { %6223 = vmatpush3.bf16.msra.mxu0 %v6220_v16 }
0x1bc6   :  { %v6754_v40 = vpop.eup %6753  ;;  %6225 = vmatprep.subr.bf16.mxu0 %v6224_v20 }
0x1bc7   :  { %v3784_v1 = vmul.f32 %v6754_v40, %v6746_v62  ;;  %v4823_v62 = vld [vmem:[%s9097_s10 + $0x108] sm:$0xff]  ;;  %v8619_v40 = vpack.c.bf16 %v4833_v17, %v4831_v8 }
0x1bc8   :  { %5701 = vmatmul.mubr.msk.f32.vlgmr.msra.gmra.mrb[52].mxu0 %vm579_vm0, %v3782_v57  ;;  %v8586_v5 = vpack.c.bf16 %v4825_v37, %v4823_v62  ;;  %v6544_v62 = vunpack.i.l.bf16 %v6543_v46 }
0x1bc9   :  { %5703 = vmatprep.mubr.msk.f32.mxu0 %vm579_vm0, %v3783_v41  ;;  %6227 = vmatpush3.bf16.msra.mxu0 %v6224_v20  ;;  %v4830_v41 = vld [vmem:[%s9097_s10 + $0x140] sm:$0xff]  ;;  %v8642_v20 = vpack.c.bf16 %v4837_v61, %v4835_v63 }
0x1bca   :  { %6229 = vmatprep.subr.bf16.mxu0 %v6228_v27  ;;  %6257 = vmatprep.subr.bf16.mxu1 %v8586_v5  ;;  %v3942_v2 = vsel %vm579_vm0, %v8387_v11, %v6544_v62 }
0x1bcb   :  { %6259 = vmatpush1.bf16.msra.mxu1 %v8597_v18 }
0x1bcc   :  { %5704 = vmatmul.mubr.msk.f32.gmra.mrb[54].mxu0 %vm579_vm0, %v3784_v1  ;;  %6261 = vmatprep.subr.bf16.mxu1 %v8599_v4  ;;  %v4832_v1 = vld [vmem:[%s9097_s10 + $0x150] sm:$0xff] }
0x1bcd   :  { %6231 = vmatpush3.bf16.msra.mxu0 %v6228_v27  ;;  %v8639_v15 = vpack.c.bf16 %v4832_v1, %v4830_v41  ;;  %v4836_v27 = vld [vmem:[%s9097_s10 + $0x170] sm:$0xff] }
0x1bce   :  { %6233 = vmatprep.subr.bf16.mxu0 %v6232_v31 }
0x1bcf   :  { %6263 = vmatpush1.bf16.msra.mxu1 %v8617_v36 }
0x1bd0   :  { %6265 = vmatprep.subr.bf16.mxu1 %v8619_v40 }
0x1bd1   :  { %6235 = vmatpush3.bf16.msra.mxu0 %v6232_v31  ;;  %v4840_v31 = vld [vmem:[%s9097_s10 + $0x190] sm:$0xff] }
0x1bd2   :  { %6237 = vmatprep.subr.bf16.mxu0 %v6236_v34 }
0x1bd3   :  { %6267 = vmatpush1.bf16.msra.mxu1 %v8639_v15 }
0x1bd4   :  { %6269 = vmatprep.subr.bf16.mxu1 %v8642_v20 }
0x1bd5   :  { %6239 = vmatpush3.bf16.msra.mxu0 %v6236_v34  ;;  %v8675_v34 = vpack.c.bf16 %v4840_v31, %v4838_v10 }
0x1bd6   :  { %6241 = vmatprep.subr.bf16.mxu0 %v6240_v52 }
0x1bd9   :  { %6243 = vmatpush3.bf16.msra.mxu0 %v6240_v52  ;;  %v4844_v52 = vld [vmem:[%s9097_s10 + $0x1b0] sm:$0xff] }
0x1bda   :  { %6245 = vmatprep.subr.bf16.mxu0 %v6244_v35 }
0x1bdd   :  { %6247 = vmatpush3.bf16.msra.mxu0 %v6244_v35  ;;  %v8693_v35 = vpack.c.bf16 %v4844_v52, %v4842_v43  ;;  %v4852_v43 = vld [vmem:[%s9097_s10 + $0x1f0] sm:$0xff] }
0x1bde   :  { %6249 = vmatprep.subr.bf16.mxu0 %v6248_v51 }
0x1be1   :  { %6251 = vmatpush3.bf16.msra.mxu0 %v6248_v51  ;;  %v4848_v51 = vld [vmem:[%s9097_s10 + $0x1d0] sm:$0xff] }
0x1be2   :  { %6253 = vmatprep.subr.bf16.mxu0 %v6252_v13  ;;  %v8705_v25 = vpack.c.bf16 %v4848_v51, %v4846_v47  ;;  %v4855_v47 = vld [vmem:[%s9099_s12 + $0x100] sm:$0xff]  ;;  %v8747_v51 = vpack.c.bf16 %v4872_v39, %v4871_v30  ;;  %v4869_v30 = vld [vmem:[%s9099_s12 + $0x170] sm:$0xff]  ;;  %v4870_v39 = vld [vmem:[%s9099_s12 + $0x178] sm:$0xff] }
0x1be5   :  { %6255 = vmatpush3.bf16.msra.mxu0 %v6252_v13  ;;  %v6548_v13 = vpop.permute.xlu1 %6547 }
0x1be6   :  { %v6550_v37 = vunpack.i.h.bf16 %v6548_v13  ;;  %v6549_v23 = vunpack.i.l.bf16 %v6548_v13  ;;  %6289 = vmatprep.subr.bf16.mxu0 %v8747_v51 }
0x1c9b   :  { %v5702_v9 = vpop.f32.mrb[52].mxu0 }
0x1c9c   :  { %v3875_v33 = vpop.f32.mrb[53].mxu0 }
0x1c9d   :  { %v6551_v49 = vpack.i.bf16 %v5702_v9, %v3875_v33  ;;  %v6545_v9 = vunpack.i.h.bf16 %v6543_v46  ;;  %v6558_v33 = vpop.permute.xlu1 %6557  ;;  %v4856_v46 = vld [vmem:[%s9099_s12 + $0x108] sm:$0xff] }
0x1c9e   :  { %v6560_v8 = vunpack.i.h.bf16 %v6558_v33  ;;  %v6559_v17 = vunpack.i.l.bf16 %v6558_v33  ;;  %v8752_v13 = vpack.c.bf16 %v4856_v46, %v4855_v47  ;;  %v8914_v47 = vpack.c.bf16 %v4870_v39, %v4869_v30  ;;  %v4854_v46 = vld [vmem:[%s9098_s11 + $0x2] sm:$0x3] }
0x1c9f   :  { %6552 = vrot.lane.b32.xlu0 %v6551_v49, %s6834_s26  ;;  %v5705_v16 = vpop.f32.mrb[54].mxu0  ;;  %v3943_v28 = vsel %vm579_vm0, %v8385_v50, %v6545_v9 }
0x1ca0   :  { %v3885_v53 = vpop.f32.mrb[55].mxu0  ;;  %v3947_v3 = vsel %vm1728_vm2, %v3943_v28, %v6550_v37  ;;  %v3944_v11 = vsel %vm579_vm0, %v8391_v12, %v6559_v17  ;;  %v4853_v12 = vld [vmem:[%s9097_s10 + $0x1f8] sm:$0xff] }
0x1ca1   :  { %v6566_v57 = vpack.i.bf16 %v5705_v16, %v3885_v53  ;;  %v3946_v16 = vsel %vm1728_vm2, %v3942_v2, %v6549_v23  ;;  %v6284_v48 = vpack.c.bf16 %v4853_v12, %v4851_v19  ;;  %v4868_v12 = vld [vmem:[%s9099_s12 + $0x168] sm:$0xff] }
0x1ca3   :  { %6562 = vrot.lane.b32.xlu0 %v6561_v22, %s6835_s0  ;;  %6567 = vrot.lane.b32.xlu1 %v6566_v57, %s6834_s26  ;;  %v8657_v22 = vpack.c.bf16 %v4836_v27, %v4834_v26  ;;  %v3945_v27 = vsel %vm579_vm0, %v8389_v21, %v6560_v8  ;;  %v4850_v21 = vld [vmem:[%s9097_s10 + $0x1e0] sm:$0xff]  ;;  %v4862_v8 = vld [vmem:[%s9099_s12 + $0x138] sm:$0xff] }
0x1ca4   :  { %v6286_v52 = vpack.c.bf16 %v4852_v43, %v4850_v21  ;;  %v4886_v21 = vld [vmem:[%s9099_s12 + $0x1f8] sm:$0xff] }
0x1ca5   :  { %6271 = vmatpush1.bf16.msra.mxu1 %v8657_v22 }
0x1ca6   :  { %6273 = vmatprep.subr.bf16.mxu1 %v8660_v7 }
0x1ca9   :  { %6275 = vmatpush1.bf16.msra.mxu1 %v8675_v34 }
0x1caa   :  { %6277 = vmatprep.subr.bf16.mxu1 %v8678_v55 }
0x1cad   :  { %6279 = vmatpush1.bf16.msra.mxu1 %v8693_v35 }
0x1cae   :  { %6281 = vmatprep.subr.bf16.mxu1 %v8696_v58 }
0x1cb1   :  { %6283 = vmatpush1.bf16.msra.mxu1 %v8705_v25 }
0x1cb2   :  { %6285 = vmatprep.subr.bf16.mxu1 %v6284_v48 }
0x1cb5   :  { %6287 = vmatpush1.bf16.msra.mxu1 %v6286_v52 }
0x1cb6   :  { %6321 = vmatprep.subr.bf16.mxu1 %v8586_v5  ;;  %v4936_v5 = vld [vmem:[%s9096_s9 + $0x1] ss:$0 sm:$0xff] }
0x1d11   :  { %v6553_v59 = vpop.permute.xlu0 %6552 }
0x1d12   :  { %v6555_v38 = vunpack.i.h.bf16 %v6553_v59  ;;  %v6554_v49 = vunpack.i.l.bf16 %v6553_v59 }
0x1d14   :  { %v3950_v53 = vsel %vm1733_vm3, %v3946_v16, %v6554_v49  ;;  %v3951_v57 = vsel %vm1733_vm3, %v3947_v3, %v6555_v38  ;;  %v4861_v3 = vld [vmem:[%s9099_s12 + $0x130] sm:$0xff]  ;;  %v4879_v16 = vld [vmem:[%s9099_s12 + $0x1c0] sm:$0xff] }
0x1d15   :  { %v6563_v41 = vpop.permute.xlu0 %6562  ;;  %5738 = vmatprep.mubr.f32.mxu0 %v3950_v53  ;;  %v6568_v1 = vpop.permute.xlu1 %6567  ;;  %v8842_v17 = vpack.c.bf16 %v4862_v8, %v4861_v3  ;;  %v4880_v53 = vld [vmem:[%s9099_s12 + $0x1c8] sm:$0xff] }
0x1d16   :  { %v6565_v63 = vunpack.i.h.bf16 %v6563_v41  ;;  %v6564_v50 = vunpack.i.l.bf16 %v6563_v41  ;;  %v6570_v61 = vunpack.i.h.bf16 %v6568_v1  ;;  %v6569_v26 = vunpack.i.l.bf16 %v6568_v1  ;;  %5739 = vmatmul.mubr.f32.vlgmr.msra.gmra.mrb[56].mxu0 %v3951_v57  ;;  %v4863_v41 = vld [vmem:[%s9099_s12 + $0x140] sm:$0xff]  ;;  %v4864_v1 = vld [vmem:[%s9099_s12 + $0x148] sm:$0xff] }
0x1d17   :  { %6291 = vmatpush3.bf16.msra.mxu0 %v8752_v13  ;;  %v8852_v57 = vpack.c.bf16 %v4880_v53, %v4879_v16 }
0x1d18   :  { %v3948_v29 = vsel %vm1728_vm2, %v3944_v11, %v6564_v50  ;;  %v3949_v32 = vsel %vm1728_vm2, %v3945_v27, %v6565_v63  ;;  %v8860_v63 = vpack.c.bf16 %v4864_v1, %v4863_v41  ;;  %v4881_v50 = vld [vmem:[%s9099_s12 + $0x1d0] sm:$0xff]  ;;  %v4866_v27 = vld [vmem:[%s9099_s12 + $0x158] sm:$0xff] }
0x1d19   :  { %v3952_v10 = vsel %vm1733_vm3, %v3948_v29, %v6569_v26  ;;  %v3953_v31 = vsel %vm1733_vm3, %v3949_v32, %v6570_v61  ;;  %v4882_v61 = vld [vmem:[%s9099_s12 + $0x1d8] sm:$0xff]  ;;  %v4865_v11 = vld [vmem:[%s9099_s12 + $0x150] sm:$0xff]  ;;  %v4883_v32 = vld [vmem:[%s9099_s12 + $0x1e0] sm:$0xff] }
0x1d1a   :  { %5741 = vmatprep.mubr.f32.mxu0 %v3952_v10  ;;  %v8870_v26 = vpack.c.bf16 %v4882_v61, %v4881_v50  ;;  %v8878_v29 = vpack.c.bf16 %v4866_v27, %v4865_v11  ;;  %v4884_v10 = vld [vmem:[%s9099_s12 + $0x1e8] sm:$0xff] }
0x1d1b   :  { %5742 = vmatmul.mubr.f32.gmra.mrb[58].mxu0 %v3953_v31  ;;  %v4867_v31 = vld [vmem:[%s9099_s12 + $0x160] sm:$0xff]  ;;  %v8890_v19 = vpack.c.bf16 %v4884_v10, %v4883_v32 }
0x1d1c   :  { %v8902_v43 = vpack.c.bf16 %v4868_v12, %v4867_v31 }
0x1de9   :  { %v5740_v9 = vpop.f32.mrb[56].mxu0 }
0x1dea   :  { %v4026_v62 = vpop.f32.mrb[57].mxu0  ;;  %v4032_v23 = vadd.f32 %v5740_v9, %v4936_v5  ;;  %v8926_v9 = vrot.slane %v4854_v46, %v7241_v0 }
0x1deb   :  { %v4027_v37 = vadd.f32 %v4936_v5, %v4026_v62 }
0x1dec   :  { %v8766_v38 = vadd.f32 %v4032_v23, %v8098_v45 }
0x1ded   :  { %v8760_v33 = vadd.f32 %v4027_v37, %v8093_v14 }
0x1dee   :  { %v5743_v59 = vpop.f32.mrb[58].mxu0 }
0x1def   :  { %v4036_v28 = vpop.f32.mrb[59].mxu0  ;;  %4125 = vmatmul.mubr.f32.vlgmr.msra.gmra.mrb[76].mxu1 %v8760_v33  ;;  %v4042_v14 = vadd.f32 %v5743_v59, %v4936_v5 }
0x1df0   :  { %4130 = vmatprep.mubr.f32.mxu1 %v6833_v42  ;;  %6323 = vmatpush1.bf16.msra.mxu1 %v8597_v18  ;;  %v4037_v49 = vadd.f32 %v4936_v5, %v4036_v28  ;;  %v8923_v5 = vrot.slane %v4854_v46, %v7235_v60 }
0x1df1   :  { %6325 = vmatprep.subr.bf16.mxu1 %v8599_v4  ;;  %v8780_v45 = vadd.f32 %v4042_v14, %v8108_v44  ;;  %v4874_v44 = vld [vmem:[%s9099_s12 + $0x198] sm:$0xff]  ;;  %v4857_v4 = vld [vmem:[%s9099_s12 + $0x110] sm:$0xff] }
0x1df2   :  { %v8773_v2 = vadd.f32 %v4037_v49, %v8103_v54  ;;  %v4873_v54 = vld [vmem:[%s9099_s12 + $0x190] sm:$0xff] }
0x1df3   :  { %4131 = vmatmul.mubr.f32.gmra.mrb[78].mxu1 %v8766_v38  ;;  %v8798_v18 = vpack.c.bf16 %v4874_v44, %v4873_v54 }
0x1df4   :  { %4136 = vmatprep.mubr.f32.mxu1 %v6833_v42  ;;  %6327 = vmatpush1.bf16.msra.mxu1 %v8617_v36  ;;  %v4858_v36 = vld [vmem:[%s9099_s12 + $0x118] sm:$0xff] }
0x1df5   :  { %6329 = vmatprep.subr.bf16.mxu1 %v8619_v40  ;;  %v8806_v40 = vpack.c.bf16 %v4858_v36, %v4857_v4  ;;  %6293 = vmatprep.subr.bf16.mxu0 %v8798_v18 }
0x1df7   :  { %4137 = vmatmul.mubr.f32.gmra.mrb[80].mxu1 %v8773_v2  ;;  %6295 = vmatpush3.bf16.msra.mxu0 %v8806_v40 }
0x1df8   :  { %4142 = vmatprep.mubr.f32.mxu1 %v6833_v42  ;;  %6331 = vmatpush1.bf16.msra.mxu1 %v8639_v15  ;;  %v4875_v15 = vld [vmem:[%s9099_s12 + $0x1a0] sm:$0xff] }
0x1df9   :  { %6333 = vmatprep.subr.bf16.mxu1 %v8642_v20  ;;  %v4876_v20 = vld [vmem:[%s9099_s12 + $0x1a8] sm:$0xff] }
0x1dfb   :  { %4143 = vmatmul.mubr.f32.gmra.mrb[82].mxu1 %v8780_v45 }
0x1dfc   :  { %6335 = vmatpush1.bf16.msra.mxu1 %v8657_v22  ;;  %4436 = vmatprep.mubr.f32.mxu1 %v6833_v42  ;;  %v8816_v22 = vpack.c.bf16 %v4876_v20, %v4875_v15 }
0x1dfd   :  { %6337 = vmatprep.subr.bf16.mxu1 %v8660_v7  ;;  %v4859_v7 = vld [vmem:[%s9099_s12 + $0x120] sm:$0xff] }
0x1dfe   :  { %6297 = vmatprep.subr.bf16.mxu0 %v8816_v22 }
0x1e00   :  { %6339 = vmatpush1.bf16.msra.mxu1 %v8675_v34  ;;  %v4860_v34 = vld [vmem:[%s9099_s12 + $0x128] sm:$0xff] }
0x1e01   :  { %6341 = vmatprep.subr.bf16.mxu1 %v8678_v55  ;;  %v8824_v55 = vpack.c.bf16 %v4860_v34, %v4859_v7 }
0x1e03   :  { %6299 = vmatpush3.bf16.msra.mxu0 %v8824_v55 }
0x1e04   :  { %6343 = vmatpush1.bf16.msra.mxu1 %v8693_v35  ;;  %v4877_v35 = vld [vmem:[%s9099_s12 + $0x1b0] sm:$0xff] }
0x1e05   :  { %6345 = vmatprep.subr.bf16.mxu1 %v8696_v58  ;;  %v4878_v58 = vld [vmem:[%s9099_s12 + $0x1b8] sm:$0xff] }
0x1e08   :  { %6347 = vmatpush1.bf16.msra.mxu1 %v8705_v25  ;;  %v8834_v25 = vpack.c.bf16 %v4878_v58, %v4877_v35 }
0x1e09   :  { %6349 = vmatprep.subr.bf16.mxu1 %v6284_v48  ;;  %v4885_v48 = vld [vmem:[%s9099_s12 + $0x1f0] sm:$0xff] }
0x1e0a   :  { %6301 = vmatprep.subr.bf16.mxu0 %v8834_v25 }
0x1e0b   :  { %6303 = vmatpush3.bf16.msra.mxu0 %v8842_v17 }
0x1e0c   :  { %6351 = vmatpush1.bf16.msra.mxu1 %v6286_v52  ;;  %6305 = vmatprep.subr.bf16.mxu0 %v8852_v57  ;;  %v8905_v52 = vpack.c.bf16 %v4886_v21, %v4885_v48 }
0x1e0f   :  { %6307 = vmatpush3.bf16.msra.mxu0 %v8860_v63 }
0x1e10   :  { %6309 = vmatprep.subr.bf16.mxu0 %v8870_v26 }
0x1e13   :  { %6311 = vmatpush3.bf16.msra.mxu0 %v8878_v29 }
0x1e14   :  { %6313 = vmatprep.subr.bf16.mxu0 %v8890_v19 }
0x1e17   :  { %6315 = vmatpush3.bf16.msra.mxu0 %v8902_v43 }
0x1e18   :  { %6317 = vmatprep.subr.bf16.mxu0 %v8905_v52 }
0x1e1b   :  { %6319 = vmatpush3.bf16.msra.mxu0 %v8914_v47 }
0x1e1c   :  { %6353 = vmatprep.subr.bf16.mxu0 %v8747_v51 }
0x1ec2   :  { %v4126_v62 = vpop.f32.mrb[76].mxu1 }
0x1ec3   :  { %v8929_v37 = vadd.f32 %v4126_v62, %v8923_v5  ;;  %v4128_v23 = vpop.f32.mrb[77].mxu1 }
0x1ec4   :  { %v4129_v59 = vadd.f32 %v4128_v23, %v8926_v9 }
0x1ec5   :  { %v4157_v28 = vmul.f32 0.044715, %v8929_v37 }
0x1ec6   :  { %v4158_v51 = vmul.f32 0.044715, %v4129_v59  ;;  %v4132_v49 = vpop.f32.mrb[78].mxu1 }
0x1ec7   :  { %v4165_v14 = vmul.f32 %v4157_v28, %v8929_v37  ;;  %v8935_v54 = vadd.f32 %v4132_v49, %v8923_v5  ;;  %v4134_v60 = vpop.f32.mrb[79].mxu1 }
0x1ec8   :  { %v4166_v44 = vmul.f32 %v4158_v51, %v4129_v59  ;;  %v8938_v0 = vadd.f32 %v4134_v60, %v8926_v9 }
0x1ec9   :  { %v4173_v4 = vmul.f32 %v4165_v14, %v8929_v37  ;;  %v4159_v36 = vmul.f32 0.044715, %v8935_v54 }
0x1eca   :  { %v4160_v15 = vmul.f32 0.044715, %v8938_v0  ;;  %v4138_v20 = vpop.f32.mrb[80].mxu1  ;;  %v4174_v7 = vmul.f32 %v4166_v44, %v4129_v59 }
0x1ecb   :  { %v4181_v34 = vadd.f32 %v4173_v4, %v8929_v37  ;;  %v4167_v35 = vmul.f32 %v4159_v36, %v8935_v54  ;;  %v8946_v58 = vadd.f32 %v4138_v20, %v8923_v5  ;;  %v4140_v3 = vpop.f32.mrb[81].mxu1 }
0x1ecc   :  { %v4168_v8 = vmul.f32 %v4160_v15, %v8938_v0  ;;  %v8950_v16 = vadd.f32 %v4140_v3, %v8926_v9  ;;  %v4182_v53 = vadd.f32 %v4174_v7, %v4129_v59 }
0x1ecd   :  { %v4189_v41 = vmul.f32 0.7978846, %v4181_v34  ;;  %v4161_v1 = vmul.f32 0.044715, %v8946_v58  ;;  %v4175_v50 = vmul.f32 %v4167_v35, %v8935_v54 }
0x1ece   :  { %v4162_v61 = vmul.f32 0.044715, %v8950_v16  ;;  %v4144_v11 = vpop.f32.mrb[82].mxu1  ;;  %v4190_v27 = vmul.f32 0.7978846, %v4182_v53  ;;  %v4176_v32 = vmul.f32 %v4168_v8, %v8938_v0 }
0x1ecf   :  { %6755 = vtanh.f32 %v4189_v41  ;;  %v4169_v10 = vmul.f32 %v4161_v1, %v8946_v58  ;;  %v8958_v31 = vadd.f32 %v4144_v11, %v8923_v5  ;;  %v4146_v12 = vpop.f32.mrb[83].mxu1  ;;  %v4183_v48 = vadd.f32 %v4175_v50, %v8935_v54 }
0x1ed0   :  { %v4170_v21 = vmul.f32 %v4162_v61, %v8950_v16  ;;  %v4147_v30 = vadd.f32 %v4146_v12, %v8926_v9  ;;  %6757 = vtanh.f32 %v4190_v27  ;;  %v4184_v39 = vadd.f32 %v4176_v32, %v8938_v0 }
0x1ed1   :  { %v4163_v46 = vmul.f32 0.044715, %v8958_v31  ;;  %v4191_v62 = vmul.f32 0.7978846, %v4183_v48  ;;  %v4177_v23 = vmul.f32 %v4169_v10, %v8946_v58  ;;  %v4150_v50 = vmul.f32 0.5, %v4129_v59 }
0x1ed2   :  { %v4164_v28 = vmul.f32 0.044715, %v4147_v30  ;;  %v4192_v51 = vmul.f32 0.7978846, %v4184_v39  ;;  %v4178_v49 = vmul.f32 %v4170_v21, %v8950_v16  ;;  %v4149_v11 = vmul.f32 0.5, %v8929_v37 }
0x1ed3   :  { %v4171_v14 = vmul.f32 %v4163_v46, %v8958_v31  ;;  %6759 = vtanh.f32 %v4191_v62  ;;  %v4185_v60 = vadd.f32 %v4177_v23, %v8946_v58  ;;  %v4152_v21 = vmul.f32 0.5, %v8938_v0 }
0x1ed4   :  { %v4172_v44 = vmul.f32 %v4164_v28, %v4147_v30  ;;  %6761 = vtanh.f32 %v4192_v51  ;;  %v4186_v4 = vadd.f32 %v4178_v49, %v8950_v16  ;;  %v4151_v46 = vmul.f32 0.5, %v8935_v54 }
0x1ed5   :  { %v4193_v36 = vmul.f32 0.7978846, %v4185_v60  ;;  %v4179_v15 = vmul.f32 %v4171_v14, %v8958_v31  ;;  %v4154_v51 = vmul.f32 0.5, %v8950_v16  ;;  %v4153_v0 = vmul.f32 0.5, %v8946_v58 }
0x1ed6   :  { %v4194_v20 = vmul.f32 0.7978846, %v4186_v4  ;;  %v4180_v7 = vmul.f32 %v4172_v44, %v4147_v30 }
0x1ed7   :  { %6763 = vtanh.f32 %v4193_v36  ;;  %v4187_v34 = vadd.f32 %v4179_v15, %v8958_v31 }
0x1ed8   :  { %6765 = vtanh.f32 %v4194_v20  ;;  %v4188_v35 = vadd.f32 %v4180_v7, %v4147_v30 }
0x1ed9   :  { %v6756_v3 = vpop.eup %6755  ;;  %v4195_v8 = vmul.f32 0.7978846, %v4187_v34 }
0x1eda   :  { %v6758_v53 = vpop.eup %6757  ;;  %v4205_v41 = vadd.f32 1.0, %v6756_v3  ;;  %v4196_v1 = vmul.f32 0.7978846, %v4188_v35 }
0x1edb   :  { %v4206_v61 = vadd.f32 1.0, %v6758_v53  ;;  %6767 = vtanh.f32 %v4195_v8 }
0x1edc   :  { %6769 = vtanh.f32 %v4196_v1  ;;  %v4213_v12 = vmul.f32 %v4205_v41, %v4149_v11 }
0x1edd   :  { %v6760_v27 = vpop.eup %6759  ;;  %v4214_v32 = vmul.f32 %v4206_v61, %v4150_v50 }
0x1ede   :  { %v6762_v10 = vpop.eup %6761  ;;  %v4207_v48 = vadd.f32 1.0, %v6760_v27 }
0x1edf   :  { %4291 = vmatprep.mubr.f32.mxu0 %v4214_v32  ;;  %v4208_v39 = vadd.f32 1.0, %v6762_v10 }
0x1ee0   :  { %4292 = vmatmul.mubr.f32.vlgmr.msra.gmra.mrb[60].mxu0 %v4213_v12  ;;  %v4215_v28 = vmul.f32 %v4207_v48, %v4151_v46 }
0x1ee1   :  { %v6764_v62 = vpop.eup %6763  ;;  %v4216_v23 = vmul.f32 %v4208_v39, %v4152_v21  ;;  %6355 = vmatpush3.bf16.msra.mxu0 %v8752_v13  ;;  %v4156_v13 = vmul.f32 0.5, %v4147_v30 }
0x1ee2   :  { %v6766_v59 = vpop.eup %6765  ;;  %v4209_v37 = vadd.f32 1.0, %v6764_v62  ;;  %6357 = vmatprep.subr.bf16.mxu0 %v8798_v18  ;;  %v4155_v18 = vmul.f32 0.5, %v8958_v31 }
0x1ee3   :  { %4296 = vmatprep.mubr.f32.mxu0 %v4216_v23  ;;  %v4210_v49 = vadd.f32 1.0, %v6766_v59 }
0x1ee4   :  { %4297 = vmatmul.mubr.f32.gmra.mrb[62].mxu0 %v4215_v28  ;;  %v4217_v44 = vmul.f32 %v4209_v37, %v4153_v0 }
0x1ee5   :  { %v6768_v14 = vpop.eup %6767  ;;  %v4218_v60 = vmul.f32 %v4210_v49, %v4154_v51  ;;  %6359 = vmatpush3.bf16.msra.mxu0 %v8806_v40 }
0x1ee6   :  { %v6770_v54 = vpop.eup %6769  ;;  %v4211_v4 = vadd.f32 1.0, %v6768_v14  ;;  %6361 = vmatprep.subr.bf16.mxu0 %v8816_v22  ;;  %v8996_v22 = vld [vmem:[%s9100_s13 + $0x1] ss:$0 sm:$0xff]  ;;  %v6808_v14 = vld [vmem:[%s9092_s5 + $0x4] sm:$0xf] }
0x1ee7   :  { %4301 = vmatprep.mubr.f32.mxu0 %v4218_v60  ;;  %v4212_v36 = vadd.f32 1.0, %v6770_v54  ;;  %v4359_v60 = vrot.slane %v6808_v14, %v7257_v24 }
0x1ee8   :  { %4302 = vmatmul.mubr.f32.gmra.mrb[64].mxu0 %v4217_v44  ;;  %v4219_v15 = vmul.f32 %v4211_v4, %v4155_v18 }
0x1ee9   :  { %v4220_v16 = vmul.f32 %v4212_v36, %v4156_v13  ;;  %6363 = vmatpush3.bf16.msra.mxu0 %v8824_v55  ;;  %v4367_v13 = vrot.slane %v6808_v14, %v2150_v6 }
0x1eea   :  { %6365 = vmatprep.subr.bf16.mxu0 %v8834_v25 }
0x1eeb   :  { %4306 = vmatprep.mubr.f32.mxu0 %v4220_v16 }
0x1eec   :  { %4307 = vmatmul.mubr.f32.gmra.mrb[66].mxu0 %v4219_v15 }
0x1eed   :  { %6367 = vmatpush3.bf16.msra.mxu0 %v8842_v17 }
0x1eee   :  { %6369 = vmatprep.subr.bf16.mxu0 %v8852_v57 }
0x1ef1   :  { %6371 = vmatpush3.bf16.msra.mxu0 %v8860_v63 }
0x1ef2   :  { %6373 = vmatprep.subr.bf16.mxu0 %v8870_v26 }
0x1ef5   :  { %6375 = vmatpush3.bf16.msra.mxu0 %v8878_v29 }
0x1ef6   :  { %6377 = vmatprep.subr.bf16.mxu0 %v8890_v19 }
0x1ef9   :  { %6379 = vmatpush3.bf16.msra.mxu0 %v8902_v43 }
0x1efa   :  { %6381 = vmatprep.subr.bf16.mxu0 %v8905_v52 }
0x1efd   :  { %6383 = vmatpush3.bf16.msra.mxu0 %v8914_v47 }
0x1fb3   :  { %v5312_v40 = vpop.f32.mrb[60].mxu0 }
0x1fb4   :  { %v5313_v55 = vpop.f32.mrb[61].mxu0 }
0x1fb5   :  { %v5314_v25 = vadd.f32 %v5313_v55, %v5312_v40 }
0x1fb7   :  { %v4294_v17 = vadd.f32 %v5314_v25, %v8996_v22  ;;  %v5315_v57 = vpop.f32.mrb[62].mxu0 }
0x1fb8   :  { %v5316_v63 = vpop.f32.mrb[63].mxu0 }
0x1fb9   :  { %v5317_v26 = vadd.f32 %v5316_v63, %v5315_v57  ;;  %4312 = vadd.xlane.f32.xlu0 %v4294_v17 }
0x1fbb   :  { %v4299_v29 = vadd.f32 %v5317_v26, %v8996_v22  ;;  %v5318_v19 = vpop.f32.mrb[64].mxu0 }
0x1fbc   :  { %v5319_v43 = vpop.f32.mrb[65].mxu0 }
0x1fbd   :  { %v5320_v52 = vadd.f32 %v5319_v43, %v5318_v19  ;;  %4314 = vadd.xlane.f32.xlu1 %v4299_v29 }
0x1fbf   :  { %v4304_v47 = vadd.f32 %v5320_v52, %v8996_v22  ;;  %v5321_v58 = vpop.f32.mrb[66].mxu0 }
0x1fc0   :  { %v5322_v31 = vpop.f32.mrb[67].mxu0 }
0x1fc1   :  { %v5323_v30 = vadd.f32 %v5322_v31, %v5321_v58  ;;  %4316 = vadd.xlane.f32.xlu0 %v4304_v47 }
0x1fc3   :  { %v4309_v20 = vadd.f32 %v5323_v30, %v8996_v22 }
0x1fc5   :  { %4318 = vadd.xlane.f32.xlu0 %v4309_v20 }
0x2046   :  { %v4313_v7 = vpop.xlane.xlu0 %4312 }
0x2047   :  { %v4320_v34 = vmul.f32 0.0078125, %v4313_v7 }
0x2049   :  { %v4324_v35 = vsub.f32 %v4294_v17, %v4320_v34 }
0x204a   :  { %v4315_v3 = vpop.xlane.xlu1 %4314 }
0x204b   :  { %v4321_v8 = vmul.f32 0.0078125, %v4315_v3  ;;  %v4328_v53 = vmul.f32 %v4324_v35, %v4324_v35 }
0x204d   :  { %v4325_v41 = vsub.f32 %v4299_v29, %v4321_v8  ;;  %4332 = vadd.xlane.f32.xlu0 %v4328_v53 }
0x204e   :  { %v4317_v1 = vpop.xlane.xlu0 %4316 }
0x204f   :  { %v4322_v50 = vmul.f32 0.0078125, %v4317_v1  ;;  %v4329_v61 = vmul.f32 %v4325_v41, %v4325_v41 }
0x2051   :  { %v4326_v11 = vsub.f32 %v4304_v47, %v4322_v50  ;;  %4334 = vadd.xlane.f32.xlu1 %v4329_v61 }
0x2052   :  { %v4319_v27 = vpop.xlane.xlu0 %4318 }
0x2053   :  { %v4323_v32 = vmul.f32 0.0078125, %v4319_v27  ;;  %v4330_v10 = vmul.f32 %v4326_v11, %v4326_v11 }
0x2055   :  { %v4327_v12 = vsub.f32 %v4309_v20, %v4323_v32  ;;  %4336 = vadd.xlane.f32.xlu0 %v4330_v10 }
0x2057   :  { %v4331_v48 = vmul.f32 %v4327_v12, %v4327_v12 }
0x2059   :  { %4338 = vadd.xlane.f32.xlu1 %v4331_v48 }
0x20da   :  { %v4333_v21 = vpop.xlane.xlu0 %4332 }
0x20db   :  { %v4340_v39 = vmul.f32 0.0078125, %v4333_v21 }
0x20dd   :  { %v4344_v46 = vadd.f32 1e-06, %v4340_v39 }
0x20de   :  { %v4335_v62 = vpop.xlane.xlu1 %4334 }
0x20df   :  { %6771 = vrsqrt.f32 %v4344_v46  ;;  %v4341_v23 = vmul.f32 0.0078125, %v4335_v62 }
0x20e1   :  { %v4345_v59 = vadd.f32 1e-06, %v4341_v23 }
0x20e2   :  { %v4337_v28 = vpop.xlane.xlu0 %4336 }
0x20e3   :  { %6773 = vrsqrt.f32 %v4345_v59  ;;  %v4342_v37 = vmul.f32 0.0078125, %v4337_v28 }
0x20e5   :  { %v4346_v51 = vadd.f32 1e-06, %v4342_v37 }
0x20e6   :  { %v4339_v49 = vpop.xlane.xlu1 %4338 }
0x20e7   :  { %6775 = vrsqrt.f32 %v4346_v51  ;;  %v4343_v0 = vmul.f32 0.0078125, %v4339_v49 }
0x20e9   :  { %v6772_v54 = vpop.eup %6771  ;;  %v4347_v44 = vadd.f32 1e-06, %v4343_v0 }
0x20ea   :  { %v4352_v4 = vmul.f32 %v6772_v54, %v4324_v35 }
0x20eb   :  { %6777 = vrsqrt.f32 %v4347_v44 }
0x20ec   :  { %v4360_v36 = vmul.f32 %v4359_v60, %v4352_v4 }
0x20ed   :  { %v6774_v18 = vpop.eup %6773 }
0x20ee   :  { %v4368_v16 = vadd.f32 %v4367_v13, %v4360_v36  ;;  %v4353_v15 = vmul.f32 %v6774_v18, %v4325_v41 }
0x20f0   :  { %4437 = vmatmul.mubr.f32.vlgmr.msra.gmra.mrb[84].mxu1 %v4368_v16  ;;  %v4361_v40 = vmul.f32 %v4359_v60, %v4353_v15 }
0x20f1   :  { %v6776_v55 = vpop.eup %6775  ;;  %4442 = vmatprep.mubr.f32.mxu1 %v6833_v42 }
0x20f2   :  { %v4369_v25 = vadd.f32 %v4367_v13, %v4361_v40  ;;  %v4354_v17 = vmul.f32 %v6776_v55, %v4326_v11 }
0x20f4   :  { %4443 = vmatmul.mubr.f32.gmra.mrb[86].mxu1 %v4369_v25  ;;  %v4362_v24 = vmul.f32 %v4359_v60, %v4354_v17 }
0x20f5   :  { %v6778_v57 = vpop.eup %6777  ;;  %4448 = vmatprep.mubr.f32.mxu1 %v6833_v42 }
0x20f6   :  { %v4370_v63 = vadd.f32 %v4367_v13, %v4362_v24  ;;  %v4355_v56 = vmul.f32 %v6778_v57, %v4327_v12 }
0x20f8   :  { %4449 = vmatmul.mubr.f32.gmra.mrb[88].mxu1 %v4370_v63  ;;  %v4363_v6 = vmul.f32 %v4359_v60, %v4355_v56 }
0x20f9   :  { %4454 = vmatprep.mubr.f32.mxu1 %v6833_v42 }
0x20fa   :  { %v4371_v26 = vadd.f32 %v4367_v13, %v4363_v6 }
0x20fc   :  { %4455 = vmatmul.mubr.f32.gmra.mrb[90].mxu1 %v4371_v26 }
0x21c3   :  { %v4438_v29 = vpop.f32.mrb[84].mxu1 }
0x21c4   :  { %v9012_v19 = vadd.f32 %v4438_v29, %v8923_v5  ;;  %v4440_v43 = vpop.f32.mrb[85].mxu1 }
0x21c5   :  { %v4441_v52 = vadd.f32 %v4440_v43, %v8926_v9 }
0x21c6   :  { %v4469_v47 = vmul.f32 0.044715, %v9012_v19 }
0x21c7   :  { %v4470_v58 = vmul.f32 0.044715, %v4441_v52  ;;  %v4444_v31 = vpop.f32.mrb[86].mxu1  ;;  %v4462_v29 = vmul.f32 0.5, %v4441_v52 }
0x21c8   :  { %v4477_v30 = vmul.f32 %v4469_v47, %v9012_v19  ;;  %v9018_v20 = vadd.f32 %v4444_v31, %v8923_v5  ;;  %v4446_v7 = vpop.f32.mrb[87].mxu1  ;;  %v4461_v47 = vmul.f32 0.5, %v9012_v19 }
0x21c9   :  { %v4478_v42 = vmul.f32 %v4470_v58, %v4441_v52  ;;  %v9021_v34 = vadd.f32 %v4446_v7, %v8926_v9 }
0x21ca   :  { %v4485_v35 = vmul.f32 %v4477_v30, %v9012_v19  ;;  %v4471_v3 = vmul.f32 0.044715, %v9018_v20 }
0x21cb   :  { %v4472_v8 = vmul.f32 0.044715, %v9021_v34  ;;  %v4450_v53 = vpop.f32.mrb[88].mxu1  ;;  %v4486_v41 = vmul.f32 %v4478_v42, %v4441_v52 }
0x21cc   :  { %v4493_v1 = vadd.f32 %v4485_v35, %v9012_v19  ;;  %v4479_v50 = vmul.f32 %v4471_v3, %v9018_v20  ;;  %v9029_v61 = vadd.f32 %v4450_v53, %v8923_v5  ;;  %v4452_v11 = vpop.f32.mrb[89].mxu1  ;;  %v4464_v35 = vmul.f32 0.5, %v9021_v34 }
0x21cd   :  { %v4480_v27 = vmul.f32 %v4472_v8, %v9021_v34  ;;  %v9033_v32 = vadd.f32 %v4452_v11, %v8926_v9  ;;  %v4494_v10 = vadd.f32 %v4486_v41, %v4441_v52  ;;  %v4463_v8 = vmul.f32 0.5, %v9018_v20 }
0x21ce   :  { %v4501_v12 = vmul.f32 0.7978846, %v4493_v1  ;;  %v4473_v48 = vmul.f32 0.044715, %v9029_v61  ;;  %v4487_v21 = vmul.f32 %v4479_v50, %v9018_v20 }
0x21cf   :  { %v4474_v39 = vmul.f32 0.044715, %v9033_v32  ;;  %v4456_v46 = vpop.f32.mrb[90].mxu1  ;;  %v4502_v62 = vmul.f32 0.7978846, %v4494_v10  ;;  %v4488_v23 = vmul.f32 %v4480_v27, %v9021_v34  ;;  %v4466_v19 = vmul.f32 0.5, %v9033_v32 }
0x21d0   :  { %6779 = vtanh.f32 %v4501_v12  ;;  %v4481_v59 = vmul.f32 %v4473_v48, %v9029_v61  ;;  %v9041_v28 = vadd.f32 %v4456_v46, %v8923_v5  ;;  %v4458_v37 = vpop.f32.mrb[91].mxu1  ;;  %v4495_v51 = vadd.f32 %v4487_v21, %v9018_v20 }
0x21d1   :  { %v4482_v49 = vmul.f32 %v4474_v39, %v9033_v32  ;;  %v4459_v0 = vadd.f32 %v4458_v37, %v8926_v9  ;;  %6781 = vtanh.f32 %v4502_v62  ;;  %v4496_v14 = vadd.f32 %v4488_v23, %v9021_v34 }
0x21d2   :  { %v4475_v60 = vmul.f32 0.044715, %v9041_v28  ;;  %v4503_v54 = vmul.f32 0.7978846, %v4495_v51  ;;  %v4489_v44 = vmul.f32 %v4481_v59, %v9029_v61  ;;  %v4465_v27 = vmul.f32 0.5, %v9029_v61 }
0x21d3   :  { %v4476_v4 = vmul.f32 0.044715, %v4459_v0  ;;  %v4504_v13 = vmul.f32 0.7978846, %v4496_v14  ;;  %v4490_v5 = vmul.f32 %v4482_v49, %v9033_v32  ;;  %v4468_v39 = vmul.f32 0.5, %v4459_v0 }
0x21d4   :  { %v4483_v36 = vmul.f32 %v4475_v60, %v9041_v28  ;;  %6783 = vtanh.f32 %v4503_v54  ;;  %v4497_v18 = vadd.f32 %v4489_v44, %v9029_v61  ;;  %v4467_v46 = vmul.f32 0.5, %v9041_v28 }
0x21d5   :  { %v4484_v16 = vmul.f32 %v4476_v4, %v4459_v0  ;;  %6785 = vtanh.f32 %v4504_v13  ;;  %v4498_v9 = vadd.f32 %v4490_v5, %v9033_v32 }
0x21d6   :  { %v4505_v15 = vmul.f32 0.7978846, %v4497_v18  ;;  %v4491_v40 = vmul.f32 %v4483_v36, %v9041_v28 }
0x21d7   :  { %v4506_v55 = vmul.f32 0.7978846, %v4498_v9  ;;  %v4492_v25 = vmul.f32 %v4484_v16, %v4459_v0 }
0x21d8   :  { %6787 = vtanh.f32 %v4505_v15  ;;  %v4499_v17 = vadd.f32 %v4491_v40, %v9041_v28 }
0x21d9   :  { %6789 = vtanh.f32 %v4506_v55  ;;  %v4500_v24 = vadd.f32 %v4492_v25, %v4459_v0 }
0x21da   :  { %v6780_v57 = vpop.eup %6779  ;;  %v4507_v63 = vmul.f32 0.7978846, %v4499_v17 }
0x21db   :  { %v6782_v56 = vpop.eup %6781  ;;  %v4517_v6 = vadd.f32 1.0, %v6780_v57  ;;  %v4508_v26 = vmul.f32 0.7978846, %v4500_v24 }
0x21dc   :  { %v4518_v43 = vadd.f32 1.0, %v6782_v56  ;;  %6791 = vtanh.f32 %v4507_v63 }
0x21dd   :  { %6793 = vtanh.f32 %v4508_v26  ;;  %v4525_v7 = vmul.f32 %v4517_v6, %v4461_v47 }
0x21de   :  { %v6784_v58 = vpop.eup %6783  ;;  %v4526_v31 = vmul.f32 %v4518_v43, %v4462_v29 }
0x21df   :  { %v6786_v30 = vpop.eup %6785  ;;  %v4519_v42 = vadd.f32 1.0, %v6784_v58 }
0x21e0   :  { %4597 = vmatprep.mubr.f32.mxu0 %v4526_v31  ;;  %v4520_v3 = vadd.f32 1.0, %v6786_v30 }
0x21e1   :  { %4598 = vmatmul.mubr.f32.vlgmr.msra.gmra.mrb[68].mxu0 %v4525_v7  ;;  %v4527_v1 = vmul.f32 %v4519_v42, %v4463_v8 }
0x21e2   :  { %v6788_v53 = vpop.eup %6787  ;;  %v4528_v41 = vmul.f32 %v4520_v3, %v4464_v35 }
0x21e3   :  { %v6790_v52 = vpop.eup %6789  ;;  %v4521_v50 = vadd.f32 1.0, %v6788_v53 }
0x21e4   :  { %4602 = vmatprep.mubr.f32.mxu0 %v4528_v41  ;;  %v4522_v11 = vadd.f32 1.0, %v6790_v52  ;;  %v4938_v52 = vld [vmem:[%s9101_s14] ss:$0 sm:$0xff] }
0x21e5   :  { %4603 = vmatmul.mubr.f32.gmra.mrb[70].mxu0 %v4527_v1  ;;  %v4529_v34 = vmul.f32 %v4521_v50, %v4465_v27 }
0x21e6   :  { %v6792_v10 = vpop.eup %6791  ;;  %v4530_v12 = vmul.f32 %v4522_v11, %v4466_v19  ;;  %v4939_v19 = vld [vmem:[%s9101_s14 + $0x1] ss:$0 sm:$0xff]  ;;  %s6809_s14 = scalar_lea.vmem %s4694_s18, 512 }
0x21e7   :  { %v6794_v48 = vpop.eup %6793  ;;  %v4523_v21 = vadd.f32 1.0, %v6792_v10  ;;  %p6810_p0 = scmp.ne.s32.totalorder %s4694_s18, %s6809_s14  ;;  %p6815_p2 = scmp.lt.s32.totalorder %s6809_s14, %s6809_s14 }
0x21e8   :  { %4607 = vmatprep.mubr.f32.mxu0 %v4530_v12  ;;  %v4524_v20 = vadd.f32 1.0, %v6794_v48 }
0x21e9   :  { %4608 = vmatmul.mubr.f32.gmra.mrb[72].mxu0 %v4529_v34  ;;  %v4531_v23 = vmul.f32 %v4523_v21, %v4467_v46  ;;  %p6816_p3 = por %p6815_p2, %p6814_p1 }
0x21ea   :  { %v4532_v62 = vmul.f32 %v4524_v20, %v4468_v39 }
0x21eb   :  { %p6817_p4 = pnand %p6816_p3, %p6810_p0 }
0x21ec   :  { %4612 = vmatprep.mubr.f32.mxu0 %v4532_v62 }
0x21ed   :  { %4613 = vmatmul.mubr.f32.gmra.mrb[74].mxu0 %v4531_v23 }
0x22b4   :  { %v5356_v32 = vpop.f32.mrb[68].mxu0 }
0x22b5   :  { %v5357_v59 = vpop.f32.mrb[69].mxu0 }
0x22b6   :  { %v5358_v37 = vadd.f32 %v5357_v59, %v5356_v32 }
0x22b8   :  { %v4600_v61 = vadd.f32 %v5358_v37, %v8996_v22  ;;  %v5359_v51 = vpop.f32.mrb[70].mxu0 }
0x22b9   :  { %v5360_v49 = vpop.f32.mrb[71].mxu0 }
0x22ba   :  { %v5361_v14 = vadd.f32 %v5360_v49, %v5359_v51  ;;  %v4618_v60 = vadd.f32 %v4600_v61, %v8760_v33 }
0x22bc   :  { %v4605_v0 = vadd.f32 %v5361_v14, %v8996_v22  ;;  %4624 = vadd.xlane.f32.xlu0 %v4618_v60  ;;  %v5362_v54 = vpop.f32.mrb[72].mxu0 }
0x22bd   :  { %v5363_v44 = vpop.f32.mrb[73].mxu0 }
0x22be   :  { %v5364_v28 = vadd.f32 %v5363_v44, %v5362_v54  ;;  %v4619_v4 = vadd.f32 %v4605_v0, %v8766_v38 }
0x22c0   :  { %v4610_v13 = vadd.f32 %v5364_v28, %v8996_v22  ;;  %4626 = vadd.xlane.f32.xlu1 %v4619_v4  ;;  %v5365_v5 = vpop.f32.mrb[74].mxu0 }
0x22c1   :  { %v5366_v36 = vpop.f32.mrb[75].mxu0 }
0x22c2   :  { %v5367_v18 = vadd.f32 %v5366_v36, %v5365_v5  ;;  %v4620_v16 = vadd.f32 %v4610_v13, %v8773_v2 }
0x22c4   :  { %v4615_v9 = vadd.f32 %v5367_v18, %v8996_v22  ;;  %4628 = vadd.xlane.f32.xlu0 %v4620_v16 }
0x22c6   :  { %v4621_v33 = vadd.f32 %v4615_v9, %v8780_v45 }
0x22c8   :  { %4630 = vadd.xlane.f32.xlu1 %v4621_v33 }
0x2349   :  { %v4625_v15 = vpop.xlane.xlu0 %4624 }
0x234a   :  { %v4632_v40 = vmul.f32 0.0078125, %v4625_v15 }
0x234c   :  { %v4636_v55 = vsub.f32 %v4618_v60, %v4632_v40 }
0x234d   :  { %v4627_v25 = vpop.xlane.xlu1 %4626 }
0x234e   :  { %v4633_v17 = vmul.f32 0.0078125, %v4627_v25  ;;  %v4640_v38 = vmul.f32 %v4636_v55, %v4636_v55 }
0x2350   :  { %v4637_v24 = vsub.f32 %v4619_v4, %v4633_v17  ;;  %4644 = vadd.xlane.f32.xlu0 %v4640_v38 }
0x2351   :  { %v4629_v57 = vpop.xlane.xlu0 %4628 }
0x2352   :  { %v4634_v63 = vmul.f32 0.0078125, %v4629_v57  ;;  %v4641_v56 = vmul.f32 %v4637_v24, %v4637_v24 }
0x2354   :  { %v4638_v6 = vsub.f32 %v4620_v16, %v4634_v63  ;;  %4646 = vadd.xlane.f32.xlu1 %v4641_v56 }
0x2355   :  { %v4631_v2 = vpop.xlane.xlu1 %4630 }
0x2356   :  { %v4635_v26 = vmul.f32 0.0078125, %v4631_v2  ;;  %v4642_v22 = vmul.f32 %v4638_v6, %v4638_v6 }
0x2358   :  { %v4639_v29 = vsub.f32 %v4621_v33, %v4635_v26  ;;  %4648 = vadd.xlane.f32.xlu0 %v4642_v22 }
0x235a   :  { %v4643_v45 = vmul.f32 %v4639_v29, %v4639_v29 }
0x235c   :  { %4650 = vadd.xlane.f32.xlu1 %v4643_v45 }
0x23dd   :  { %v4645_v43 = vpop.xlane.xlu0 %4644 }
0x23de   :  { %v4652_v47 = vmul.f32 0.0078125, %v4645_v43 }
0x23e0   :  { %v4656_v58 = vadd.f32 1e-06, %v4652_v47 }
0x23e1   :  { %v4647_v31 = vpop.xlane.xlu1 %4646 }
0x23e2   :  { %6795 = vrsqrt.f32 %v4656_v58  ;;  %v4653_v30 = vmul.f32 0.0078125, %v4647_v31 }
0x23e4   :  { %v4657_v7 = vadd.f32 1e-06, %v4653_v30 }
0x23e5   :  { %v4649_v42 = vpop.xlane.xlu0 %4648 }
0x23e6   :  { %6797 = vrsqrt.f32 %v4657_v7  ;;  %v4654_v35 = vmul.f32 0.0078125, %v4649_v42 }
0x23e8   :  { %v4658_v3 = vadd.f32 1e-06, %v4654_v35 }
0x23e9   :  { %v4651_v8 = vpop.xlane.xlu1 %4650 }
0x23ea   :  { %6799 = vrsqrt.f32 %v4658_v3  ;;  %v4655_v53 = vmul.f32 0.0078125, %v4651_v8 }
0x23ec   :  { %v6796_v41 = vpop.eup %6795  ;;  %v4659_v1 = vadd.f32 1e-06, %v4655_v53 }
0x23ed   :  { %v4664_v50 = vmul.f32 %v6796_v41, %v4636_v55 }
0x23ee   :  { %6801 = vrsqrt.f32 %v4659_v1 }
0x23ef   :  { %v4672_v11 = vmul.f32 %v4938_v52, %v4664_v50 }
0x23f0   :  { %v6798_v27 = vpop.eup %6797 }
0x23f1   :  { %v4665_v10 = vmul.f32 %v6798_v27, %v4637_v24  ;;  %v4680_v12 = vadd.f32 %v4939_v19, %v4672_v11 }
0x23f3   :  { %v4673_v48 = vmul.f32 %v4938_v52, %v4665_v10  ;;  %4684 = vst [vmem:[#allocation2] sm:$0xff] %v4680_v12 }
0x23f4   :  { %v6800_v34 = vpop.eup %6799 }
0x23f5   :  { %v4666_v21 = vmul.f32 %v6800_v34, %v4638_v6  ;;  %v4681_v39 = vadd.f32 %v4939_v19, %v4673_v48 }
0x23f7   :  { %v4674_v20 = vmul.f32 %v4938_v52, %v4666_v21  ;;  %4685 = vst [vmem:[#allocation2 + $0x8] sm:$0xff] %v4681_v39 }
0x23f8   :  { %v6802_v46 = vpop.eup %6801 }
0x23f9   :  { %v4682_v62 = vadd.f32 %v4939_v19, %v4674_v20  ;;  %v4667_v23 = vmul.f32 %v6802_v46, %v4639_v29 }
0x23fb   :  { %4686 = vst [vmem:[#allocation2 + $0x10] sm:$0xff] %v4682_v62  ;;  %v4675_v32 = vmul.f32 %v4938_v52, %v4667_v23 }
0x23fd   :  { %v4683_v59 = vadd.f32 %v4939_v19, %v4675_v32 }
0x23ff   :  { %4687 = vst [vmem:[#allocation2 + $0x18] sm:$0xff] %v4683_v59 }
0x2400   :  { %6820 = shalt.err (!%p6817_p4)
}
0x2401   :  { %s6821_s6 = scalar_lea.hbm %s9102_s15, 512 }
0x2402   :  { %p6822_p5 = scmp.ne.s32.totalorder %s9102_s15, %s6821_s6  ;;  %p6825_p6 = scmp.lt.u32.totalorder %s6821_s6, %s9102_s15 }
0x2404   :  { %p6827_p7 = pnand %p6825_p6, %p6822_p5 }
0x2406   :  { %6830 = shalt.err (!%p6827_p7)
}
0x2407   :  { %s6838_s10 = smov 128   ;;  %s6839_s23 = smov 8  }
0x2408   :  { %4699 = dma.vmem_to_hbm [thread:$0]  %s4694_s18, 512, %s9102_s15, [#allocation3], %s6838_s10, %s6838_s10, %s6839_s23  }
0x2409   :  { %6831 = dma.done.wait [#allocation3], 512  }
0x240a   :  { %6832 = vsyncadd [#allocation3], 4294966784 }
0x240b   :  { %4703 = vsyncpa [#allocation3], 1 }

</bundles_post_ra>
